<compile_context>
chip_gen: v7x
topology: tpu7x:2x2x1
jax: 0.10.0
libtpu: 0.0.40
codegen_flags: <defaults>
</compile_context>

<pallas_src>
import jax
import jax.numpy as jnp
from jax.experimental import pallas as pl
from jax.experimental.pallas import tpu as pltpu


def _round_up(x, m):
    return (x + m - 1) // m * m


def _cdiv(a, b):
    return (a + b - 1) // b


# Explicit scoped-VMEM budget: above the v5e default (16 MiB), below v7x
# physical (64 MiB); current tiles use only a few MiB.
_VMEM_LIMIT = 32 * 1024 * 1024


def _choose_tiles(M, tm_max, *, min_rows_to_split=16):
    """Pick an M tile: multiple of 8, grid >= 2 when the problem is big enough
    (v7x megacore), minimal pad waste."""
    tm_max = max(8, _round_up(tm_max, 8))
    Mr = _round_up(M, 8)
    ntiles = _cdiv(Mr, tm_max)
    if ntiles < 2 and Mr >= min_rows_to_split:
        ntiles = 2
    tm = _round_up(_cdiv(M, ntiles), 8)
    Mp = _round_up(M, tm)
    return tm, Mp


# ----------------------------------------------------------------------------
# Fused conv (valid) + bias + ReLU + 2x2/2 max-pool  (GEMM with pooled epilogue)
# ----------------------------------------------------------------------------
def _conv_relu_pool_kernel(x_ref, w_ref, b_ref, o_ref):
    # x_ref: (4, TM, K) -- im2col patches for the 4 positions of each 2x2
    # pooling window; rows of every quarter are flat (b, oh_pooled, ow_pooled).
    # One MXU matmul per window position, max-pooled before bias + ReLU
    # (valid because x -> relu(x + b) is monotone increasing).
    w = w_ref[...]
    m = jnp.dot(x_ref[0], w, preferred_element_type=jnp.float32)
    for q in range(1, 4):
        m = jnp.maximum(m, jnp.dot(x_ref[q], w, preferred_element_type=jnp.float32))
    o_ref[...] = jnp.maximum(m + b_ref[...], 0.0).astype(o_ref.dtype)


def conv_relu_pool(a, wk, bk, kh, kw, cin, *, tm_max=512):
    """a: (B, H, W, Ca) bf16 NHWC; only channels [:cin] are used.
    wk: (Kp, N) bf16 packed weight, K order (kh, kw, cin) + zero tail.
    bk: (1, N) f32 bias (zero in padded output channels).
    Returns (B, OH//2, OW//2, N) bf16; padded output channels are exactly 0.
    """
    B, H, W, _ = a.shape
    OH, OW = H - kh + 1, W - kw + 1
    assert OH % 2 == 0 and OW % 2 == 0
    OHp, OWp = OH // 2, OW // 2
    Kp, N = wk.shape
    K = kh * kw * cin
    Mq = B * OHp * OWp

    # im2col glue directly in pooled-window-position-major order: quarter
    # (r, c) holds the patch rows of conv-output pixels (2*ohp + r, 2*owp + c).
    # TODO(synk): move this im2col fully in-kernel (kh*kw reduction grid axis)
    # to avoid materializing the patch matrix in HBM at large batch.
    quarters = []
    for r in range(2):
        for c in range(2):
            cols = [
                a[:, r + i: r + i + 2 * OHp - 1: 2,
                     c + j: c + j + 2 * OWp - 1: 2, :cin]
                for i in range(kh) for j in range(kw)
            ]
            quarters.append(jnp.concatenate(cols, axis=-1).reshape(Mq, K))
    x = jnp.stack(quarters, axis=0)                      # (4, Mq, K) bf16

    # Cap the M tile so the double-buffered 4-quarter patch tile stays small
    # (matters on v5e's 16 MiB scoped default and v7x's 64 MiB physical VMEM).
    tm_cap = min(tm_max, max(64, (4 << 20) // (Kp * 8)))
    tm, Mp = _choose_tiles(Mq, tm_cap)
    if Mp != Mq or Kp != K:
        x = jnp.pad(x, ((0, 0), (0, Mp - Mq), (0, Kp - K)))

    cost = pl.CostEstimate(
        flops=2 * 4 * Mp * Kp * N,
        transcendentals=0,
        bytes_accessed=4 * Mp * Kp * 2 + Kp * N * 2 + N * 4 + Mp * N * 2,
    )
    out = pl.pallas_call(
        _conv_relu_pool_kernel,
        out_shape=jax.ShapeDtypeStruct((Mp, N), jnp.bfloat16),
        grid=(Mp // tm,),
        in_specs=[
            pl.BlockSpec((4, tm, Kp), lambda i: (0, i, 0)),
            pl.BlockSpec((Kp, N), lambda i: (0, 0)),   # constant index -> no re-DMA
            pl.BlockSpec((1, N), lambda i: (0, 0)),
        ],
        out_specs=pl.BlockSpec((tm, N), lambda i: (i, 0)),
        compiler_params=pltpu.CompilerParams(
            dimension_semantics=("parallel",),
            vmem_limit_bytes=_VMEM_LIMIT),
        cost_estimate=cost,
    )(x, wk, bk)
    # Padded rows compute relu(0 + bias); they are sliced off here and never
    # consumed (pooling happened inside the kernel on real rows only).
    return out[:Mq].reshape(B, OHp, OWp, N)


# ----------------------------------------------------------------------------
# Fused fc1(relu) -> fc2(relu) -> fc3 in one pallas_call (all weights in VMEM)
# ----------------------------------------------------------------------------
def _fc_fused_kernel(x_ref, w1_ref, b1_ref, w2_ref, b2_ref, w3_ref, b3_ref, o_ref):
    h = jnp.dot(x_ref[...], w1_ref[...], preferred_element_type=jnp.float32)
    h = jnp.maximum(h + b1_ref[...], 0.0)
    h = jnp.dot(h.astype(jnp.bfloat16), w2_ref[...], preferred_element_type=jnp.float32)
    h = jnp.maximum(h + b2_ref[...], 0.0)
    h = jnp.dot(h.astype(jnp.bfloat16), w3_ref[...], preferred_element_type=jnp.float32)
    o_ref[...] = (h + b3_ref[...]).astype(o_ref.dtype)


def fc_fused(x, w1, b1, w2, b2, w3, b3, *, tm_max=512):
    B, K = x.shape
    N1, N2, N3 = w1.shape[1], w2.shape[1], w3.shape[1]
    tm, Bp = _choose_tiles(B, tm_max)
    xp = jnp.pad(x, ((0, Bp - B), (0, 0))) if Bp != B else x
    out = pl.pallas_call(
        _fc_fused_kernel,
        out_shape=jax.ShapeDtypeStruct((Bp, N3), jnp.float32),
        grid=(Bp // tm,),
        in_specs=[
            pl.BlockSpec((tm, K), lambda i: (i, 0)),
            pl.BlockSpec((K, N1), lambda i: (0, 0)),
            pl.BlockSpec((1, N1), lambda i: (0, 0)),
            pl.BlockSpec((N1, N2), lambda i: (0, 0)),
            pl.BlockSpec((1, N2), lambda i: (0, 0)),
            pl.BlockSpec((N2, N3), lambda i: (0, 0)),
            pl.BlockSpec((1, N3), lambda i: (0, 0)),
        ],
        out_specs=pl.BlockSpec((tm, N3), lambda i: (i, 0)),
        compiler_params=pltpu.CompilerParams(
            dimension_semantics=("parallel",),
            vmem_limit_bytes=_VMEM_LIMIT),
    )(xp, w1, b1, w2, b2, w3, b3)
    return out[:B]


# ----------------------------------------------------------------------------
# Parameters: PyTorch-style init + one-time packing (pad / permute / bf16 cast)
# ----------------------------------------------------------------------------
def init_params(key):
    def uni(k, shape, fan_in):
        bound = 1.0 / jnp.sqrt(jnp.float32(fan_in))
        return jax.random.uniform(k, shape, jnp.float32, -bound, bound)

    ks = jax.random.split(key, 10)
    return {
        "w1": uni(ks[0], (64, 3, 5, 5), 3 * 5 * 5),
        "b1": uni(ks[1], (64,), 3 * 5 * 5),
        "w2": uni(ks[2], (16, 64, 5, 5), 64 * 5 * 5),
        "b2": uni(ks[3], (16,), 64 * 5 * 5),
        "wf1": uni(ks[4], (120, 400), 400),
        "bf1": uni(ks[5], (120,), 400),
        "wf2": uni(ks[6], (84, 120), 120),
        "bf2": uni(ks[7], (84,), 120),
        "wf3": uni(ks[8], (10, 84), 84),
        "bf3": uni(ks[9], (10,), 84),
    }


def _pack_conv(w, b):
    cout, cin, kh, kw = w.shape
    wk = w.transpose(2, 3, 1, 0).reshape(kh * kw * cin, cout)   # K order (kh, kw, cin)
    K = wk.shape[0]
    Kp, Np = _round_up(K, 128), _round_up(cout, 128)
    wk = jnp.pad(wk, ((0, Kp - K), (0, Np - cout))).astype(jnp.bfloat16)
    bk = jnp.pad(b, (0, Np - cout)).astype(jnp.float32)[None, :]
    return wk, bk


def _pack_fc(wf, bf):
    nout, kin = wf.shape
    Kp, Np = _round_up(kin, 128), _round_up(nout, 128)
    wk = jnp.pad(wf.T, ((0, Kp - kin), (0, Np - nout))).astype(jnp.bfloat16)
    bk = jnp.pad(bf, (0, Np - nout)).astype(jnp.float32)[None, :]
    return wk, bk


def prepare_params(p):
    """One-time weight packing: lane padding to 128, compact K orders, bf16."""
    w1, b1 = _pack_conv(p["w1"], p["b1"])                 # K 75 -> 128,   N 64 -> 128
    w2, b2 = _pack_conv(p["w2"], p["b2"])                 # K 1600 -> 1664, N 16 -> 128
    # fc1 consumes the 16 real channels flattened in (h, w, c) order;
    # PyTorch's x.view(-1, 400) is (c, h, w) order -> permute the columns.
    wf1 = p["wf1"].reshape(120, 16, 5, 5).transpose(0, 2, 3, 1).reshape(120, 400)
    wf1, bf1 = _pack_fc(wf1, p["bf1"])                    # (512, 128)
    wf2, bf2 = _pack_fc(p["wf2"], p["bf2"])               # (128, 128)
    wf3, bf3 = _pack_fc(p["wf3"], p["bf3"])               # (128, 128)
    return {"w1": w1, "b1": b1, "w2": w2, "b2": b2,
            "wf1": wf1, "bf1": bf1, "wf2": wf2, "bf2": bf2,
            "wf3": wf3, "bf3": bf3}


# ----------------------------------------------------------------------------
# CoolNet forward
# ----------------------------------------------------------------------------
def coolnet_forward(x, pp):
    # x: (B, 3, 32, 32) f32 NCHW (PyTorch layout)
    B = x.shape[0]
    h = jnp.transpose(x, (0, 2, 3, 1)).astype(jnp.bfloat16)    # (B, 32, 32, 3) bf16
    h = conv_relu_pool(h, pp["w1"], pp["b1"], 5, 5, cin=3)     # (B, 14, 14, 128); ch>=64 are 0
    h = conv_relu_pool(h, pp["w2"], pp["b2"], 5, 5, cin=64)    # (B, 5, 5, 128);  ch>=16 are 0
    # Flatten only the 16 real channels in (h, w, c) order; fc1 weights were
    # pre-permuted so this matches PyTorch's x.view(-1, 16*5*5) semantics.
    h = h[..., :16].reshape(B, 400)
    h = jnp.pad(h, ((0, 0), (0, 512 - 400)))                   # (B, 512) bf16
    logits = fc_fused(h, pp["wf1"], pp["bf1"], pp["wf2"], pp["bf2"],
                      pp["wf3"], pp["bf3"])                    # (B, 128) f32
    return logits[:, :10]


if __name__ == "__main__":
    key = jax.random.PRNGKey(0)
    kx, kp = jax.random.split(key)
    x = jax.random.normal(kx, (2, 3, 32, 32), dtype=jnp.float32)
    params = init_params(kp)
    packed = prepare_params(params)          # one-time: pad / permute / bf16 cast

    fwd = jax.jit(coolnet_forward)
    out = jax.block_until_ready(fwd(x, packed))
    assert out.shape == (2, 10) and out.dtype == jnp.float32
    print("KERNEL_OK")
</pallas_src>

<mosaic_0001>
module attributes {stable_mosaic.version = 11 : i64} {
  func.func @_conv_relu_pool_kernel(%arg0: i32, %arg1: memref<4x200x128xbf16, #tpu.memory_space<vmem>>, %arg2: memref<128x128xbf16, #tpu.memory_space<vmem>>, %arg3: memref<1x128xf32, #tpu.memory_space<vmem>>, %arg4: memref<200x128xbf16, #tpu.memory_space<vmem>>) attributes {dimension_semantics = [#tpu.dimension_semantics<parallel>], iteration_bounds = array<i64: 2>, scalar_prefetch = 0 : i64, scratch_operands = 0 : i64, tpu.core_type = #tpu.core_type<tc>, window_params = [{transform_indices = @transform_0, window_bounds = array<i64: 4, 200, 128>}, {pipeline_mode = #tpu.pipeline_mode<synchronous>, transform_indices = @transform_1, window_bounds = array<i64: 128, 128>}, {pipeline_mode = #tpu.pipeline_mode<synchronous>, transform_indices = @transform_2, window_bounds = array<i64: 1, 128>}, {transform_indices = @transform_3, window_bounds = array<i64: 200, 128>}]} {
    %c0 = arith.constant 0 : index
    %c0_0 = arith.constant 0 : index
    %0 = vector.load %arg2[%c0, %c0_0] : memref<128x128xbf16, #tpu.memory_space<vmem>>, vector<128x128xbf16>
    %c0_1 = arith.constant 0 : index
    %c0_2 = arith.constant 0 : index
    %c0_3 = arith.constant 0 : index
    %1 = vector.load %arg1[%c0_1, %c0_2, %c0_3] : memref<4x200x128xbf16, #tpu.memory_space<vmem>>, vector<1x200x128xbf16>
    %2 = vector.shape_cast %1 : vector<1x200x128xbf16> to vector<200x128xbf16>
    %cst = arith.constant dense<0.000000e+00> : vector<200x128xf32>
    %3 = tpu.matmul %2, %0, %cst {dimension_numbers = #tpu.dot_dimension_numbers<[1], [0], [0], [1], [0, 0, 1, 1], [], []>} : vector<200x128xbf16>, vector<128x128xbf16>, vector<200x128xf32> -> vector<200x128xf32>
    %c1 = arith.constant 1 : index
    %c0_4 = arith.constant 0 : index
    %c0_5 = arith.constant 0 : index
    %4 = vector.load %arg1[%c1, %c0_4, %c0_5] : memref<4x200x128xbf16, #tpu.memory_space<vmem>>, vector<1x200x128xbf16>
    %5 = vector.shape_cast %4 : vector<1x200x128xbf16> to vector<200x128xbf16>
    %cst_6 = arith.constant dense<0.000000e+00> : vector<200x128xf32>
    %6 = tpu.matmul %5, %0, %cst_6 {dimension_numbers = #tpu.dot_dimension_numbers<[1], [0], [0], [1], [0, 0, 1, 1], [], []>} : vector<200x128xbf16>, vector<128x128xbf16>, vector<200x128xf32> -> vector<200x128xf32>
    %7 = arith.maximumf %3, %6 : vector<200x128xf32>
    %c2 = arith.constant 2 : index
    %c0_7 = arith.constant 0 : index
    %c0_8 = arith.constant 0 : index
    %8 = vector.load %arg1[%c2, %c0_7, %c0_8] : memref<4x200x128xbf16, #tpu.memory_space<vmem>>, vector<1x200x128xbf16>
    %9 = vector.shape_cast %8 : vector<1x200x128xbf16> to vector<200x128xbf16>
    %cst_9 = arith.constant dense<0.000000e+00> : vector<200x128xf32>
    %10 = tpu.matmul %9, %0, %cst_9 {dimension_numbers = #tpu.dot_dimension_numbers<[1], [0], [0], [1], [0, 0, 1, 1], [], []>} : vector<200x128xbf16>, vector<128x128xbf16>, vector<200x128xf32> -> vector<200x128xf32>
    %11 = arith.maximumf %7, %10 : vector<200x128xf32>
    %c3 = arith.constant 3 : index
    %c0_10 = arith.constant 0 : index
    %c0_11 = arith.constant 0 : index
    %12 = vector.load %arg1[%c3, %c0_10, %c0_11] : memref<4x200x128xbf16, #tpu.memory_space<vmem>>, vector<1x200x128xbf16>
    %13 = vector.shape_cast %12 : vector<1x200x128xbf16> to vector<200x128xbf16>
    %cst_12 = arith.constant dense<0.000000e+00> : vector<200x128xf32>
    %14 = tpu.matmul %13, %0, %cst_12 {dimension_numbers = #tpu.dot_dimension_numbers<[1], [0], [0], [1], [0, 0, 1, 1], [], []>} : vector<200x128xbf16>, vector<128x128xbf16>, vector<200x128xf32> -> vector<200x128xf32>
    %15 = arith.maximumf %11, %14 : vector<200x128xf32>
    %c0_13 = arith.constant 0 : index
    %c0_14 = arith.constant 0 : index
    %16 = vector.load %arg3[%c0_13, %c0_14] : memref<1x128xf32, #tpu.memory_space<vmem>>, vector<1x128xf32>
    %17 = vector.broadcast %16 : vector<1x128xf32> to vector<200x128xf32>
    %18 = arith.addf %15, %17 : vector<200x128xf32>
    %cst_15 = arith.constant 0.000000e+00 : f32
    %19 = vector.broadcast %cst_15 : f32 to vector<200x128xf32>
    %20 = arith.maximumf %18, %19 : vector<200x128xf32>
    %21 = arith.truncf %20 : vector<200x128xf32> to vector<200x128xbf16>
    %c0_16 = arith.constant 0 : index
    %c0_17 = arith.constant 0 : index
    %22 = vector.load %arg4[%c0_16, %c0_17] : memref<200x128xbf16, #tpu.memory_space<vmem>>, vector<200x128xbf16>
    tpu.vector_store %arg4[%c0_16, %c0_17], %21 {strides = array<i32>} : memref<200x128xbf16, #tpu.memory_space<vmem>>, vector<200x128xbf16>,
    return
  }
  func.func @transform_0(%arg0: i32) -> (i32, i32, i32) {
    %c0_i32 = arith.constant 0 : i32
    %c0_i32_0 = arith.constant 0 : i32
    %c0_i32_1 = arith.constant 0 : i32
    return %c0_i32, %arg0, %c0_i32_0 : i32, i32, i32
  }
  func.func @transform_1(%arg0: i32) -> (i32, i32) {
    %c0_i32 = arith.constant 0 : i32
    %c0_i32_0 = arith.constant 0 : i32
    %c0_i32_1 = arith.constant 0 : i32
    return %c0_i32, %c0_i32_0 : i32, i32
  }
  func.func @transform_2(%arg0: i32) -> (i32, i32) {
    %c0_i32 = arith.constant 0 : i32
    %c0_i32_0 = arith.constant 0 : i32
    %c0_i32_1 = arith.constant 0 : i32
    return %c0_i32, %c0_i32_0 : i32, i32
  }
  func.func @transform_3(%arg0: i32) -> (i32, i32) {
    %c0_i32 = arith.constant 0 : i32
    %c0_i32_0 = arith.constant 0 : i32
    return %arg0, %c0_i32 : i32, i32
  }
}

module attributes {stable_mosaic.version = 11 : i64} {
  func.func @_conv_relu_pool_kernel(%arg0: i32, %arg1: memref<4x32x1664xbf16, #tpu.memory_space<vmem>>, %arg2: memref<1664x128xbf16, #tpu.memory_space<vmem>>, %arg3: memref<1x128xf32, #tpu.memory_space<vmem>>, %arg4: memref<32x128xbf16, #tpu.memory_space<vmem>>) attributes {dimension_semantics = [#tpu.dimension_semantics<parallel>], iteration_bounds = array<i64: 2>, scalar_prefetch = 0 : i64, scratch_operands = 0 : i64, tpu.core_type = #tpu.core_type<tc>, window_params = [{transform_indices = @transform_0, window_bounds = array<i64: 4, 32, 1664>}, {pipeline_mode = #tpu.pipeline_mode<synchronous>, transform_indices = @transform_1, window_bounds = array<i64: 1664, 128>}, {pipeline_mode = #tpu.pipeline_mode<synchronous>, transform_indices = @transform_2, window_bounds = array<i64: 1, 128>}, {transform_indices = @transform_3, window_bounds = array<i64: 32, 128>}]} {
    %c0 = arith.constant 0 : index
    %c0_0 = arith.constant 0 : index
    %0 = vector.load %arg2[%c0, %c0_0] : memref<1664x128xbf16, #tpu.memory_space<vmem>>, vector<1664x128xbf16>
    %c0_1 = arith.constant 0 : index
    %c0_2 = arith.constant 0 : index
    %c0_3 = arith.constant 0 : index
    %1 = vector.load %arg1[%c0_1, %c0_2, %c0_3] : memref<4x32x1664xbf16, #tpu.memory_space<vmem>>, vector<1x32x1664xbf16>
    %2 = vector.shape_cast %1 : vector<1x32x1664xbf16> to vector<32x1664xbf16>
    %cst = arith.constant dense<0.000000e+00> : vector<32x128xf32>
    %3 = tpu.matmul %2, %0, %cst {dimension_numbers = #tpu.dot_dimension_numbers<[1], [0], [0], [1], [0, 0, 1, 1], [], []>} : vector<32x1664xbf16>, vector<1664x128xbf16>, vector<32x128xf32> -> vector<32x128xf32>
    %c1 = arith.constant 1 : index
    %c0_4 = arith.constant 0 : index
    %c0_5 = arith.constant 0 : index
    %4 = vector.load %arg1[%c1, %c0_4, %c0_5] : memref<4x32x1664xbf16, #tpu.memory_space<vmem>>, vector<1x32x1664xbf16>
    %5 = vector.shape_cast %4 : vector<1x32x1664xbf16> to vector<32x1664xbf16>
    %cst_6 = arith.constant dense<0.000000e+00> : vector<32x128xf32>
    %6 = tpu.matmul %5, %0, %cst_6 {dimension_numbers = #tpu.dot_dimension_numbers<[1], [0], [0], [1], [0, 0, 1, 1], [], []>} : vector<32x1664xbf16>, vector<1664x128xbf16>, vector<32x128xf32> -> vector<32x128xf32>
    %7 = arith.maximumf %3, %6 : vector<32x128xf32>
    %c2 = arith.constant 2 : index
    %c0_7 = arith.constant 0 : index
    %c0_8 = arith.constant 0 : index
    %8 = vector.load %arg1[%c2, %c0_7, %c0_8] : memref<4x32x1664xbf16, #tpu.memory_space<vmem>>, vector<1x32x1664xbf16>
    %9 = vector.shape_cast %8 : vector<1x32x1664xbf16> to vector<32x1664xbf16>
    %cst_9 = arith.constant dense<0.000000e+00> : vector<32x128xf32>
    %10 = tpu.matmul %9, %0, %cst_9 {dimension_numbers = #tpu.dot_dimension_numbers<[1], [0], [0], [1], [0, 0, 1, 1], [], []>} : vector<32x1664xbf16>, vector<1664x128xbf16>, vector<32x128xf32> -> vector<32x128xf32>
    %11 = arith.maximumf %7, %10 : vector<32x128xf32>
    %c3 = arith.constant 3 : index
    %c0_10 = arith.constant 0 : index
    %c0_11 = arith.constant 0 : index
    %12 = vector.load %arg1[%c3, %c0_10, %c0_11] : memref<4x32x1664xbf16, #tpu.memory_space<vmem>>, vector<1x32x1664xbf16>
    %13 = vector.shape_cast %12 : vector<1x32x1664xbf16> to vector<32x1664xbf16>
    %cst_12 = arith.constant dense<0.000000e+00> : vector<32x128xf32>
    %14 = tpu.matmul %13, %0, %cst_12 {dimension_numbers = #tpu.dot_dimension_numbers<[1], [0], [0], [1], [0, 0, 1, 1], [], []>} : vector<32x1664xbf16>, vector<1664x128xbf16>, vector<32x128xf32> -> vector<32x128xf32>
    %15 = arith.maximumf %11, %14 : vector<32x128xf32>
    %c0_13 = arith.constant 0 : index
    %c0_14 = arith.constant 0 : index
    %16 = vector.load %arg3[%c0_13, %c0_14] : memref<1x128xf32, #tpu.memory_space<vmem>>, vector<1x128xf32>
    %17 = vector.broadcast %16 : vector<1x128xf32> to vector<32x128xf32>
    %18 = arith.addf %15, %17 : vector<32x128xf32>
    %cst_15 = arith.constant 0.000000e+00 : f32
    %19 = vector.broadcast %cst_15 : f32 to vector<32x128xf32>
    %20 = arith.maximumf %18, %19 : vector<32x128xf32>
    %21 = arith.truncf %20 : vector<32x128xf32> to vector<32x128xbf16>
    %c0_16 = arith.constant 0 : index
    %c0_17 = arith.constant 0 : index
    %22 = vector.load %arg4[%c0_16, %c0_17] : memref<32x128xbf16, #tpu.memory_space<vmem>>, vector<32x128xbf16>
    tpu.vector_store %arg4[%c0_16, %c0_17], %21 {strides = array<i32>} : memref<32x128xbf16, #tpu.memory_space<vmem>>, vector<32x128xbf16>,
    return
  }
  func.func @transform_0(%arg0: i32) -> (i32, i32, i32) {
    %c0_i32 = arith.constant 0 : i32
    %c0_i32_0 = arith.constant 0 : i32
    %c0_i32_1 = arith.constant 0 : i32
    return %c0_i32, %arg0, %c0_i32_0 : i32, i32, i32
  }
  func.func @transform_1(%arg0: i32) -> (i32, i32) {
    %c0_i32 = arith.constant 0 : i32
    %c0_i32_0 = arith.constant 0 : i32
    %c0_i32_1 = arith.constant 0 : i32
    return %c0_i32, %c0_i32_0 : i32, i32
  }
  func.func @transform_2(%arg0: i32) -> (i32, i32) {
    %c0_i32 = arith.constant 0 : i32
    %c0_i32_0 = arith.constant 0 : i32
    %c0_i32_1 = arith.constant 0 : i32
    return %c0_i32, %c0_i32_0 : i32, i32
  }
  func.func @transform_3(%arg0: i32) -> (i32, i32) {
    %c0_i32 = arith.constant 0 : i32
    %c0_i32_0 = arith.constant 0 : i32
    return %arg0, %c0_i32 : i32, i32
  }
}

module attributes {stable_mosaic.version = 11 : i64} {
  func.func @_fc_fused_kernel(%arg0: i32, %arg1: memref<8x512xbf16, #tpu.memory_space<vmem>>, %arg2: memref<512x128xbf16, #tpu.memory_space<vmem>>, %arg3: memref<1x128xf32, #tpu.memory_space<vmem>>, %arg4: memref<128x128xbf16, #tpu.memory_space<vmem>>, %arg5: memref<1x128xf32, #tpu.memory_space<vmem>>, %arg6: memref<128x128xbf16, #tpu.memory_space<vmem>>, %arg7: memref<1x128xf32, #tpu.memory_space<vmem>>, %arg8: memref<8x128xf32, #tpu.memory_space<vmem>>) attributes {dimension_semantics = [#tpu.dimension_semantics<parallel>], iteration_bounds = array<i64: 1>, scalar_prefetch = 0 : i64, scratch_operands = 0 : i64, tpu.core_type = #tpu.core_type<tc>, window_params = [{transform_indices = @transform_0, window_bounds = array<i64: 8, 512>}, {pipeline_mode = #tpu.pipeline_mode<synchronous>, transform_indices = @transform_1, window_bounds = array<i64: 512, 128>}, {pipeline_mode = #tpu.pipeline_mode<synchronous>, transform_indices = @transform_2, window_bounds = array<i64: 1, 128>}, {pipeline_mode = #tpu.pipeline_mode<synchronous>, transform_indices = @transform_3, window_bounds = array<i64: 128, 128>}, {pipeline_mode = #tpu.pipeline_mode<synchronous>, transform_indices = @transform_4, window_bounds = array<i64: 1, 128>}, {pipeline_mode = #tpu.pipeline_mode<synchronous>, transform_indices = @transform_5, window_bounds = array<i64: 128, 128>}, {pipeline_mode = #tpu.pipeline_mode<synchronous>, transform_indices = @transform_6, window_bounds = array<i64: 1, 128>}, {transform_indices = @transform_7, window_bounds = array<i64: 8, 128>}]} {
    %c0 = arith.constant 0 : index
    %c0_0 = arith.constant 0 : index
    %0 = vector.load %arg1[%c0, %c0_0] : memref<8x512xbf16, #tpu.memory_space<vmem>>, vector<8x512xbf16>
    %c0_1 = arith.constant 0 : index
    %c0_2 = arith.constant 0 : index
    %1 = vector.load %arg2[%c0_1, %c0_2] : memref<512x128xbf16, #tpu.memory_space<vmem>>, vector<512x128xbf16>
    %cst = arith.constant dense<0.000000e+00> : vector<8x128xf32>
    %2 = tpu.matmul %0, %1, %cst {dimension_numbers = #tpu.dot_dimension_numbers<[1], [0], [0], [1], [0, 0, 1, 1], [], []>} : vector<8x512xbf16>, vector<512x128xbf16>, vector<8x128xf32> -> vector<8x128xf32>
    %c0_3 = arith.constant 0 : index
    %c0_4 = arith.constant 0 : index
    %3 = vector.load %arg3[%c0_3, %c0_4] : memref<1x128xf32, #tpu.memory_space<vmem>>, vector<1x128xf32>
    %4 = vector.broadcast %3 : vector<1x128xf32> to vector<8x128xf32>
    %5 = arith.addf %2, %4 : vector<8x128xf32>
    %cst_5 = arith.constant 0.000000e+00 : f32
    %6 = vector.broadcast %cst_5 : f32 to vector<8x128xf32>
    %7 = arith.maximumf %5, %6 : vector<8x128xf32>
    %8 = arith.truncf %7 : vector<8x128xf32> to vector<8x128xbf16>
    %c0_6 = arith.constant 0 : index
    %c0_7 = arith.constant 0 : index
    %9 = vector.load %arg4[%c0_6, %c0_7] : memref<128x128xbf16, #tpu.memory_space<vmem>>, vector<128x128xbf16>
    %cst_8 = arith.constant dense<0.000000e+00> : vector<8x128xf32>
    %10 = tpu.matmul %8, %9, %cst_8 {dimension_numbers = #tpu.dot_dimension_numbers<[1], [0], [0], [1], [0, 0, 1, 1], [], []>} : vector<8x128xbf16>, vector<128x128xbf16>, vector<8x128xf32> -> vector<8x128xf32>
    %c0_9 = arith.constant 0 : index
    %c0_10 = arith.constant 0 : index
    %11 = vector.load %arg5[%c0_9, %c0_10] : memref<1x128xf32, #tpu.memory_space<vmem>>, vector<1x128xf32>
    %12 = vector.broadcast %11 : vector<1x128xf32> to vector<8x128xf32>
    %13 = arith.addf %10, %12 : vector<8x128xf32>
    %cst_11 = arith.constant 0.000000e+00 : f32
    %14 = vector.broadcast %cst_11 : f32 to vector<8x128xf32>
    %15 = arith.maximumf %13, %14 : vector<8x128xf32>
    %16 = arith.truncf %15 : vector<8x128xf32> to vector<8x128xbf16>
    %c0_12 = arith.constant 0 : index
    %c0_13 = arith.constant 0 : index
    %17 = vector.load %arg6[%c0_12, %c0_13] : memref<128x128xbf16, #tpu.memory_space<vmem>>, vector<128x128xbf16>
    %cst_14 = arith.constant dense<0.000000e+00> : vector<8x128xf32>
    %18 = tpu.matmul %16, %17, %cst_14 {dimension_numbers = #tpu.dot_dimension_numbers<[1], [0], [0], [1], [0, 0, 1, 1], [], []>} : vector<8x128xbf16>, vector<128x128xbf16>, vector<8x128xf32> -> vector<8x128xf32>
    %c0_15 = arith.constant 0 : index
    %c0_16 = arith.constant 0 : index
    %19 = vector.load %arg7[%c0_15, %c0_16] : memref<1x128xf32, #tpu.memory_space<vmem>>, vector<1x128xf32>
    %20 = vector.broadcast %19 : vector<1x128xf32> to vector<8x128xf32>
    %21 = arith.addf %18, %20 : vector<8x128xf32>
    %c0_17 = arith.constant 0 : index
    %c0_18 = arith.constant 0 : index
    %22 = vector.load %arg8[%c0_17, %c0_18] : memref<8x128xf32, #tpu.memory_space<vmem>>, vector<8x128xf32>
    tpu.vector_store %arg8[%c0_17, %c0_18], %21 {strides = array<i32>} : memref<8x128xf32, #tpu.memory_space<vmem>>, vector<8x128xf32>,
    return
  }
  func.func @transform_0(%arg0: i32) -> (i32, i32) {
    %c0_i32 = arith.constant 0 : i32
    %c0_i32_0 = arith.constant 0 : i32
    return %arg0, %c0_i32 : i32, i32
  }
  func.func @transform_1(%arg0: i32) -> (i32, i32) {
    %c0_i32 = arith.constant 0 : i32
    %c0_i32_0 = arith.constant 0 : i32
    %c0_i32_1 = arith.constant 0 : i32
    return %c0_i32, %c0_i32_0 : i32, i32
  }
  func.func @transform_2(%arg0: i32) -> (i32, i32) {
    %c0_i32 = arith.constant 0 : i32
    %c0_i32_0 = arith.constant 0 : i32
    %c0_i32_1 = arith.constant 0 : i32
    return %c0_i32, %c0_i32_0 : i32, i32
  }
  func.func @transform_3(%arg0: i32) -> (i32, i32) {
    %c0_i32 = arith.constant 0 : i32
    %c0_i32_0 = arith.constant 0 : i32
    %c0_i32_1 = arith.constant 0 : i32
    return %c0_i32, %c0_i32_0 : i32, i32
  }
  func.func @transform_4(%arg0: i32) -> (i32, i32) {
    %c0_i32 = arith.constant 0 : i32
    %c0_i32_0 = arith.constant 0 : i32
    %c0_i32_1 = arith.constant 0 : i32
    return %c0_i32, %c0_i32_0 : i32, i32
  }
  func.func @transform_5(%arg0: i32) -> (i32, i32) {
    %c0_i32 = arith.constant 0 : i32
    %c0_i32_0 = arith.constant 0 : i32
    %c0_i32_1 = arith.constant 0 : i32
    return %c0_i32, %c0_i32_0 : i32, i32
  }
  func.func @transform_6(%arg0: i32) -> (i32, i32) {
    %c0_i32 = arith.constant 0 : i32
    %c0_i32_0 = arith.constant 0 : i32
    %c0_i32_1 = arith.constant 0 : i32
    return %c0_i32, %c0_i32_0 : i32, i32
  }
  func.func @transform_7(%arg0: i32) -> (i32, i32) {
    %c0_i32 = arith.constant 0 : i32
    %c0_i32_0 = arith.constant 0 : i32
    return %arg0, %c0_i32 : i32, i32
  }
}

</mosaic_0001>

<bundles_post_ra>
// kernel: coolnet_forward.3
= control target key start
LH: loop header
LB: loop body
LE: loop exit
PB: predicated region body
PF: predicated region fallthrough
CT: control target
= control target key end

     0   :  { %s2704_s12 = smov 0   ;;  %s2706_s13 = smov 0   ;;  %s3348_s0 = inlined_call_operand.vmem [shape: bf16[4,400,128], index: 0, kind: input, shape index: {}]   ;;  %s3349_s1 = inlined_call_operand.vmem [shape: bf16[128,128], index: 1, kind: input, shape index: {}]   ;;  %s3350_s2 = inlined_call_operand.vmem [shape: f32[1,128], index: 2, kind: input, shape index: {}]   ;;  %s3351_s3 = inlined_call_operand.vmem [shape: bf16[400,128], index: 3, kind: output, shape index: {}]  }
   0x1   :  { %s2708_s14 = smov 0  }
   0x2 LB: > { %s1947_s15 = sadd.s32 4294967295, %s2680_s14   ;;  %s2721_s16 = sadd.s32 1, %s2680_s14   ;;  %s2680_s14 = sphi %s2708_s14, %s3383_s14   ;;  %s2676_s13 = sphi %s2706_s13, %s3382_s13   ;;  %s2672_s12 = sphi %s2704_s12, %s3381_s12  }
   0x3   : > { %s17_s17 = ssub.s32 %s2680_s14, %s2721_s16  ;;  %s20_s18 = sadd.s32 1, %s2676_s13 }
   0x4   : > { %p18_p0 = scmp.eq.s32.totalorder %s17_s17, 0  ;;  %p27_p1 = scmp.ne.s32.totalorder %s2676_s13, %s2672_s12 }
   0x5   : > { %p28_p2 = scmp.eq.s32.totalorder %s2680_s14, 0  ;;  %p1950_p4 = scmp.ge.s32.totalorder %s2680_s14, 2 }
   0x6   : > { %s2730_s19 = scalar_select %p18_p0, %s2676_s13, %s20_s18  }
   0x7   : > { %p29_p3 = por %p28_p2, %p27_p1  ;;  %127 = sbr.rel (%p1950_p4) target bundleno = 45 (0x2d), region = 24 }
   0xe   : > { %130 = sbr.rel (!%p29_p3) target bundleno = 45 (0x2d), region = 28  ;;  %s132_s20 = sand.u32 (%p29_p3), 1, %s2676_s13  }
   0xf   : > { %s2117_s21 = smul.u32 (%p29_p3), 100, %s2680_s14 }
  0x10   : > { %s2570_s22 = smul.u32 (%p29_p3), 400, %s132_s20 }
  0x11   : > { %s2738_s25 = scalar_lea.vmem (%p29_p3), %s3348_s0, %s2117_s21 }
  0x12   : > { %v153_v0 = vld [vmem:[%s2738_s25] sm:$0xff] (%p29_p3)   ;;  %v157_v1 = vld [vmem:[%s2738_s25 + $0x8] sm:$0xff] (%p29_p3)   ;;  %v161_v2 = vld [vmem:[%s2738_s25 + $0x10] sm:$0xff] (%p29_p3)   ;;  %s2743_s26 = scalar_lea.vmem (%p29_p3), [#allocation2], %s2570_s22 }
  0x13   : > { %154 = vst [vmem:[%s2743_s26] sm:$0xff] (%p29_p3), %v153_v0   ;;  %158 = vst [vmem:[%s2743_s26 + $0x8] sm:$0xff] (%p29_p3), %v157_v1   ;;  %v165_v3 = vld [vmem:[%s2738_s25 + $0x18] sm:$0xff] (%p29_p3)   ;;  %v169_v4 = vld [vmem:[%s2738_s25 + $0x20] sm:$0xff] (%p29_p3)  }
  0x14   : > { %162 = vst [vmem:[%s2743_s26 + $0x10] sm:$0xff] (%p29_p3), %v161_v2   ;;  %v173_v5 = vld [vmem:[%s2738_s25 + $0x28] sm:$0xff] (%p29_p3)   ;;  %166 = vst [vmem:[%s2743_s26 + $0x18] sm:$0xff] (%p29_p3), %v165_v3   ;;  %v177_v6 = vld [vmem:[%s2738_s25 + $0x30] sm:$0xff] (%p29_p3)  }
  0x15   : > { %170 = vst [vmem:[%s2743_s26 + $0x20] sm:$0xff] %v169_v4   ;;  %174 = vst [vmem:[%s2743_s26 + $0x28] sm:$0xff] %v173_v5   ;;  %v181_v7 = vld [vmem:[%s2738_s25 + $0x38] sm:$0xff]   ;;  %v185_v8 = vld [vmem:[%s2738_s25 + $0x40] sm:$0xff]  }
  0x16   : > { %178 = vst [vmem:[%s2743_s26 + $0x30] sm:$0xff] %v177_v6   ;;  %182 = vst [vmem:[%s2743_s26 + $0x38] sm:$0xff] %v181_v7   ;;  %v189_v9 = vld [vmem:[%s2738_s25 + $0x48] sm:$0xff]   ;;  %v193_v10 = vld [vmem:[%s2738_s25 + $0x50] sm:$0xff]  }
  0x17   : > { %186 = vst [vmem:[%s2743_s26 + $0x40] sm:$0xff] %v185_v8   ;;  %v197_v11 = vld [vmem:[%s2738_s25 + $0x58] sm:$0xff]   ;;  %190 = vst [vmem:[%s2743_s26 + $0x48] sm:$0xff] %v189_v9   ;;  %v201_v12 = vld [vmem:[%s2738_s25 + $0x60] sm:$0xf] }
  0x18   : > { %194 = vst [vmem:[%s2743_s26 + $0x50] sm:$0xff] %v193_v10   ;;  %198 = vst [vmem:[%s2743_s26 + $0x58] sm:$0xff] %v197_v11   ;;  %v203_v13 = vld [vmem:[%s2738_s25 + $0xc8] sm:$0xff]   ;;  %v207_v14 = vld [vmem:[%s2738_s25 + $0xd0] sm:$0xff]  }
  0x19   : > { %202 = vst [vmem:[%s2743_s26 + $0x60] sm:$0xf] %v201_v12  ;;  %204 = vst [vmem:[%s2743_s26 + $0x64] sm:$0xff] %v203_v13   ;;  %v211_v15 = vld [vmem:[%s2738_s25 + $0xd8] sm:$0xff]   ;;  %v215_v16 = vld [vmem:[%s2738_s25 + $0xe0] sm:$0xff]  }
  0x1a   : > { %208 = vst [vmem:[%s2743_s26 + $0x6c] sm:$0xff] %v207_v14   ;;  %v219_v17 = vld [vmem:[%s2738_s25 + $0xe8] sm:$0xff]   ;;  %212 = vst [vmem:[%s2743_s26 + $0x74] sm:$0xff] %v211_v15   ;;  %v223_v18 = vld [vmem:[%s2738_s25 + $0xf0] sm:$0xff]  }
  0x1b   : > { %216 = vst [vmem:[%s2743_s26 + $0x7c] sm:$0xff] %v215_v16   ;;  %220 = vst [vmem:[%s2743_s26 + $0x84] sm:$0xff] %v219_v17   ;;  %v227_v19 = vld [vmem:[%s2738_s25 + $0xf8] sm:$0xff]   ;;  %v231_v20 = vld [vmem:[%s2738_s25 + $0x100] sm:$0xff]  }
  0x1c   : > { %224 = vst [vmem:[%s2743_s26 + $0x8c] sm:$0xff] %v223_v18   ;;  %228 = vst [vmem:[%s2743_s26 + $0x94] sm:$0xff] %v227_v19   ;;  %v235_v21 = vld [vmem:[%s2738_s25 + $0x108] sm:$0xff]   ;;  %v239_v22 = vld [vmem:[%s2738_s25 + $0x110] sm:$0xff]  }
  0x1d   : > { %232 = vst [vmem:[%s2743_s26 + $0x9c] sm:$0xff] %v231_v20   ;;  %v243_v23 = vld [vmem:[%s2738_s25 + $0x118] sm:$0xff]   ;;  %236 = vst [vmem:[%s2743_s26 + $0xa4] sm:$0xff] %v235_v21   ;;  %v247_v24 = vld [vmem:[%s2738_s25 + $0x120] sm:$0xff]  }
  0x1e   : > { %240 = vst [vmem:[%s2743_s26 + $0xac] sm:$0xff] %v239_v22   ;;  %244 = vst [vmem:[%s2743_s26 + $0xb4] sm:$0xff] %v243_v23   ;;  %v251_v25 = vld [vmem:[%s2738_s25 + $0x128] sm:$0xf]  ;;  %v253_v26 = vld [vmem:[%s2738_s25 + $0x190] sm:$0xff]  }
  0x1f   : > { %248 = vst [vmem:[%s2743_s26 + $0xbc] sm:$0xff] %v247_v24   ;;  %252 = vst [vmem:[%s2743_s26 + $0xc4] sm:$0xf] %v251_v25  ;;  %v257_v27 = vld [vmem:[%s2738_s25 + $0x198] sm:$0xff]   ;;  %v261_v28 = vld [vmem:[%s2738_s25 + $0x1a0] sm:$0xff]  }
  0x20   : > { %254 = vst [vmem:[%s2743_s26 + $0xc8] sm:$0xff] %v253_v26   ;;  %v265_v29 = vld [vmem:[%s2738_s25 + $0x1a8] sm:$0xff]   ;;  %258 = vst [vmem:[%s2743_s26 + $0xd0] sm:$0xff] %v257_v27   ;;  %v269_v30 = vld [vmem:[%s2738_s25 + $0x1b0] sm:$0xff]  }
  0x21   : > { %262 = vst [vmem:[%s2743_s26 + $0xd8] sm:$0xff] %v261_v28   ;;  %266 = vst [vmem:[%s2743_s26 + $0xe0] sm:$0xff] %v265_v29   ;;  %v273_v31 = vld [vmem:[%s2738_s25 + $0x1b8] sm:$0xff]   ;;  %v277_v32 = vld [vmem:[%s2738_s25 + $0x1c0] sm:$0xff]  }
  0x22   : > { %270 = vst [vmem:[%s2743_s26 + $0xe8] sm:$0xff] %v269_v30   ;;  %274 = vst [vmem:[%s2743_s26 + $0xf0] sm:$0xff] %v273_v31   ;;  %v281_v33 = vld [vmem:[%s2738_s25 + $0x1c8] sm:$0xff]   ;;  %v285_v34 = vld [vmem:[%s2738_s25 + $0x1d0] sm:$0xff]  }
  0x23   : > { %278 = vst [vmem:[%s2743_s26 + $0xf8] sm:$0xff] %v277_v32   ;;  %v289_v35 = vld [vmem:[%s2738_s25 + $0x1d8] sm:$0xff]   ;;  %282 = vst [vmem:[%s2743_s26 + $0x100] sm:$0xff] %v281_v33   ;;  %v293_v36 = vld [vmem:[%s2738_s25 + $0x1e0] sm:$0xff]  }
  0x24   : > { %286 = vst [vmem:[%s2743_s26 + $0x108] sm:$0xff] %v285_v34   ;;  %290 = vst [vmem:[%s2743_s26 + $0x110] sm:$0xff] %v289_v35   ;;  %v297_v37 = vld [vmem:[%s2738_s25 + $0x1e8] sm:$0xff]   ;;  %v301_v38 = vld [vmem:[%s2738_s25 + $0x1f0] sm:$0xf] }
  0x25   : > { %294 = vst [vmem:[%s2743_s26 + $0x118] sm:$0xff] %v293_v36   ;;  %298 = vst [vmem:[%s2743_s26 + $0x120] sm:$0xff] %v297_v37   ;;  %v303_v39 = vld [vmem:[%s2738_s25 + $0x258] sm:$0xff]   ;;  %v307_v40 = vld [vmem:[%s2738_s25 + $0x260] sm:$0xff]  }
  0x26   : > { %302 = vst [vmem:[%s2743_s26 + $0x128] sm:$0xf] %v301_v38  ;;  %v311_v41 = vld [vmem:[%s2738_s25 + $0x268] sm:$0xff]   ;;  %304 = vst [vmem:[%s2743_s26 + $0x12c] sm:$0xff] %v303_v39   ;;  %v315_v42 = vld [vmem:[%s2738_s25 + $0x270] sm:$0xff]  }
  0x27   : > { %308 = vst [vmem:[%s2743_s26 + $0x134] sm:$0xff] %v307_v40   ;;  %312 = vst [vmem:[%s2743_s26 + $0x13c] sm:$0xff] %v311_v41   ;;  %v319_v43 = vld [vmem:[%s2738_s25 + $0x278] sm:$0xff]   ;;  %v323_v44 = vld [vmem:[%s2738_s25 + $0x280] sm:$0xff]  }
  0x28   : > { %316 = vst [vmem:[%s2743_s26 + $0x144] sm:$0xff] %v315_v42   ;;  %320 = vst [vmem:[%s2743_s26 + $0x14c] sm:$0xff] %v319_v43   ;;  %v327_v45 = vld [vmem:[%s2738_s25 + $0x288] sm:$0xff]   ;;  %v331_v46 = vld [vmem:[%s2738_s25 + $0x290] sm:$0xff]  }
  0x29   : > { %324 = vst [vmem:[%s2743_s26 + $0x154] sm:$0xff] %v323_v44   ;;  %v335_v47 = vld [vmem:[%s2738_s25 + $0x298] sm:$0xff]   ;;  %328 = vst [vmem:[%s2743_s26 + $0x15c] sm:$0xff] %v327_v45   ;;  %v339_v48 = vld [vmem:[%s2738_s25 + $0x2a0] sm:$0xff]  }
  0x2a   : > { %332 = vst [vmem:[%s2743_s26 + $0x164] sm:$0xff] %v331_v46   ;;  %336 = vst [vmem:[%s2743_s26 + $0x16c] sm:$0xff] %v335_v47   ;;  %v343_v49 = vld [vmem:[%s2738_s25 + $0x2a8] sm:$0xff]   ;;  %v347_v50 = vld [vmem:[%s2738_s25 + $0x2b0] sm:$0xff]  }
  0x2b   : > { %340 = vst [vmem:[%s2743_s26 + $0x174] sm:$0xff] %v339_v48   ;;  %344 = vst [vmem:[%s2743_s26 + $0x17c] sm:$0xff] %v343_v49   ;;  %v351_v51 = vld [vmem:[%s2738_s25 + $0x2b8] sm:$0xf] }
  0x2c   : > { %348 = vst [vmem:[%s2743_s26 + $0x184] sm:$0xff] %v347_v50   ;;  %352 = vst [vmem:[%s2743_s26 + $0x18c] sm:$0xf] %v351_v51 }
  0x2d PF: > { %p1952_p5 = scmp.ge.s32.totalorder %s2680_s14, 1  ;;  %p574_p6 = scmp.lt.s32.totalorder %s2680_s14, 3 }
  0x2f   : > { %p575_p7 = pnand %p1952_p5, %p574_p6 }
  0x31   : > { %578 = sbr.rel (%p575_p7) target bundleno = 512 (0x200), region = 69 }
  0x38   : > { %v2598_v52 = vld [vmem:[%s3349_s1] sm:$0xff]   ;;  %v2682_v53 = vmov 0.0   ;;  %v2599_v54 = vld [vmem:[%s3349_s1 + $0x8] sm:$0xff]   ;;  %s581_s4 = sand.u32 1, %s2672_s12   ;;  %vm2683_vm0 = vmmov 0   ;;  %v2600_v55 = vld [vmem:[%s3349_s1 + $0x10] sm:$0xff]  }
  0x39   : > { %2298 = vmatprep.subr.bf16.mxu0 %v2682_v53  ;;  %2366 = vmatprep.subr.bf16.mxu1 %v2682_v53  ;;  %s2571_s5 = smul.u32 400, %s581_s4  ;;  %v2601_v56 = vld [vmem:[%s3349_s1 + $0x18] sm:$0xff]   ;;  %v2602_v57 = vld [vmem:[%s3349_s1 + $0x20] sm:$0xff]   ;;  %v2603_v58 = vld [vmem:[%s3349_s1 + $0x28] sm:$0xff]  }
  0x3a   : > { %2299 = vmatpush3.bf16.msra.mxu0 %v2598_v52  ;;  %2367 = vmatpush3.bf16.msra.mxu1 %v2598_v52  ;;  %v2604_v59 = vld [vmem:[%s3349_s1 + $0x30] sm:$0xff]   ;;  %v2605_v60 = vld [vmem:[%s3349_s1 + $0x38] sm:$0xff]   ;;  %s605_s24 = smul.u32 25, %s1947_s15 }
  0x3b   : > { %2300 = vmatprep.subr.bf16.mxu0 %v2682_v53  ;;  %2368 = vmatprep.subr.bf16.mxu1 %v2682_v53  ;;  %s2868_s8 = scalar_lea.vmem [#allocation2], %s2571_s5 }
  0x3c   : > { %2314 = vmatprep.mubr.msk.bf16.mxu0 %vm2683_vm0, %v2682_v53  ;;  %2382 = vmatprep.mubr.msk.bf16.mxu1 %vm2683_vm0, %v2682_v53  ;;  %v2606_v61 = vld [vmem:[%s2868_s8] sm:$0xff]   ;;  %v2608_v63 = vld [vmem:[%s2868_s8 + $0x8] sm:$0xff]   ;;  %v2610_v1 = vld [vmem:[%s2868_s8 + $0x10] sm:$0xff]   ;;  %p606_p8 = scmp.lt.s32.totalorder %s605_s24, 49 }
  0x3d   : > { %v2607_v62 = vld [vmem:[%s2868_s8 + $0x64] sm:$0xff]   ;;  %v2609_v0 = vld [vmem:[%s2868_s8 + $0x6c] sm:$0xff]   ;;  %v2611_v2 = vld [vmem:[%s2868_s8 + $0x74] sm:$0xff]  }
  0x3e   : > { %2301 = vmatpush3.bf16.msra.mxu0 %v2599_v54  ;;  %2369 = vmatpush3.bf16.msra.mxu1 %v2599_v54  ;;  %v2612_v3 = vld [vmem:[%s2868_s8 + $0x18] sm:$0xff]   ;;  %v2614_v5 = vld [vmem:[%s2868_s8 + $0x20] sm:$0xff]   ;;  %v2616_v7 = vld [vmem:[%s2868_s8 + $0x28] sm:$0xff]   ;;  %s3385_s24 = smov (!%p606_p8, %s605_s24), 49 }
  0x3f   : > { %2302 = vmatprep.subr.bf16.mxu0 %v2682_v53  ;;  %2370 = vmatprep.subr.bf16.mxu1 %v2682_v53  ;;  %v2613_v4 = vld [vmem:[%s2868_s8 + $0x7c] sm:$0xff]   ;;  %v2615_v6 = vld [vmem:[%s2868_s8 + $0x84] sm:$0xff]   ;;  %v2617_v8 = vld [vmem:[%s2868_s8 + $0x8c] sm:$0xff]   ;;  %s1953_s14 = sshll.u32 %s3385_s24, 2 }
  0x40   : > { %v2618_v9 = vld [vmem:[%s2868_s8 + $0x30] sm:$0xff]   ;;  %v2620_v11 = vld [vmem:[%s2868_s8 + $0x38] sm:$0xff]   ;;  %v2622_v13 = vld [vmem:[%s2868_s8 + $0x40] sm:$0xff]   ;;  %s3234_s28 = scalar_lea.vmem %s3351_s3, %s1953_s14 }
  0x41   : > { %v2619_v10 = vld [vmem:[%s2868_s8 + $0x94] sm:$0xff]   ;;  %v2621_v12 = vld [vmem:[%s2868_s8 + $0x9c] sm:$0xff]   ;;  %v2623_v14 = vld [vmem:[%s2868_s8 + $0xa4] sm:$0xff]  }
  0x42   : > { %2303 = vmatpush3.bf16.msra.mxu0 %v2600_v55  ;;  %2371 = vmatpush3.bf16.msra.mxu1 %v2600_v55  ;;  %v2624_v15 = vld [vmem:[%s2868_s8 + $0x48] sm:$0xff]   ;;  %v2626_v17 = vld [vmem:[%s2868_s8 + $0x50] sm:$0xff]   ;;  %v2628_v19 = vld [vmem:[%s2868_s8 + $0x58] sm:$0xff]  }
  0x43   : > { %2304 = vmatprep.subr.bf16.mxu0 %v2682_v53  ;;  %2372 = vmatprep.subr.bf16.mxu1 %v2682_v53  ;;  %v2625_v16 = vld [vmem:[%s2868_s8 + $0xac] sm:$0xff]   ;;  %v2627_v18 = vld [vmem:[%s2868_s8 + $0xb4] sm:$0xff]   ;;  %v2629_v20 = vld [vmem:[%s2868_s8 + $0xbc] sm:$0xff]  }
  0x44   : > { %v2630_v21 = vld [vmem:[%s2868_s8 + $0x60] ss:$0 sps:$4 sm:$0xff]   ;;  %v2631_v22 = vld [vmem:[%s2868_s8 + $0xc4] ss:$0 sps:$4 sm:$0xff]   ;;  %v2632_v23 = vld [vmem:[%s2868_s8 + $0xc8] sm:$0xff]  }
  0x45   : > { %v2633_v24 = vld [vmem:[%s2868_s8 + $0x12c] sm:$0xff]   ;;  %v2635_v26 = vld [vmem:[%s2868_s8 + $0x134] sm:$0xff]   ;;  %v2637_v28 = vld [vmem:[%s2868_s8 + $0x13c] sm:$0xff]  }
  0x46   : > { %2305 = vmatpush3.bf16.msra.mxu0 %v2601_v56  ;;  %2373 = vmatpush3.bf16.msra.mxu1 %v2601_v56  ;;  %v2634_v25 = vld [vmem:[%s2868_s8 + $0xd0] sm:$0xff]   ;;  %v2636_v27 = vld [vmem:[%s2868_s8 + $0xd8] sm:$0xff]   ;;  %v2638_v29 = vld [vmem:[%s2868_s8 + $0xe0] sm:$0xff]  }
  0x47   : > { %2306 = vmatprep.subr.bf16.mxu0 %v2682_v53  ;;  %2374 = vmatprep.subr.bf16.mxu1 %v2682_v53  ;;  %v2639_v30 = vld [vmem:[%s2868_s8 + $0x144] sm:$0xff]   ;;  %v2641_v32 = vld [vmem:[%s2868_s8 + $0x14c] sm:$0xff]   ;;  %v2643_v34 = vld [vmem:[%s2868_s8 + $0x154] sm:$0xff]  }
  0x48   : > { %v2640_v31 = vld [vmem:[%s2868_s8 + $0xe8] sm:$0xff]   ;;  %v2642_v33 = vld [vmem:[%s2868_s8 + $0xf0] sm:$0xff]   ;;  %v2644_v35 = vld [vmem:[%s2868_s8 + $0xf8] sm:$0xff]  }
  0x49   : > { %v2645_v36 = vld [vmem:[%s2868_s8 + $0x15c] sm:$0xff]   ;;  %v2647_v38 = vld [vmem:[%s2868_s8 + $0x164] sm:$0xff]   ;;  %v2649_v40 = vld [vmem:[%s2868_s8 + $0x16c] sm:$0xff]  }
  0x4a   : > { %2307 = vmatpush3.bf16.msra.mxu0 %v2602_v57  ;;  %2375 = vmatpush3.bf16.msra.mxu1 %v2602_v57  ;;  %v2646_v37 = vld [vmem:[%s2868_s8 + $0x100] sm:$0xff]   ;;  %v2648_v39 = vld [vmem:[%s2868_s8 + $0x108] sm:$0xff]   ;;  %v2650_v41 = vld [vmem:[%s2868_s8 + $0x110] sm:$0xff]  }
  0x4b   : > { %2308 = vmatprep.subr.bf16.mxu0 %v2682_v53  ;;  %2376 = vmatprep.subr.bf16.mxu1 %v2682_v53  ;;  %v2651_v42 = vld [vmem:[%s2868_s8 + $0x174] sm:$0xff]   ;;  %v2653_v44 = vld [vmem:[%s2868_s8 + $0x17c] sm:$0xff]   ;;  %v2655_v46 = vld [vmem:[%s2868_s8 + $0x184] sm:$0xff]  }
  0x4c   : > { %v2652_v43 = vld [vmem:[%s2868_s8 + $0x118] sm:$0xff]   ;;  %v2654_v45 = vld [vmem:[%s2868_s8 + $0x120] sm:$0xff]   ;;  %v2656_v47 = vld [vmem:[%s2868_s8 + $0x128] ss:$0 sps:$4 sm:$0xff]  }
  0x4d   : > { %v2657_v48 = vld [vmem:[%s2868_s8 + $0x18c] ss:$0 sps:$4 sm:$0xff]  }
  0x4e   : > { %2309 = vmatpush3.bf16.msra.mxu0 %v2603_v58  ;;  %2377 = vmatpush3.bf16.msra.mxu1 %v2603_v58 }
  0x4f   : > { %2310 = vmatprep.subr.bf16.mxu0 %v2682_v53  ;;  %2378 = vmatprep.subr.bf16.mxu1 %v2682_v53 }
  0x52   : > { %2311 = vmatpush3.bf16.msra.mxu0 %v2604_v59  ;;  %2379 = vmatpush3.bf16.msra.mxu1 %v2604_v59 }
  0x53   : > { %2312 = vmatprep.subr.bf16.mxu0 %v2682_v53  ;;  %2380 = vmatprep.subr.bf16.mxu1 %v2682_v53 }
  0x56   : > { %2313 = vmatpush3.bf16.msra.mxu0 %v2605_v60  ;;  %2381 = vmatpush3.bf16.msra.mxu1 %v2605_v60 }
  0x57   : > { %2434 = vmatprep.subr.bf16.mxu0 %v2682_v53  ;;  %2502 = vmatprep.subr.bf16.mxu1 %v2682_v53 }
  0x59   : > { %2315 = vmatmul.mubr.bf16.vlgmr.msra.gmra.mrb[0].mxu0 %v2606_v61  ;;  %2383 = vmatmul.mubr.bf16.vlgmr.msra.gmra.mrb[0].mxu1 %v2607_v62 }
  0x5a   : > { %2435 = vmatpush3.bf16.msra.mxu0 %v2598_v52  ;;  %2503 = vmatpush3.bf16.msra.mxu1 %v2598_v52 }
  0x5b   : > { %2318 = vmatprep.mubr.msk.bf16.mxu0 %vm2683_vm0, %v2682_v53  ;;  %2386 = vmatprep.mubr.msk.bf16.mxu1 %vm2683_vm0, %v2682_v53 }
  0x5c   : > { %2436 = vmatprep.subr.bf16.mxu0 %v2682_v53  ;;  %2504 = vmatprep.subr.bf16.mxu1 %v2682_v53 }
  0x5e   : > { %2437 = vmatpush3.bf16.msra.mxu0 %v2599_v54  ;;  %2505 = vmatpush3.bf16.msra.mxu1 %v2599_v54 }
  0x5f   : > { %2438 = vmatprep.subr.bf16.mxu0 %v2682_v53  ;;  %2506 = vmatprep.subr.bf16.mxu1 %v2682_v53 }
  0x61   : > { %2319 = vmatmul.mubr.bf16.gmra.mrb[4].mxu0 %v2608_v63  ;;  %2387 = vmatmul.mubr.bf16.gmra.mrb[4].mxu1 %v2609_v0 }
  0x62   : > { %2322 = vmatprep.mubr.msk.bf16.mxu0 %vm2683_vm0, %v2682_v53  ;;  %2390 = vmatprep.mubr.msk.bf16.mxu1 %vm2683_vm0, %v2682_v53 }
  0x63   : > { %2439 = vmatpush3.bf16.msra.mxu0 %v2600_v55  ;;  %2507 = vmatpush3.bf16.msra.mxu1 %v2600_v55 }
  0x64   : > { %2440 = vmatprep.subr.bf16.mxu0 %v2682_v53  ;;  %2508 = vmatprep.subr.bf16.mxu1 %v2682_v53 }
  0x67   : > { %2441 = vmatpush3.bf16.msra.mxu0 %v2601_v56  ;;  %2509 = vmatpush3.bf16.msra.mxu1 %v2601_v56 }
  0x68   : > { %2442 = vmatprep.subr.bf16.mxu0 %v2682_v53  ;;  %2510 = vmatprep.subr.bf16.mxu1 %v2682_v53 }
  0x69   : > { %2323 = vmatmul.mubr.bf16.gmra.mrb[8].mxu0 %v2610_v1  ;;  %2391 = vmatmul.mubr.bf16.gmra.mrb[8].mxu1 %v2611_v2 }
  0x6a   : > { %2326 = vmatprep.mubr.msk.bf16.mxu0 %vm2683_vm0, %v2682_v53  ;;  %2394 = vmatprep.mubr.msk.bf16.mxu1 %vm2683_vm0, %v2682_v53 }
  0x6b   : > { %2443 = vmatpush3.bf16.msra.mxu0 %v2602_v57  ;;  %2511 = vmatpush3.bf16.msra.mxu1 %v2602_v57 }
  0x6c   : > { %2444 = vmatprep.subr.bf16.mxu0 %v2682_v53  ;;  %2512 = vmatprep.subr.bf16.mxu1 %v2682_v53 }
  0x6f   : > { %2445 = vmatpush3.bf16.msra.mxu0 %v2603_v58  ;;  %2513 = vmatpush3.bf16.msra.mxu1 %v2603_v58 }
  0x70   : > { %2446 = vmatprep.subr.bf16.mxu0 %v2682_v53  ;;  %2514 = vmatprep.subr.bf16.mxu1 %v2682_v53 }
  0x71   : > { %2327 = vmatmul.mubr.bf16.gmra.mrb[12].mxu0 %v2612_v3  ;;  %2395 = vmatmul.mubr.bf16.gmra.mrb[12].mxu1 %v2613_v4 }
  0x72   : > { %2330 = vmatprep.mubr.msk.bf16.mxu0 %vm2683_vm0, %v2682_v53  ;;  %2398 = vmatprep.mubr.msk.bf16.mxu1 %vm2683_vm0, %v2682_v53 }
  0x73   : > { %2447 = vmatpush3.bf16.msra.mxu0 %v2604_v59  ;;  %2515 = vmatpush3.bf16.msra.mxu1 %v2604_v59 }
  0x74   : > { %2448 = vmatprep.subr.bf16.mxu0 %v2682_v53  ;;  %2516 = vmatprep.subr.bf16.mxu1 %v2682_v53 }
  0x77   : > { %2449 = vmatpush3.bf16.msra.mxu0 %v2605_v60  ;;  %2517 = vmatpush3.bf16.msra.mxu1 %v2605_v60 }
  0x79   : > { %2331 = vmatmul.mubr.bf16.gmra.mrb[16].mxu0 %v2614_v5  ;;  %2399 = vmatmul.mubr.bf16.gmra.mrb[16].mxu1 %v2615_v6 }
  0x7a   : > { %2334 = vmatprep.mubr.msk.bf16.mxu0 %vm2683_vm0, %v2682_v53  ;;  %2402 = vmatprep.mubr.msk.bf16.mxu1 %vm2683_vm0, %v2682_v53 }
  0x81   : > { %2335 = vmatmul.mubr.bf16.gmra.mrb[20].mxu0 %v2616_v7  ;;  %2403 = vmatmul.mubr.bf16.gmra.mrb[20].mxu1 %v2617_v8 }
  0x82   : > { %2338 = vmatprep.mubr.msk.bf16.mxu0 %vm2683_vm0, %v2682_v53  ;;  %2406 = vmatprep.mubr.msk.bf16.mxu1 %vm2683_vm0, %v2682_v53 }
  0x89   : > { %2339 = vmatmul.mubr.bf16.gmra.mrb[24].mxu0 %v2618_v9  ;;  %2407 = vmatmul.mubr.bf16.gmra.mrb[24].mxu1 %v2619_v10 }
  0x8a   : > { %2342 = vmatprep.mubr.msk.bf16.mxu0 %vm2683_vm0, %v2682_v53  ;;  %2410 = vmatprep.mubr.msk.bf16.mxu1 %vm2683_vm0, %v2682_v53 }
  0x91   : > { %2343 = vmatmul.mubr.bf16.gmra.mrb[28].mxu0 %v2620_v11  ;;  %2411 = vmatmul.mubr.bf16.gmra.mrb[28].mxu1 %v2621_v12 }
  0x92   : > { %2346 = vmatprep.mubr.msk.bf16.mxu0 %vm2683_vm0, %v2682_v53  ;;  %2414 = vmatprep.mubr.msk.bf16.mxu1 %vm2683_vm0, %v2682_v53 }
  0x99   : > { %2347 = vmatmul.mubr.bf16.gmra.mrb[32].mxu0 %v2622_v13  ;;  %2415 = vmatmul.mubr.bf16.gmra.mrb[32].mxu1 %v2623_v14 }
  0x9a   : > { %2350 = vmatprep.mubr.msk.bf16.mxu0 %vm2683_vm0, %v2682_v53  ;;  %2418 = vmatprep.mubr.msk.bf16.mxu1 %vm2683_vm0, %v2682_v53 }
  0xa1   : > { %2351 = vmatmul.mubr.bf16.gmra.mrb[36].mxu0 %v2624_v15  ;;  %2419 = vmatmul.mubr.bf16.gmra.mrb[36].mxu1 %v2625_v16 }
  0xa2   : > { %2354 = vmatprep.mubr.msk.bf16.mxu0 %vm2683_vm0, %v2682_v53  ;;  %2422 = vmatprep.mubr.msk.bf16.mxu1 %vm2683_vm0, %v2682_v53 }
  0xa9   : > { %2355 = vmatmul.mubr.bf16.gmra.mrb[40].mxu0 %v2626_v17  ;;  %2423 = vmatmul.mubr.bf16.gmra.mrb[40].mxu1 %v2627_v18 }
  0xaa   : > { %2358 = vmatprep.mubr.msk.bf16.mxu0 %vm2683_vm0, %v2682_v53  ;;  %2426 = vmatprep.mubr.msk.bf16.mxu1 %vm2683_vm0, %v2682_v53 }
  0xb1   : > { %2359 = vmatmul.mubr.bf16.gmra.mrb[44].mxu0 %v2628_v19  ;;  %2427 = vmatmul.mubr.bf16.gmra.mrb[44].mxu1 %v2629_v20 }
  0xb2   : > { %2362 = vmatprep.mubr.msk.bf16.mxu0 %vm2683_vm0, %v2682_v53  ;;  %2430 = vmatprep.mubr.msk.bf16.mxu1 %vm2683_vm0, %v2682_v53 }
  0xb9   : > { %2363 = vmatmul.mubr.bf16.gmra.mrb[48].mxu0 %v2630_v21  ;;  %2431 = vmatmul.mubr.bf16.gmra.mrb[48].mxu1 %v2631_v22 }
  0xba   : > { %2450 = vmatprep.mubr.msk.bf16.mxu0 %vm2683_vm0, %v2682_v53  ;;  %2518 = vmatprep.mubr.msk.bf16.mxu1 %vm2683_vm0, %v2682_v53 }
  0xc1   : > { %2451 = vmatmul.mubr.bf16.vlgmr.msra.gmra.mrb[52].mxu0 %v2632_v23  ;;  %2519 = vmatmul.mubr.bf16.vlgmr.msra.gmra.mrb[52].mxu1 %v2633_v24 }
  0xc2   : > { %2454 = vmatprep.mubr.msk.bf16.mxu0 %vm2683_vm0, %v2682_v53  ;;  %2522 = vmatprep.mubr.msk.bf16.mxu1 %vm2683_vm0, %v2682_v53 }
  0xc9   : > { %2455 = vmatmul.mubr.bf16.gmra.mrb[56].mxu0 %v2634_v25  ;;  %2523 = vmatmul.mubr.bf16.gmra.mrb[56].mxu1 %v2635_v26 }
  0xca   : > { %2458 = vmatprep.mubr.msk.bf16.mxu0 %vm2683_vm0, %v2682_v53  ;;  %2526 = vmatprep.mubr.msk.bf16.mxu1 %vm2683_vm0, %v2682_v53 }
  0xd1   : > { %2459 = vmatmul.mubr.bf16.gmra.mrb[60].mxu0 %v2636_v27  ;;  %2527 = vmatmul.mubr.bf16.gmra.mrb[60].mxu1 %v2637_v28 }
  0xd2   : > { %2462 = vmatprep.mubr.msk.bf16.mxu0 %vm2683_vm0, %v2682_v53  ;;  %2530 = vmatprep.mubr.msk.bf16.mxu1 %vm2683_vm0, %v2682_v53 }
  0xd9   : > { %2463 = vmatmul.mubr.bf16.gmra.mrb[64].mxu0 %v2638_v29  ;;  %2531 = vmatmul.mubr.bf16.gmra.mrb[64].mxu1 %v2639_v30 }
  0xda   : > { %2466 = vmatprep.mubr.msk.bf16.mxu0 %vm2683_vm0, %v2682_v53  ;;  %2534 = vmatprep.mubr.msk.bf16.mxu1 %vm2683_vm0, %v2682_v53 }
  0xe1   : > { %2467 = vmatmul.mubr.bf16.gmra.mrb[68].mxu0 %v2640_v31  ;;  %2535 = vmatmul.mubr.bf16.gmra.mrb[68].mxu1 %v2641_v32 }
  0xe2   : > { %2470 = vmatprep.mubr.msk.bf16.mxu0 %vm2683_vm0, %v2682_v53  ;;  %2538 = vmatprep.mubr.msk.bf16.mxu1 %vm2683_vm0, %v2682_v53 }
  0xe9   : > { %2471 = vmatmul.mubr.bf16.gmra.mrb[72].mxu0 %v2642_v33  ;;  %2539 = vmatmul.mubr.bf16.gmra.mrb[72].mxu1 %v2643_v34 }
  0xea   : > { %2474 = vmatprep.mubr.msk.bf16.mxu0 %vm2683_vm0, %v2682_v53  ;;  %2542 = vmatprep.mubr.msk.bf16.mxu1 %vm2683_vm0, %v2682_v53 }
  0xf1   : > { %2475 = vmatmul.mubr.bf16.gmra.mrb[76].mxu0 %v2644_v35  ;;  %2543 = vmatmul.mubr.bf16.gmra.mrb[76].mxu1 %v2645_v36 }
  0xf2   : > { %2478 = vmatprep.mubr.msk.bf16.mxu0 %vm2683_vm0, %v2682_v53  ;;  %2546 = vmatprep.mubr.msk.bf16.mxu1 %vm2683_vm0, %v2682_v53 }
  0xf9   : > { %2479 = vmatmul.mubr.bf16.gmra.mrb[80].mxu0 %v2646_v37  ;;  %2547 = vmatmul.mubr.bf16.gmra.mrb[80].mxu1 %v2647_v38 }
  0xfa   : > { %2482 = vmatprep.mubr.msk.bf16.mxu0 %vm2683_vm0, %v2682_v53  ;;  %2550 = vmatprep.mubr.msk.bf16.mxu1 %vm2683_vm0, %v2682_v53 }
 0x101   : > { %2483 = vmatmul.mubr.bf16.gmra.mrb[84].mxu0 %v2648_v39  ;;  %2551 = vmatmul.mubr.bf16.gmra.mrb[84].mxu1 %v2649_v40 }
 0x102   : > { %2486 = vmatprep.mubr.msk.bf16.mxu0 %vm2683_vm0, %v2682_v53  ;;  %2554 = vmatprep.mubr.msk.bf16.mxu1 %vm2683_vm0, %v2682_v53 }
 0x109   : > { %2487 = vmatmul.mubr.bf16.gmra.mrb[88].mxu0 %v2650_v41  ;;  %2555 = vmatmul.mubr.bf16.gmra.mrb[88].mxu1 %v2651_v42 }
 0x10a   : > { %2490 = vmatprep.mubr.msk.bf16.mxu0 %vm2683_vm0, %v2682_v53  ;;  %2558 = vmatprep.mubr.msk.bf16.mxu1 %vm2683_vm0, %v2682_v53 }
 0x111   : > { %2491 = vmatmul.mubr.bf16.gmra.mrb[92].mxu0 %v2652_v43  ;;  %2559 = vmatmul.mubr.bf16.gmra.mrb[92].mxu1 %v2653_v44 }
 0x112   : > { %2494 = vmatprep.mubr.msk.bf16.mxu0 %vm2683_vm0, %v2682_v53  ;;  %2562 = vmatprep.mubr.msk.bf16.mxu1 %vm2683_vm0, %v2682_v53 }
 0x119   : > { %2495 = vmatmul.mubr.bf16.gmra.mrb[96].mxu0 %v2654_v45  ;;  %2563 = vmatmul.mubr.bf16.gmra.mrb[96].mxu1 %v2655_v46 }
 0x11a   : > { %2498 = vmatprep.mubr.msk.bf16.mxu0 %vm2683_vm0, %v2682_v53  ;;  %2566 = vmatprep.mubr.msk.bf16.mxu1 %vm2683_vm0, %v2682_v53 }
 0x121   : > { %2499 = vmatmul.mubr.bf16.gmra.mrb[100].mxu0 %v2656_v47  ;;  %2567 = vmatmul.mubr.bf16.gmra.mrb[100].mxu1 %v2657_v48 }
 0x12c   : > { %v3063_v49 = vpop.f32.mrb[0].mxu0  ;;  %v3065_v50 = vpop.f32.mrb[0].mxu1 }
 0x12d   : > { %v1151_v51 = vmax.f32 %v3063_v49, %v3065_v50  ;;  %v2316_v52 = vpop.f32.mrb[1].mxu0  ;;  %v2384_v54 = vpop.f32.mrb[1].mxu1 }
 0x12e   : > { %v3069_v55 = vpop.f32.mrb[2].mxu0  ;;  %v3071_v56 = vpop.f32.mrb[2].mxu1 }
 0x12f   : > { %v1152_v53 = vmax.f32 %v3069_v55, %v3071_v56  ;;  %v2317_v57 = vpop.f32.mrb[3].mxu0  ;;  %v2385_v58 = vpop.f32.mrb[3].mxu1 }
 0x134   : > { %v3075_v59 = vpop.f32.mrb[4].mxu0  ;;  %v3077_v60 = vpop.f32.mrb[4].mxu1 }
 0x135   : > { %v2320_v62 = vpop.f32.mrb[5].mxu0  ;;  %v2388_v63 = vpop.f32.mrb[5].mxu1 }
 0x136   : > { %v3081_v0 = vpop.f32.mrb[6].mxu0  ;;  %v3083_v1 = vpop.f32.mrb[6].mxu1 }
 0x137   : > { %v2321_v3 = vpop.f32.mrb[7].mxu0  ;;  %v2389_v4 = vpop.f32.mrb[7].mxu1 }
 0x13c   : > { %v3087_v5 = vpop.f32.mrb[8].mxu0  ;;  %v3089_v6 = vpop.f32.mrb[8].mxu1 }
 0x13d   : > { %v2324_v8 = vpop.f32.mrb[9].mxu0  ;;  %v2392_v9 = vpop.f32.mrb[9].mxu1 }
 0x13e   : > { %v3093_v10 = vpop.f32.mrb[10].mxu0  ;;  %v3095_v11 = vpop.f32.mrb[10].mxu1 }
 0x13f   : > { %v2325_v13 = vpop.f32.mrb[11].mxu0  ;;  %v2393_v14 = vpop.f32.mrb[11].mxu1 }
 0x144   : > { %v3099_v15 = vpop.f32.mrb[12].mxu0  ;;  %v3101_v16 = vpop.f32.mrb[12].mxu1 }
 0x145   : > { %v2328_v18 = vpop.f32.mrb[13].mxu0  ;;  %v2396_v19 = vpop.f32.mrb[13].mxu1 }
 0x146   : > { %v3105_v20 = vpop.f32.mrb[14].mxu0  ;;  %v3107_v21 = vpop.f32.mrb[14].mxu1 }
 0x147   : > { %v2329_v23 = vpop.f32.mrb[15].mxu0  ;;  %v2397_v24 = vpop.f32.mrb[15].mxu1 }
 0x14c   : > { %v3111_v25 = vpop.f32.mrb[16].mxu0  ;;  %v3113_v26 = vpop.f32.mrb[16].mxu1 }
 0x14d   : > { %v2332_v28 = vpop.f32.mrb[17].mxu0  ;;  %v2400_v29 = vpop.f32.mrb[17].mxu1 }
 0x14e   : > { %v3117_v30 = vpop.f32.mrb[18].mxu0  ;;  %v3119_v31 = vpop.f32.mrb[18].mxu1 }
 0x14f   : > { %v2333_v33 = vpop.f32.mrb[19].mxu0  ;;  %v2401_v34 = vpop.f32.mrb[19].mxu1 }
 0x154   : > { %v3123_v35 = vpop.f32.mrb[20].mxu0  ;;  %v3125_v36 = vpop.f32.mrb[20].mxu1 }
 0x155   : > { %v2336_v38 = vpop.f32.mrb[21].mxu0  ;;  %v2404_v39 = vpop.f32.mrb[21].mxu1 }
 0x156   : > { %v3129_v40 = vpop.f32.mrb[22].mxu0  ;;  %v3131_v41 = vpop.f32.mrb[22].mxu1 }
 0x157   : > { %v2337_v43 = vpop.f32.mrb[23].mxu0  ;;  %v2405_v44 = vpop.f32.mrb[23].mxu1 }
 0x15c   : > { %v3135_v45 = vpop.f32.mrb[24].mxu0  ;;  %v3137_v46 = vpop.f32.mrb[24].mxu1 }
 0x15d   : > { %v2340_v48 = vpop.f32.mrb[25].mxu0  ;;  %v2408_v52 = vpop.f32.mrb[25].mxu1 }
 0x15e   : > { %v3141_v54 = vpop.f32.mrb[26].mxu0  ;;  %v3143_v57 = vpop.f32.mrb[26].mxu1 }
 0x15f   : > { %v2341_v62 = vpop.f32.mrb[27].mxu0  ;;  %v2409_v63 = vpop.f32.mrb[27].mxu1 }
 0x164   : > { %v3147_v3 = vpop.f32.mrb[28].mxu0  ;;  %v3149_v4 = vpop.f32.mrb[28].mxu1 }
 0x165   : > { %v2344_v9 = vpop.f32.mrb[29].mxu0  ;;  %v2412_v13 = vpop.f32.mrb[29].mxu1 }
 0x166   : > { %v3153_v14 = vpop.f32.mrb[30].mxu0  ;;  %v3155_v18 = vpop.f32.mrb[30].mxu1 }
 0x167   : > { %v2345_v23 = vpop.f32.mrb[31].mxu0  ;;  %v2413_v24 = vpop.f32.mrb[31].mxu1 }
 0x16c   : > { %v3159_v28 = vpop.f32.mrb[32].mxu0  ;;  %v3161_v29 = vpop.f32.mrb[32].mxu1 }
 0x16d   : > { %v2348_v34 = vpop.f32.mrb[33].mxu0  ;;  %v2416_v38 = vpop.f32.mrb[33].mxu1 }
 0x16e   : > { %v3165_v39 = vpop.f32.mrb[34].mxu0  ;;  %v3167_v43 = vpop.f32.mrb[34].mxu1 }
 0x16f   : > { %v2349_v48 = vpop.f32.mrb[35].mxu0  ;;  %v2417_v52 = vpop.f32.mrb[35].mxu1 }
 0x174   : > { %v3171_v62 = vpop.f32.mrb[36].mxu0  ;;  %v3173_v63 = vpop.f32.mrb[36].mxu1 }
 0x175   : > { %v2352_v13 = vpop.f32.mrb[37].mxu0  ;;  %v2420_v23 = vpop.f32.mrb[37].mxu1 }
 0x176   : > { %v3177_v24 = vpop.f32.mrb[38].mxu0  ;;  %v3179_v34 = vpop.f32.mrb[38].mxu1 }
 0x177   : > { %v2353_v33 = vpop.f32.mrb[39].mxu0  ;;  %v2421_v44 = vpop.f32.mrb[39].mxu1 }
 0x17c   : > { %v3183_v48 = vpop.f32.mrb[40].mxu0  ;;  %v3185_v52 = vpop.f32.mrb[40].mxu1 }
 0x17d   : > { %v2356_v8 = vpop.f32.mrb[41].mxu0  ;;  %v2424_v9 = vpop.f32.mrb[41].mxu1 }
 0x17e   : > { %v3189_v13 = vpop.f32.mrb[42].mxu0  ;;  %v3191_v23 = vpop.f32.mrb[42].mxu1 }
 0x17f   : > { %v2357_v47 = vpop.f32.mrb[43].mxu0  ;;  %v2425_v38 = vpop.f32.mrb[43].mxu1 }
 0x184   : > { %v3195_v33 = vpop.f32.mrb[44].mxu0  ;;  %v3197_v44 = vpop.f32.mrb[44].mxu1 }
 0x185   : > { %v2360_v37 = vpop.f32.mrb[45].mxu0  ;;  %v2428_v8 = vpop.f32.mrb[45].mxu1 }
 0x186   : > { %v3201_v9 = vpop.f32.mrb[46].mxu0  ;;  %v3203_v19 = vpop.f32.mrb[46].mxu1 }
 0x187   : > { %v2361_v58 = vpop.f32.mrb[47].mxu0  ;;  %v2429_v47 = vpop.f32.mrb[47].mxu1 }
 0x18c   : > { %v3207_v38 = vpop.f32.mrb[48].mxu0  ;;  %v3209_v27 = vpop.f32.mrb[48].mxu1 }
 0x18d   : > { %3354 = vst [vmem:[#allocation3_spill] sm:$0xff] %v3207_v38  ;;  %3355 = vst [vmem:[#allocation4_spill] sm:$0xff] %v3209_v27  ;;  %v2364_v42 = vpop.f32.mrb[49].mxu0  ;;  %v2432_v37 = vpop.f32.mrb[49].mxu1 }
 0x18e   : > { %v910_v17 = vpop.f32.mrb[50].mxu0  ;;  %v1148_v8 = vpop.f32.mrb[50].mxu1  ;;  %v3221_v42 = vld [vmem:[%s3350_s2] ss:$0 sm:$0xff] }
 0x18f   : > { %v2365_v12 = vpop.f32.mrb[51].mxu0  ;;  %v2433_v7 = vpop.f32.mrb[51].mxu1 }
 0x194   : > { %v1312_v2 = vpop.f32.mrb[52].mxu0  ;;  %v1575_v32 = vpop.f32.mrb[52].mxu1 }
 0x195   : > { %v1414_v58 = vmax.f32 %v1151_v51, %v1312_v2  ;;  %v2452_v47 = vpop.f32.mrb[53].mxu0  ;;  %v2520_v61 = vpop.f32.mrb[53].mxu1 }
 0x196   : > { %v1315_v17 = vpop.f32.mrb[54].mxu0  ;;  %v1578_v37 = vpop.f32.mrb[54].mxu1 }
 0x197   : > { %v1677_v12 = vmax.f32 %v1414_v58, %v1575_v32  ;;  %v1415_v7 = vmax.f32 %v1152_v53, %v1315_v17  ;;  %v2453_v8 = vpop.f32.mrb[55].mxu0  ;;  %v2521_v22 = vpop.f32.mrb[55].mxu1  ;;  %v3356_v32 = vmax.f32 %v3075_v59, %v3077_v60 }
 0x199   : > { %v1709_v49 = vadd.f32 %v3221_v42, %v1677_v12  ;;  %v1678_v50 = vmax.f32 %v1415_v7, %v1578_v37  ;;  %v3357_v37 = vmax.f32 %v3081_v0, %v3083_v1 }
 0x19b   : > { %v1710_v51 = vadd.f32 %v3221_v42, %v1678_v50  ;;  %v1734_v47 = vmax.f32 %v1709_v49, 0.0 }
 0x19c   : > { %v1320_v61 = vpop.f32.mrb[56].mxu0  ;;  %v1583_v2 = vpop.f32.mrb[56].mxu1 }
 0x19d   : > { %v1735_v27 = vmax.f32 %v1710_v51, 0.0  ;;  %v1416_v58 = vmax.f32 %v3356_v32, %v1320_v61  ;;  %v2456_v38 = vpop.f32.mrb[57].mxu0  ;;  %v2524_v55 = vpop.f32.mrb[57].mxu1 }
 0x19e   : > { %v1323_v56 = vpop.f32.mrb[58].mxu0  ;;  %v1586_v53 = vpop.f32.mrb[58].mxu1 }
 0x19f   : > { %v2146_v22 = vpack.c.bf16 %v1735_v27, %v1734_v47  ;;  %v1679_v17 = vmax.f32 %v1416_v58, %v1583_v2  ;;  %v1417_v12 = vmax.f32 %v3357_v37, %v1323_v56  ;;  %v2457_v7 = vpop.f32.mrb[59].mxu0  ;;  %v2525_v8 = vpop.f32.mrb[59].mxu1  ;;  %v3358_v27 = vmax.f32 %v3087_v5, %v3089_v6 }
 0x1a0   : > { %v3359_v56 = vmax.f32 %v3093_v10, %v3095_v11 }
 0x1a1   : > { %2147 = vst [vmem:[%s3234_s28] sm:$0xff] %v2146_v22   ;;  %v1711_v59 = vadd.f32 %v3221_v42, %v1679_v17  ;;  %v1680_v60 = vmax.f32 %v1417_v12, %v1586_v53 }
 0x1a3   : > { %v1712_v38 = vadd.f32 %v3221_v42, %v1680_v60  ;;  %v1736_v51 = vmax.f32 %v1711_v59, 0.0  ;;  %v3360_v60 = vmax.f32 %v3099_v15, %v3101_v16 }
 0x1a4   : > { %v1328_v49 = vpop.f32.mrb[60].mxu0  ;;  %v1591_v50 = vpop.f32.mrb[60].mxu1 }
 0x1a5   : > { %v1737_v61 = vmax.f32 %v1712_v38, 0.0  ;;  %v1418_v2 = vmax.f32 %v3358_v27, %v1328_v49  ;;  %v2460_v47 = vpop.f32.mrb[61].mxu0  ;;  %v2528_v0 = vpop.f32.mrb[61].mxu1  ;;  %v3361_v27 = vmax.f32 %v3105_v20, %v3107_v21 }
 0x1a6   : > { %v1331_v1 = vpop.f32.mrb[62].mxu0  ;;  %v1594_v32 = vpop.f32.mrb[62].mxu1 }
 0x1a7   : > { %v2151_v58 = vpack.c.bf16 %v1737_v61, %v1736_v51  ;;  %v1681_v55 = vmax.f32 %v1418_v2, %v1591_v50  ;;  %v1419_v53 = vmax.f32 %v3359_v56, %v1331_v1  ;;  %v2461_v22 = vpop.f32.mrb[63].mxu0  ;;  %v2529_v17 = vpop.f32.mrb[63].mxu1 }
 0x1a9   : > { %2203 = vst [vmem:[%s3234_s28 + $0x8] sm:$0xff] %v2151_v58   ;;  %v1713_v37 = vadd.f32 %v3221_v42, %v1681_v55  ;;  %v1682_v12 = vmax.f32 %v1419_v53, %v1594_v32  ;;  %v3362_v53 = vmax.f32 %v3111_v25, %v3113_v26 }
 0x1ab   : > { %v1714_v5 = vadd.f32 %v3221_v42, %v1682_v12  ;;  %v1738_v8 = vmax.f32 %v1713_v37, 0.0 }
 0x1ac   : > { %v1336_v6 = vpop.f32.mrb[64].mxu0  ;;  %v1599_v7 = vpop.f32.mrb[64].mxu1 }
 0x1ad   : > { %v1739_v59 = vmax.f32 %v1714_v5, 0.0  ;;  %v1420_v38 = vmax.f32 %v3360_v60, %v1336_v6  ;;  %v2464_v49 = vpop.f32.mrb[65].mxu0  ;;  %v2532_v10 = vpop.f32.mrb[65].mxu1  ;;  %v3363_v6 = vmax.f32 %v3117_v30, %v3119_v31 }
 0x1ae   : > { %v1339_v11 = vpop.f32.mrb[66].mxu0  ;;  %v1602_v50 = vpop.f32.mrb[66].mxu1 }
 0x1af   : > { %v2156_v51 = vpack.c.bf16 %v1739_v59, %v1738_v8  ;;  %v1683_v61 = vmax.f32 %v1420_v38, %v1599_v7  ;;  %v1421_v2 = vmax.f32 %v3361_v27, %v1339_v11  ;;  %v2465_v47 = vpop.f32.mrb[67].mxu0  ;;  %v2533_v0 = vpop.f32.mrb[67].mxu1 }
 0x1b0   : > { %v3365_v0 = vmax.f32 %v3129_v40, %v3131_v41 }
 0x1b1   : > { %2204 = vst [vmem:[%s3234_s28 + $0x10] sm:$0xff] %v2156_v51   ;;  %v1715_v1 = vadd.f32 %v3221_v42, %v1683_v61  ;;  %v1684_v32 = vmax.f32 %v1421_v2, %v1602_v50  ;;  %v3364_v50 = vmax.f32 %v3123_v35, %v3125_v36 }
 0x1b3   : > { %v1716_v15 = vadd.f32 %v3221_v42, %v1684_v32  ;;  %v1740_v55 = vmax.f32 %v1715_v1, 0.0 }
 0x1b4   : > { %v1344_v16 = vpop.f32.mrb[68].mxu0  ;;  %v1607_v58 = vpop.f32.mrb[68].mxu1 }
 0x1b5   : > { %v1741_v56 = vmax.f32 %v1716_v15, 0.0  ;;  %v1422_v22 = vmax.f32 %v3362_v53, %v1344_v16  ;;  %v2468_v17 = vpop.f32.mrb[69].mxu0  ;;  %v2536_v20 = vpop.f32.mrb[69].mxu1 }
 0x1b6   : > { %v1347_v21 = vpop.f32.mrb[70].mxu0  ;;  %v1610_v37 = vpop.f32.mrb[70].mxu1 }
 0x1b7   : > { %v2161_v12 = vpack.c.bf16 %v1741_v56, %v1740_v55  ;;  %v1685_v5 = vmax.f32 %v1422_v22, %v1607_v58  ;;  %v1423_v7 = vmax.f32 %v3363_v6, %v1347_v21  ;;  %v2469_v8 = vpop.f32.mrb[71].mxu0  ;;  %v2537_v59 = vpop.f32.mrb[71].mxu1  ;;  %v3366_v22 = vmax.f32 %v3135_v45, %v3137_v46 }
 0x1b9   : > { %2205 = vst [vmem:[%s3234_s28 + $0x18] sm:$0xff] %v2161_v12   ;;  %v1717_v60 = vadd.f32 %v3221_v42, %v1685_v5  ;;  %v1686_v38 = vmax.f32 %v1423_v7, %v1610_v37  ;;  %v3367_v5 = vmax.f32 %v3141_v54, %v3143_v57 }
 0x1bb   : > { %v1718_v25 = vadd.f32 %v3221_v42, %v1686_v38  ;;  %v1742_v10 = vmax.f32 %v1717_v60, 0.0 }
 0x1bc   : > { %v1352_v26 = vpop.f32.mrb[72].mxu0  ;;  %v1615_v49 = vpop.f32.mrb[72].mxu1 }
 0x1bd   : > { %v1743_v11 = vmax.f32 %v1718_v25, 0.0  ;;  %v1424_v51 = vmax.f32 %v3364_v50, %v1352_v26  ;;  %v2472_v61 = vpop.f32.mrb[73].mxu0  ;;  %v2540_v30 = vpop.f32.mrb[73].mxu1 }
 0x1be   : > { %v1355_v31 = vpop.f32.mrb[74].mxu0  ;;  %v1618_v27 = vpop.f32.mrb[74].mxu1  ;;  %v3369_v30 = vmax.f32 %v3153_v14, %v3155_v18 }
 0x1bf   : > { %v2166_v2 = vpack.c.bf16 %v1743_v11, %v1742_v10  ;;  %v1687_v47 = vmax.f32 %v1424_v51, %v1615_v49  ;;  %v1425_v1 = vmax.f32 %v3365_v0, %v1355_v31  ;;  %v2473_v32 = vpop.f32.mrb[75].mxu0  ;;  %v2541_v15 = vpop.f32.mrb[75].mxu1  ;;  %v3368_v49 = vmax.f32 %v3147_v3, %v3149_v4 }
 0x1c1   : > { %2206 = vst [vmem:[%s3234_s28 + $0x20] sm:$0xff] %v2166_v2   ;;  %v1719_v16 = vadd.f32 %v3221_v42, %v1687_v47  ;;  %v1688_v58 = vmax.f32 %v1425_v1, %v1618_v27 }
 0x1c3   : > { %v1720_v35 = vadd.f32 %v3221_v42, %v1688_v58  ;;  %v1744_v56 = vmax.f32 %v1719_v16, 0.0  ;;  %v3370_v16 = vmax.f32 %v3159_v28, %v3161_v29 }
 0x1c4   : > { %v1360_v36 = vpop.f32.mrb[76].mxu0  ;;  %v1623_v55 = vpop.f32.mrb[76].mxu1 }
 0x1c5   : > { %v1745_v53 = vmax.f32 %v1720_v35, 0.0  ;;  %v1426_v17 = vmax.f32 %v3366_v22, %v1360_v36  ;;  %v2476_v20 = vpop.f32.mrb[77].mxu0  ;;  %v2544_v40 = vpop.f32.mrb[77].mxu1 }
 0x1c6   : > { %v1363_v41 = vpop.f32.mrb[78].mxu0  ;;  %v1626_v21 = vpop.f32.mrb[78].mxu1 }
 0x1c7   : > { %v2171_v37 = vpack.c.bf16 %v1745_v53, %v1744_v56  ;;  %v1689_v12 = vmax.f32 %v1426_v17, %v1623_v55  ;;  %v1427_v6 = vmax.f32 %v3367_v5, %v1363_v41  ;;  %v2477_v7 = vpop.f32.mrb[79].mxu0  ;;  %v2545_v8 = vpop.f32.mrb[79].mxu1  ;;  %v3371_v53 = vmax.f32 %v3165_v39, %v3167_v43 }
 0x1c8   : > { %v3372_v5 = vmax.f32 %v3171_v62, %v3173_v63 }
 0x1c9   : > { %2207 = vst [vmem:[%s3234_s28 + $0x28] sm:$0xff] %v2171_v37   ;;  %v1721_v59 = vadd.f32 %v3221_v42, %v1689_v12  ;;  %v1690_v60 = vmax.f32 %v1427_v6, %v1626_v21 }
 0x1cb   : > { %v1722_v45 = vadd.f32 %v3221_v42, %v1690_v60  ;;  %v1746_v25 = vmax.f32 %v1721_v59, 0.0 }
 0x1cc   : > { %v1368_v46 = vpop.f32.mrb[80].mxu0  ;;  %v1631_v38 = vpop.f32.mrb[80].mxu1 }
 0x1cd   : > { %v1747_v26 = vmax.f32 %v1722_v45, 0.0  ;;  %v1428_v10 = vmax.f32 %v3368_v49, %v1368_v46  ;;  %v2480_v11 = vpop.f32.mrb[81].mxu0  ;;  %v2548_v54 = vpop.f32.mrb[81].mxu1  ;;  %v3373_v45 = vmax.f32 %v3177_v24, %v3179_v34 }
 0x1ce   : > { %v1371_v57 = vpop.f32.mrb[82].mxu0  ;;  %v1634_v50 = vpop.f32.mrb[82].mxu1 }
 0x1cf   : > { %v2176_v51 = vpack.c.bf16 %v1747_v26, %v1746_v25  ;;  %v1691_v61 = vmax.f32 %v1428_v10, %v1631_v38  ;;  %v1429_v31 = vmax.f32 %v3369_v30, %v1371_v57  ;;  %v2481_v27 = vpop.f32.mrb[83].mxu0  ;;  %v2549_v2 = vpop.f32.mrb[83].mxu1  ;;  %v3374_v57 = vmax.f32 %v3183_v48, %v3185_v52 }
 0x1d0   : > { %v3375_v27 = vmax.f32 %v3189_v13, %v3191_v23 }
 0x1d1   : > { %2208 = vst [vmem:[%s3234_s28 + $0x30] sm:$0xff] %v2176_v51   ;;  %v1723_v47 = vadd.f32 %v3221_v42, %v1691_v61  ;;  %v1692_v0 = vmax.f32 %v1429_v31, %v1634_v50 }
 0x1d3   : > { %v1724_v3 = vadd.f32 %v3221_v42, %v1692_v0  ;;  %v1748_v32 = vmax.f32 %v1723_v47, 0.0 }
 0x1d4   : > { %v1376_v4 = vpop.f32.mrb[84].mxu0  ;;  %v1639_v1 = vpop.f32.mrb[84].mxu1 }
 0x1d5   : > { %v1749_v15 = vmax.f32 %v1724_v3, 0.0  ;;  %v1430_v58 = vmax.f32 %v3370_v16, %v1376_v4  ;;  %v2484_v35 = vpop.f32.mrb[85].mxu0  ;;  %v2552_v14 = vpop.f32.mrb[85].mxu1  ;;  %v3376_v16 = vmax.f32 %v3195_v33, %v3197_v44 }
 0x1d6   : > { %v1379_v18 = vpop.f32.mrb[86].mxu0  ;;  %v1642_v36 = vpop.f32.mrb[86].mxu1 }
 0x1d7   : > { %v2181_v55 = vpack.c.bf16 %v1749_v15, %v1748_v32  ;;  %v1693_v56 = vmax.f32 %v1430_v58, %v1639_v1  ;;  %v1431_v22 = vmax.f32 %v3371_v53, %v1379_v18  ;;  %v2485_v17 = vpop.f32.mrb[87].mxu0  ;;  %v2553_v20 = vpop.f32.mrb[87].mxu1 }
 0x1d9   : > { %2209 = vst [vmem:[%s3234_s28 + $0x38] sm:$0xff] %v2181_v55   ;;  %v1725_v40 = vadd.f32 %v3221_v42, %v1693_v56  ;;  %v1694_v41 = vmax.f32 %v1431_v22, %v1642_v36  ;;  %v3377_v55 = vmax.f32 %v3201_v9, %v3203_v19 }
 0x1db   : > { %v1726_v28 = vadd.f32 %v3221_v42, %v1694_v41  ;;  %v1750_v37 = vmax.f32 %v1725_v40, 0.0 }
 0x1dc   : > { %v1384_v29 = vpop.f32.mrb[88].mxu0  ;;  %v1647_v21 = vpop.f32.mrb[88].mxu1 }
 0x1dd   : > { %v1751_v12 = vmax.f32 %v1726_v28, 0.0  ;;  %v1432_v6 = vmax.f32 %v3372_v5, %v1384_v29  ;;  %v2488_v7 = vpop.f32.mrb[89].mxu0  ;;  %v2556_v39 = vpop.f32.mrb[89].mxu1  ;;  %v3378_v29 = vld [vmem:[#allocation3_spill] sm:$0xff] }
 0x1de   : > { %v1387_v43 = vpop.f32.mrb[90].mxu0  ;;  %v1650_v8 = vpop.f32.mrb[90].mxu1 }
 0x1df   : > { %v2186_v59 = vpack.c.bf16 %v1751_v12, %v1750_v37  ;;  %v1695_v60 = vmax.f32 %v1432_v6, %v1647_v21  ;;  %v1433_v46 = vmax.f32 %v3373_v45, %v1387_v43  ;;  %v2489_v38 = vpop.f32.mrb[91].mxu0  ;;  %v2557_v25 = vpop.f32.mrb[91].mxu1  ;;  %v3379_v21 = vld [vmem:[#allocation4_spill] sm:$0xff] }
 0x1e0   : > { %v3380_v37 = vmax.f32 %v3378_v29, %v3379_v21 }
 0x1e1   : > { %2210 = vst [vmem:[%s3234_s28 + $0x40] sm:$0xff] %v2186_v59   ;;  %v1727_v26 = vadd.f32 %v3221_v42, %v1695_v60  ;;  %v1696_v49 = vmax.f32 %v1433_v46, %v1650_v8 }
 0x1e3   : > { %v1728_v62 = vadd.f32 %v3221_v42, %v1696_v49  ;;  %v1752_v11 = vmax.f32 %v1727_v26, 0.0 }
 0x1e4   : > { %v1392_v63 = vpop.f32.mrb[92].mxu0  ;;  %v1655_v10 = vpop.f32.mrb[92].mxu1 }
 0x1e5   : > { %v1753_v54 = vmax.f32 %v1728_v62, 0.0  ;;  %v1434_v50 = vmax.f32 %v3374_v57, %v1392_v63  ;;  %v2492_v51 = vpop.f32.mrb[93].mxu0  ;;  %v2560_v24 = vpop.f32.mrb[93].mxu1 }
 0x1e6   : > { %v1395_v34 = vpop.f32.mrb[94].mxu0  ;;  %v1658_v61 = vpop.f32.mrb[94].mxu1 }
 0x1e7   : > { %v2191_v30 = vpack.c.bf16 %v1753_v54, %v1752_v11  ;;  %v1697_v31 = vmax.f32 %v1434_v50, %v1655_v10  ;;  %v1435_v2 = vmax.f32 %v3375_v27, %v1395_v34  ;;  %v2493_v47 = vpop.f32.mrb[95].mxu0  ;;  %v2561_v0 = vpop.f32.mrb[95].mxu1 }
 0x1e9   : > { %2211 = vst [vmem:[%s3234_s28 + $0x48] sm:$0xff] %v2191_v30   ;;  %v1729_v3 = vadd.f32 %v3221_v42, %v1697_v31  ;;  %v1698_v4 = vmax.f32 %v1435_v2, %v1658_v61 }
 0x1eb   : > { %v1730_v48 = vadd.f32 %v3221_v42, %v1698_v4  ;;  %v1754_v32 = vmax.f32 %v1729_v3, 0.0 }
 0x1ec   : > { %v1400_v52 = vpop.f32.mrb[96].mxu0  ;;  %v1663_v1 = vpop.f32.mrb[96].mxu1 }
 0x1ed   : > { %v1755_v15 = vmax.f32 %v1730_v48, 0.0  ;;  %v1436_v58 = vmax.f32 %v3376_v16, %v1400_v52  ;;  %v2496_v35 = vpop.f32.mrb[97].mxu0  ;;  %v2564_v13 = vpop.f32.mrb[97].mxu1 }
 0x1ee   : > { %v1403_v23 = vpop.f32.mrb[98].mxu0  ;;  %v1666_v14 = vpop.f32.mrb[98].mxu1 }
 0x1ef   : > { %v2196_v18 = vpack.c.bf16 %v1755_v15, %v1754_v32  ;;  %v1699_v36 = vmax.f32 %v1436_v58, %v1663_v1  ;;  %v1437_v56 = vmax.f32 %v3377_v55, %v1403_v23  ;;  %v2497_v53 = vpop.f32.mrb[99].mxu0  ;;  %v2565_v22 = vpop.f32.mrb[99].mxu1 }
 0x1f1   : > { %2212 = vst [vmem:[%s3234_s28 + $0x50] sm:$0xff] %v2196_v18   ;;  %v1731_v17 = vadd.f32 %v3221_v42, %v1699_v36  ;;  %v1700_v20 = vmax.f32 %v1437_v56, %v1666_v14 }
 0x1f3   : > { %v1732_v33 = vadd.f32 %v3221_v42, %v1700_v20  ;;  %v1756_v41 = vmax.f32 %v1731_v17, 0.0 }
 0x1f4   : > { %v1408_v44 = vpop.f32.mrb[100].mxu0  ;;  %v1671_v40 = vpop.f32.mrb[100].mxu1 }
 0x1f5   : > { %v1757_v28 = vmax.f32 %v1732_v33, 0.0  ;;  %v1438_v12 = vmax.f32 %v3380_v37, %v1408_v44  ;;  %v2500_v19 = vpop.f32.mrb[101].mxu0  ;;  %v2568_v9 = vpop.f32.mrb[101].mxu1 }
 0x1f6   : > { %v1411_v5 = vpop.f32.mrb[102].mxu0  ;;  %v1674_v6 = vpop.f32.mrb[102].mxu1 }
 0x1f7   : > { %v2201_v7 = vpack.c.bf16 %v1757_v28, %v1756_v41  ;;  %v1701_v39 = vmax.f32 %v1438_v12, %v1671_v40  ;;  %v2501_v43 = vpop.f32.mrb[103].mxu0  ;;  %v2569_v8 = vpop.f32.mrb[103].mxu1 }
 0x1f9   : > { %2213 = vst [vmem:[%s3234_s28 + $0x58] sm:$0xff] %v2201_v7   ;;  %v1733_v59 = vadd.f32 %v3221_v42, %v1701_v39 }
 0x1fb   : > { %v1758_v60 = vmax.f32 %v1733_v59, 0.0 }
 0x1fd   : > { %v2142_v45 = vpack.c.bf16 %v1758_v60, %v1758_v60 }
 0x1ff   : > { %1884 = vst [vmem:[%s3234_s28 + $0x60] sm:$0xf] %v2142_v45 }
 0x200 PF: > { %p10_p9 = scmp.ge.s32.totalorder %s2721_s16, 4   ;;  %s3381_s12 = smov %s2676_s13 }
 0x201   : > { %s3382_s13 = smov %s2730_s19  ;;  %s3383_s14 = smov %s2721_s16 }
 0x202   :  { %12 = sbr.rel (!%p10_p9) target bundleno = 2 (0x2), region = 111 }

// kernel: coolnet_forward.5
= control target key start
LH: loop header
LB: loop body
LE: loop exit
PB: predicated region body
PF: predicated region fallthrough
CT: control target
= control target key end

     0   :  { %v828_v39 = vmov 0.0   ;;  %vm829_vm0 = vmmov 0   ;;  %s1050_s1 = inlined_call_operand.vmem [shape: bf16[512,128], index: 1, kind: input, shape index: {}]   ;;  %s1051_s0 = inlined_call_operand.vmem [shape: bf16[8,512], index: 0, kind: input, shape index: {}]   ;;  %s1052_s3 = inlined_call_operand.vmem [shape: bf16[128,128], index: 3, kind: input, shape index: {}]   ;;  %s1053_s5 = inlined_call_operand.vmem [shape: bf16[128,128], index: 5, kind: input, shape index: {}]   ;;  %s1054_s2 = inlined_call_operand.vmem [shape: f32[1,128], index: 2, kind: input, shape index: {}]   ;;  %s1055_s4 = inlined_call_operand.vmem [shape: f32[1,128], index: 4, kind: input, shape index: {}]   ;;  %s1056_s6 = inlined_call_operand.vmem [shape: f32[1,128], index: 6, kind: input, shape index: {}]   ;;  %s1057_s7 = inlined_call_operand.vmem [shape: f32[8,128], index: 7, kind: output, shape index: {}]  }
   0x1   :  { %v776_v0 = vld [vmem:[%s1050_s1 + $0x40] sm:$0xff]   ;;  %v780_v4 = vld [vmem:[%s1050_s1 + $0x48] sm:$0xff]   ;;  %v784_v8 = vld [vmem:[%s1050_s1 + $0x50] sm:$0xff]  }
   0x2   :  { %v777_v1 = vld [vmem:[%s1050_s1 + $0xc0] sm:$0xff]   ;;  %672 = vmatprep.subr.bf16.mxu0 %v776_v0  ;;  %v781_v5 = vld [vmem:[%s1050_s1 + $0xc8] sm:$0xff]   ;;  %v785_v9 = vld [vmem:[%s1050_s1 + $0xd0] sm:$0xff]  }
   0x3   :  { %v778_v2 = vld [vmem:[%s1050_s1] sm:$0xff]   ;;  %694 = vmatprep.subr.bf16.mxu1 %v777_v1  ;;  %v782_v6 = vld [vmem:[%s1050_s1 + $0x8] sm:$0xff]   ;;  %v786_v10 = vld [vmem:[%s1050_s1 + $0x10] sm:$0xff]  }
   0x4   :  { %v779_v3 = vld [vmem:[%s1050_s1 + $0x80] sm:$0xff]   ;;  %673 = vmatpush3.bf16.msra.mxu0 %v778_v2  ;;  %v783_v7 = vld [vmem:[%s1050_s1 + $0x88] sm:$0xff]   ;;  %v787_v11 = vld [vmem:[%s1050_s1 + $0x90] sm:$0xff]  }
   0x5   :  { %695 = vmatpush3.bf16.msra.mxu1 %v779_v3  ;;  %674 = vmatprep.subr.bf16.mxu0 %v780_v4  ;;  %v788_v12 = vld [vmem:[%s1050_s1 + $0x58] sm:$0xff]   ;;  %v792_v16 = vld [vmem:[%s1050_s1 + $0x60] sm:$0xff]   ;;  %v796_v20 = vld [vmem:[%s1050_s1 + $0x68] sm:$0xff]  }
   0x6   :  { %696 = vmatprep.subr.bf16.mxu1 %v781_v5  ;;  %v789_v13 = vld [vmem:[%s1050_s1 + $0xd8] sm:$0xff]   ;;  %v793_v17 = vld [vmem:[%s1050_s1 + $0xe0] sm:$0xff]   ;;  %v797_v21 = vld [vmem:[%s1050_s1 + $0xe8] sm:$0xff]  }
   0x7   :  { %v790_v14 = vld [vmem:[%s1050_s1 + $0x18] sm:$0xff]   ;;  %v794_v18 = vld [vmem:[%s1050_s1 + $0x20] sm:$0xff]   ;;  %v798_v22 = vld [vmem:[%s1050_s1 + $0x28] sm:$0xff]  }
   0x8   :  { %675 = vmatpush3.bf16.msra.mxu0 %v782_v6  ;;  %v791_v15 = vld [vmem:[%s1050_s1 + $0x98] sm:$0xff]   ;;  %v795_v19 = vld [vmem:[%s1050_s1 + $0xa0] sm:$0xff]   ;;  %v799_v23 = vld [vmem:[%s1050_s1 + $0xa8] sm:$0xff]  }
   0x9   :  { %697 = vmatpush3.bf16.msra.mxu1 %v783_v7  ;;  %676 = vmatprep.subr.bf16.mxu0 %v784_v8  ;;  %v800_v24 = vld [vmem:[%s1050_s1 + $0x70] sm:$0xff]   ;;  %v804_v28 = vld [vmem:[%s1050_s1 + $0x78] sm:$0xff]   ;;  %v27_v32 = vld [vmem:[%s1051_s0] sm:$0xff] }
   0xa   :  { %698 = vmatprep.subr.bf16.mxu1 %v785_v9  ;;  %v801_v25 = vld [vmem:[%s1050_s1 + $0xf0] sm:$0xff]   ;;  %v805_v29 = vld [vmem:[%s1050_s1 + $0xf8] sm:$0xff]   ;;  %v28_v33 = vld [vmem:[%s1051_s0 + $0x8] sm:$0xff]  ;;  %v618_v34 = vcombine.low %v27_v32, %v27_v32  ;;  %v619_v35 = vcombine.high %v27_v32, %v27_v32 }
   0xb   :  { %v802_v26 = vld [vmem:[%s1050_s1 + $0x30] sm:$0xff]   ;;  %v806_v30 = vld [vmem:[%s1050_s1 + $0x38] sm:$0xff]   ;;  %v620_v36 = vcombine.low %v28_v33, %v28_v33  ;;  %v621_v37 = vcombine.high %v28_v33, %v28_v33  ;;  %v812_v38 = vld [vmem:[%s1052_s3] sm:$0xff]  }
   0xc   :  { %677 = vmatpush3.bf16.msra.mxu0 %v786_v10  ;;  %v803_v27 = vld [vmem:[%s1050_s1 + $0xb0] sm:$0xff]   ;;  %v807_v31 = vld [vmem:[%s1050_s1 + $0xb8] sm:$0xff]   ;;  %338 = vmatprep.mubr.bf16.mxu0 %v619_v35  ;;  %v813_v40 = vld [vmem:[%s1052_s3 + $0x8] sm:$0xff]  }
   0xd   :  { %699 = vmatpush3.bf16.msra.mxu1 %v787_v11  ;;  %678 = vmatprep.subr.bf16.mxu0 %v788_v12  ;;  %v814_v41 = vld [vmem:[%s1052_s3 + $0x10] sm:$0xff]   ;;  %v815_v42 = vld [vmem:[%s1052_s3 + $0x18] sm:$0xff]   ;;  %v816_v43 = vld [vmem:[%s1052_s3 + $0x20] sm:$0xff]  }
   0xe   :  { %700 = vmatprep.subr.bf16.mxu1 %v789_v13  ;;  %378 = vmatprep.mubr.bf16.mxu1 %v621_v37  ;;  %v817_v44 = vld [vmem:[%s1052_s3 + $0x28] sm:$0xff]   ;;  %v818_v45 = vld [vmem:[%s1052_s3 + $0x30] sm:$0xff]   ;;  %v819_v46 = vld [vmem:[%s1052_s3 + $0x38] sm:$0xff]  }
   0xf   :  { %v820_v47 = vld [vmem:[%s1053_s5] sm:$0xff]   ;;  %v821_v48 = vld [vmem:[%s1053_s5 + $0x8] sm:$0xff]   ;;  %v822_v49 = vld [vmem:[%s1053_s5 + $0x10] sm:$0xff]  }
  0x10   :  { %679 = vmatpush3.bf16.msra.mxu0 %v790_v14  ;;  %v823_v50 = vld [vmem:[%s1053_s5 + $0x18] sm:$0xff]   ;;  %v824_v51 = vld [vmem:[%s1053_s5 + $0x20] sm:$0xff]   ;;  %v825_v52 = vld [vmem:[%s1053_s5 + $0x28] sm:$0xff]  }
  0x11   :  { %701 = vmatpush3.bf16.msra.mxu1 %v791_v15  ;;  %680 = vmatprep.subr.bf16.mxu0 %v792_v16  ;;  %v617_v55 = vld [vmem:[%s1054_s2] ss:$0 sm:$0xff]  ;;  %v826_v4 = vld [vmem:[%s1053_s5 + $0x30] sm:$0xff]   ;;  %v827_v5 = vld [vmem:[%s1053_s5 + $0x38] sm:$0xff]  }
  0x12   :  { %702 = vmatprep.subr.bf16.mxu1 %v793_v17  ;;  %v654_v6 = vld [vmem:[%s1055_s4] ss:$0 sm:$0xff] }
  0x13   :  { %v663_v14 = vld [vmem:[%s1056_s6] ss:$0 sm:$0xff] }
  0x14   :  { %681 = vmatpush3.bf16.msra.mxu0 %v794_v18 }
  0x15   :  { %703 = vmatpush3.bf16.msra.mxu1 %v795_v19  ;;  %682 = vmatprep.subr.bf16.mxu0 %v796_v20 }
  0x16   :  { %704 = vmatprep.subr.bf16.mxu1 %v797_v21 }
  0x18   :  { %683 = vmatpush3.bf16.msra.mxu0 %v798_v22 }
  0x19   :  { %705 = vmatpush3.bf16.msra.mxu1 %v799_v23  ;;  %684 = vmatprep.subr.bf16.mxu0 %v800_v24 }
  0x1a   :  { %706 = vmatprep.subr.bf16.mxu1 %v801_v25 }
  0x1c   :  { %685 = vmatpush3.bf16.msra.mxu0 %v802_v26 }
  0x1d   :  { %707 = vmatpush3.bf16.msra.mxu1 %v803_v27  ;;  %686 = vmatprep.subr.bf16.mxu0 %v804_v28 }
  0x1e   :  { %708 = vmatprep.subr.bf16.mxu1 %v805_v29 }
  0x20   :  { %687 = vmatpush3.bf16.msra.mxu0 %v806_v30 }
  0x21   :  { %709 = vmatpush3.bf16.msra.mxu1 %v807_v31  ;;  %734 = vmatprep.subr.bf16.mxu0 %v828_v39 }
  0x22   :  { %754 = vmatprep.subr.bf16.mxu1 %v828_v39 }
  0x23   :  { %339 = vmatmul.mubr.bf16.vlgmr.msra.gmra.mrb[0].mxu0 %v618_v34 }
  0x24   :  { %379 = vmatmul.mubr.bf16.vlgmr.msra.gmra.mrb[0].mxu1 %v620_v36  ;;  %735 = vmatpush3.bf16.msra.mxu0 %v812_v38 }
  0x25   :  { %736 = vmatprep.subr.bf16.mxu0 %v828_v39  ;;  %750 = vmatprep.mubr.msk.bf16.mxu0 %vm829_vm0, %v828_v39 }
  0x26   :  { %770 = vmatprep.mubr.msk.bf16.mxu1 %vm829_vm0, %v828_v39  ;;  %755 = vmatpush3.bf16.msra.mxu1 %v820_v47 }
  0x27   :  { %756 = vmatprep.subr.bf16.mxu1 %v828_v39 }
  0x28   :  { %737 = vmatpush3.bf16.msra.mxu0 %v813_v40 }
  0x29   :  { %738 = vmatprep.subr.bf16.mxu0 %v828_v39 }
  0x2a   :  { %757 = vmatpush3.bf16.msra.mxu1 %v821_v48 }
  0x2b   :  { %758 = vmatprep.subr.bf16.mxu1 %v828_v39 }
  0x2c   :  { %739 = vmatpush3.bf16.msra.mxu0 %v814_v41 }
  0x2d   :  { %740 = vmatprep.subr.bf16.mxu0 %v828_v39 }
  0x2e   :  { %759 = vmatpush3.bf16.msra.mxu1 %v822_v49 }
  0x2f   :  { %760 = vmatprep.subr.bf16.mxu1 %v828_v39 }
  0x30   :  { %741 = vmatpush3.bf16.msra.mxu0 %v815_v42 }
  0x31   :  { %742 = vmatprep.subr.bf16.mxu0 %v828_v39 }
  0x32   :  { %761 = vmatpush3.bf16.msra.mxu1 %v823_v50 }
  0x33   :  { %762 = vmatprep.subr.bf16.mxu1 %v828_v39 }
  0x34   :  { %743 = vmatpush3.bf16.msra.mxu0 %v816_v43 }
  0x35   :  { %744 = vmatprep.subr.bf16.mxu0 %v828_v39 }
  0x36   :  { %763 = vmatpush3.bf16.msra.mxu1 %v824_v51 }
  0x37   :  { %764 = vmatprep.subr.bf16.mxu1 %v828_v39 }
  0x38   :  { %745 = vmatpush3.bf16.msra.mxu0 %v817_v44 }
  0x39   :  { %746 = vmatprep.subr.bf16.mxu0 %v828_v39 }
  0x3a   :  { %765 = vmatpush3.bf16.msra.mxu1 %v825_v52 }
  0x3b   :  { %766 = vmatprep.subr.bf16.mxu1 %v828_v39 }
  0x3c   :  { %747 = vmatpush3.bf16.msra.mxu0 %v818_v45 }
  0x3d   :  { %748 = vmatprep.subr.bf16.mxu0 %v828_v39 }
  0x3e   :  { %767 = vmatpush3.bf16.msra.mxu1 %v826_v4 }
  0x3f   :  { %768 = vmatprep.subr.bf16.mxu1 %v828_v39 }
  0x40   :  { %749 = vmatpush3.bf16.msra.mxu0 %v819_v46 }
  0x42   :  { %769 = vmatpush3.bf16.msra.mxu1 %v827_v5 }
  0xf6   :  { %v688_v53 = vpop.f32.mrb[0].mxu0 }
  0xf7   :  { %v710_v54 = vpop.f32.mrb[0].mxu1  ;;  %v689_v56 = vpop.f32.mrb[1].mxu0 }
  0xf8   :  { %v711_v57 = vpop.f32.mrb[1].mxu1  ;;  %v690_v58 = vadd.f32 %v689_v56, %v688_v53  ;;  %v691_v60 = vpop.f32.mrb[2].mxu0 }
  0xf9   :  { %v712_v59 = vadd.f32 %v711_v57, %v710_v54  ;;  %v713_v61 = vpop.f32.mrb[2].mxu1  ;;  %v692_v62 = vpop.f32.mrb[3].mxu0 }
  0xfa   :  { %v714_v63 = vpop.f32.mrb[3].mxu1  ;;  %v341_v0 = vadd.f32 %v690_v58, %v617_v55 }
  0xfc   :  { %v381_v1 = vadd.f32 %v712_v59, %v341_v0 }
  0xfe   :  { %v386_v2 = vmax.f32 %v381_v1, 0.0 }
 0x100   :  { %v387_v3 = vpack.c.bf16 %v386_v2, %v386_v2 }
 0x102   :  { %751 = vmatmul.mubr.bf16.vlgmr.msra.gmra.mrb[4].mxu0 %v387_v3 }
 0x1d5   :  { %v493_v7 = vpop.f32.mrb[4].mxu0 }
 0x1d6   :  { %v494_v8 = vadd.f32 %v654_v6, %v493_v7  ;;  %v752_v9 = vpop.f32.mrb[5].mxu0 }
 0x1d7   :  { %v496_v10 = vpop.f32.mrb[6].mxu0 }
 0x1d8   :  { %v499_v11 = vmax.f32 %v494_v8, 0.0  ;;  %v753_v12 = vpop.f32.mrb[7].mxu0 }
 0x1da   :  { %v500_v13 = vpack.c.bf16 %v499_v11, %v499_v11 }
 0x1dc   :  { %771 = vmatmul.mubr.bf16.vlgmr.msra.gmra.mrb[4].mxu1 %v500_v13 }
 0x2af   :  { %v606_v15 = vpop.f32.mrb[4].mxu1 }
 0x2b0   :  { %v607_v16 = vadd.f32 %v663_v14, %v606_v15  ;;  %v772_v17 = vpop.f32.mrb[5].mxu1 }
 0x2b1   :  { %v609_v18 = vpop.f32.mrb[6].mxu1 }
 0x2b2   :  { %612 = vst [vmem:[%s1057_s7] sm:$0xff] %v607_v16  ;;  %v773_v19 = vpop.f32.mrb[7].mxu1 }

// kernel: coolnet_forward.4
= control target key start
LH: loop header
LB: loop body
LE: loop exit
PB: predicated region body
PF: predicated region fallthrough
CT: control target
= control target key end

     0   :  { %s4965_s12 = smov 0   ;;  %s4967_s13 = smov 0   ;;  %s6904_s0 = inlined_call_operand.vmem [shape: bf16[4,64,1664], index: 0, kind: input, shape index: {}]   ;;  %s6905_s1 = inlined_call_operand.vmem [shape: bf16[1664,128], index: 1, kind: input, shape index: {}]   ;;  %s6906_s2 = inlined_call_operand.vmem [shape: f32[1,128], index: 2, kind: input, shape index: {}]   ;;  %s6907_s3 = inlined_call_operand.vmem [shape: bf16[64,128], index: 3, kind: output, shape index: {}]  }
   0x1   :  { %s4969_s14 = smov 0  }
   0x2 LB: > { %s3386_s15 = sadd.s32 4294967295, %s4943_s14   ;;  %s4982_s16 = sadd.s32 1, %s4943_s14   ;;  %s4943_s14 = sphi %s4969_s14, %s7132_s14   ;;  %s4939_s13 = sphi %s4967_s13, %s7131_s13   ;;  %s4935_s12 = sphi %s4965_s12, %s7130_s12  }
   0x3   : > { %s17_s17 = ssub.s32 %s4943_s14, %s4982_s16  ;;  %s20_s18 = sadd.s32 1, %s4939_s13 }
   0x4   : > { %p18_p0 = scmp.eq.s32.totalorder %s17_s17, 0  ;;  %p27_p1 = scmp.ne.s32.totalorder %s4939_s13, %s4935_s12 }
   0x5   : > { %p28_p2 = scmp.eq.s32.totalorder %s4943_s14, 0  ;;  %p3389_p4 = scmp.ge.s32.totalorder %s4943_s14, 2 }
   0x6   : > { %s4991_s19 = scalar_select %p18_p0, %s4939_s13, %s20_s18  }
   0x7   : > { %p29_p3 = por %p28_p2, %p27_p1  ;;  %127 = sbr.rel (%p3389_p4) target bundleno = 77 (0x4d), region = 24 }
   0xe   : > { %130 = sbr.rel (!%p29_p3) target bundleno = 77 (0x4d), region = 28  ;;  %s132_s20 = sand.u32 (%p29_p3), 1, %s4939_s13  }
   0xf   : > { %s4535_s21 = smul.u32 (%p29_p3), 208, %s4943_s14 }
  0x10   : > { %s4534_s22 = smul.u32 (%p29_p3), 832, %s132_s20 }
  0x11   : > { %s4999_s25 = scalar_lea.vmem (%p29_p3), %s6904_s0, %s4535_s21 }
  0x12   : > { %v153_v0 = vld [vmem:[%s4999_s25] sm:$0xff] (%p29_p3)  ;;  %v155_v1 = vld [vmem:[%s4999_s25 + $0x8] sm:$0xff] (%p29_p3)  ;;  %v157_v2 = vld [vmem:[%s4999_s25 + $0x10] sm:$0xff] (%p29_p3)  ;;  %s5004_s26 = scalar_lea.vmem (%p29_p3), [#allocation2], %s4534_s22 }
  0x13   : > { %154 = vst [vmem:[%s5004_s26] sm:$0xff] (%p29_p3), %v153_v0  ;;  %156 = vst [vmem:[%s5004_s26 + $0x8] sm:$0xff] (%p29_p3), %v155_v1  ;;  %v159_v3 = vld [vmem:[%s4999_s25 + $0x18] sm:$0xff] (%p29_p3)  ;;  %v161_v4 = vld [vmem:[%s4999_s25 + $0x20] sm:$0xff] (%p29_p3) }
  0x14   : > { %158 = vst [vmem:[%s5004_s26 + $0x10] sm:$0xff] (%p29_p3), %v157_v2  ;;  %v163_v5 = vld [vmem:[%s4999_s25 + $0x28] sm:$0xff] (%p29_p3)  ;;  %160 = vst [vmem:[%s5004_s26 + $0x18] sm:$0xff] (%p29_p3), %v159_v3  ;;  %v165_v6 = vld [vmem:[%s4999_s25 + $0x34] sm:$0xff] (%p29_p3) }
  0x15   : > { %162 = vst [vmem:[%s5004_s26 + $0x20] sm:$0xff] %v161_v4  ;;  %164 = vst [vmem:[%s5004_s26 + $0x28] sm:$0xff] %v163_v5  ;;  %v167_v7 = vld [vmem:[%s4999_s25 + $0x3c] sm:$0xff]  ;;  %v169_v8 = vld [vmem:[%s4999_s25 + $0x44] sm:$0xff] }
  0x16   : > { %166 = vst [vmem:[%s5004_s26 + $0x34] sm:$0xff] %v165_v6  ;;  %168 = vst [vmem:[%s5004_s26 + $0x3c] sm:$0xff] %v167_v7  ;;  %v171_v9 = vld [vmem:[%s4999_s25 + $0x4c] sm:$0xff]  ;;  %v173_v10 = vld [vmem:[%s4999_s25 + $0x54] sm:$0xff] }
  0x17   : > { %170 = vst [vmem:[%s5004_s26 + $0x44] sm:$0xff] %v169_v8  ;;  %v175_v11 = vld [vmem:[%s4999_s25 + $0x5c] sm:$0xff]  ;;  %172 = vst [vmem:[%s5004_s26 + $0x4c] sm:$0xff] %v171_v9  ;;  %v177_v12 = vld [vmem:[%s4999_s25 + $0x68] sm:$0xff] }
  0x18   : > { %174 = vst [vmem:[%s5004_s26 + $0x54] sm:$0xff] %v173_v10  ;;  %176 = vst [vmem:[%s5004_s26 + $0x5c] sm:$0xff] %v175_v11  ;;  %v179_v13 = vld [vmem:[%s4999_s25 + $0x70] sm:$0xff]  ;;  %v181_v14 = vld [vmem:[%s4999_s25 + $0x78] sm:$0xff] }
  0x19   : > { %178 = vst [vmem:[%s5004_s26 + $0x68] sm:$0xff] %v177_v12  ;;  %180 = vst [vmem:[%s5004_s26 + $0x70] sm:$0xff] %v179_v13  ;;  %v183_v15 = vld [vmem:[%s4999_s25 + $0x80] sm:$0xff]  ;;  %v185_v16 = vld [vmem:[%s4999_s25 + $0x88] sm:$0xff] }
  0x1a   : > { %182 = vst [vmem:[%s5004_s26 + $0x78] sm:$0xff] %v181_v14  ;;  %v187_v17 = vld [vmem:[%s4999_s25 + $0x90] sm:$0xff]  ;;  %184 = vst [vmem:[%s5004_s26 + $0x80] sm:$0xff] %v183_v15  ;;  %v189_v18 = vld [vmem:[%s4999_s25 + $0x9c] sm:$0xff] }
  0x1b   : > { %186 = vst [vmem:[%s5004_s26 + $0x88] sm:$0xff] %v185_v16  ;;  %188 = vst [vmem:[%s5004_s26 + $0x90] sm:$0xff] %v187_v17  ;;  %v191_v19 = vld [vmem:[%s4999_s25 + $0xa4] sm:$0xff]  ;;  %v193_v20 = vld [vmem:[%s4999_s25 + $0xac] sm:$0xff] }
  0x1c   : > { %190 = vst [vmem:[%s5004_s26 + $0x9c] sm:$0xff] %v189_v18  ;;  %192 = vst [vmem:[%s5004_s26 + $0xa4] sm:$0xff] %v191_v19  ;;  %v195_v21 = vld [vmem:[%s4999_s25 + $0xb4] sm:$0xff]  ;;  %v197_v22 = vld [vmem:[%s4999_s25 + $0xbc] sm:$0xff] }
  0x1d   : > { %194 = vst [vmem:[%s5004_s26 + $0xac] sm:$0xff] %v193_v20  ;;  %v199_v23 = vld [vmem:[%s4999_s25 + $0xc4] sm:$0xff]  ;;  %196 = vst [vmem:[%s5004_s26 + $0xb4] sm:$0xff] %v195_v21  ;;  %v205_v26 = vld [vmem:[%s4999_s25 + $0x1b0] sm:$0xff] }
  0x1e   : > { %198 = vst [vmem:[%s5004_s26 + $0xbc] sm:$0xff] %v197_v22  ;;  %200 = vst [vmem:[%s5004_s26 + $0xc4] sm:$0xff] %v199_v23  ;;  %v201_v24 = vld [vmem:[%s4999_s25 + $0x1a0] sm:$0xff]  ;;  %v203_v25 = vld [vmem:[%s4999_s25 + $0x1a8] sm:$0xff] }
  0x1f   : > { %202 = vst [vmem:[%s5004_s26 + $0xd0] sm:$0xff] %v201_v24  ;;  %204 = vst [vmem:[%s5004_s26 + $0xd8] sm:$0xff] %v203_v25  ;;  %v207_v27 = vld [vmem:[%s4999_s25 + $0x1b8] sm:$0xff]  ;;  %v209_v28 = vld [vmem:[%s4999_s25 + $0x1c0] sm:$0xff] }
  0x20   : > { %206 = vst [vmem:[%s5004_s26 + $0xe0] sm:$0xff] %v205_v26  ;;  %v211_v29 = vld [vmem:[%s4999_s25 + $0x1c8] sm:$0xff]  ;;  %208 = vst [vmem:[%s5004_s26 + $0xe8] sm:$0xff] %v207_v27  ;;  %v213_v30 = vld [vmem:[%s4999_s25 + $0x1d4] sm:$0xff] }
  0x21   : > { %210 = vst [vmem:[%s5004_s26 + $0xf0] sm:$0xff] %v209_v28  ;;  %212 = vst [vmem:[%s5004_s26 + $0xf8] sm:$0xff] %v211_v29  ;;  %v215_v31 = vld [vmem:[%s4999_s25 + $0x1dc] sm:$0xff]  ;;  %v217_v32 = vld [vmem:[%s4999_s25 + $0x1e4] sm:$0xff] }
  0x22   : > { %214 = vst [vmem:[%s5004_s26 + $0x104] sm:$0xff] %v213_v30  ;;  %216 = vst [vmem:[%s5004_s26 + $0x10c] sm:$0xff] %v215_v31  ;;  %v219_v33 = vld [vmem:[%s4999_s25 + $0x1ec] sm:$0xff]  ;;  %v221_v34 = vld [vmem:[%s4999_s25 + $0x1f4] sm:$0xff] }
  0x23   : > { %218 = vst [vmem:[%s5004_s26 + $0x114] sm:$0xff] %v217_v32  ;;  %v223_v35 = vld [vmem:[%s4999_s25 + $0x1fc] sm:$0xff]  ;;  %220 = vst [vmem:[%s5004_s26 + $0x11c] sm:$0xff] %v219_v33  ;;  %v225_v36 = vld [vmem:[%s4999_s25 + $0x208] sm:$0xff] }
  0x24   : > { %222 = vst [vmem:[%s5004_s26 + $0x124] sm:$0xff] %v221_v34  ;;  %224 = vst [vmem:[%s5004_s26 + $0x12c] sm:$0xff] %v223_v35  ;;  %v227_v37 = vld [vmem:[%s4999_s25 + $0x210] sm:$0xff]  ;;  %v229_v38 = vld [vmem:[%s4999_s25 + $0x218] sm:$0xff] }
  0x25   : > { %226 = vst [vmem:[%s5004_s26 + $0x138] sm:$0xff] %v225_v36  ;;  %228 = vst [vmem:[%s5004_s26 + $0x140] sm:$0xff] %v227_v37  ;;  %v231_v39 = vld [vmem:[%s4999_s25 + $0x220] sm:$0xff]  ;;  %v233_v40 = vld [vmem:[%s4999_s25 + $0x228] sm:$0xff] }
  0x26   : > { %230 = vst [vmem:[%s5004_s26 + $0x148] sm:$0xff] %v229_v38  ;;  %v235_v41 = vld [vmem:[%s4999_s25 + $0x230] sm:$0xff]  ;;  %232 = vst [vmem:[%s5004_s26 + $0x150] sm:$0xff] %v231_v39  ;;  %v237_v42 = vld [vmem:[%s4999_s25 + $0x23c] sm:$0xff] }
  0x27   : > { %234 = vst [vmem:[%s5004_s26 + $0x158] sm:$0xff] %v233_v40  ;;  %236 = vst [vmem:[%s5004_s26 + $0x160] sm:$0xff] %v235_v41  ;;  %v239_v43 = vld [vmem:[%s4999_s25 + $0x244] sm:$0xff]  ;;  %v241_v44 = vld [vmem:[%s4999_s25 + $0x24c] sm:$0xff] }
  0x28   : > { %238 = vst [vmem:[%s5004_s26 + $0x16c] sm:$0xff] %v237_v42  ;;  %240 = vst [vmem:[%s5004_s26 + $0x174] sm:$0xff] %v239_v43  ;;  %v243_v45 = vld [vmem:[%s4999_s25 + $0x254] sm:$0xff]  ;;  %v245_v46 = vld [vmem:[%s4999_s25 + $0x25c] sm:$0xff] }
  0x29   : > { %242 = vst [vmem:[%s5004_s26 + $0x17c] sm:$0xff] %v241_v44  ;;  %v247_v47 = vld [vmem:[%s4999_s25 + $0x264] sm:$0xff]  ;;  %244 = vst [vmem:[%s5004_s26 + $0x184] sm:$0xff] %v243_v45  ;;  %v253_v50 = vld [vmem:[%s4999_s25 + $0x350] sm:$0xff] }
  0x2a   : > { %246 = vst [vmem:[%s5004_s26 + $0x18c] sm:$0xff] %v245_v46  ;;  %248 = vst [vmem:[%s5004_s26 + $0x194] sm:$0xff] %v247_v47  ;;  %v249_v48 = vld [vmem:[%s4999_s25 + $0x340] sm:$0xff]  ;;  %v251_v49 = vld [vmem:[%s4999_s25 + $0x348] sm:$0xff] }
  0x2b   : > { %250 = vst [vmem:[%s5004_s26 + $0x1a0] sm:$0xff] %v249_v48  ;;  %252 = vst [vmem:[%s5004_s26 + $0x1a8] sm:$0xff] %v251_v49  ;;  %v255_v51 = vld [vmem:[%s4999_s25 + $0x358] sm:$0xff]  ;;  %v257_v52 = vld [vmem:[%s4999_s25 + $0x360] sm:$0xff] }
  0x2c   : > { %254 = vst [vmem:[%s5004_s26 + $0x1b0] sm:$0xff] %v253_v50  ;;  %v259_v53 = vld [vmem:[%s4999_s25 + $0x368] sm:$0xff]  ;;  %256 = vst [vmem:[%s5004_s26 + $0x1b8] sm:$0xff] %v255_v51  ;;  %v261_v54 = vld [vmem:[%s4999_s25 + $0x374] sm:$0xff] }
  0x2d   : > { %258 = vst [vmem:[%s5004_s26 + $0x1c0] sm:$0xff] %v257_v52  ;;  %260 = vst [vmem:[%s5004_s26 + $0x1c8] sm:$0xff] %v259_v53  ;;  %v263_v55 = vld [vmem:[%s4999_s25 + $0x37c] sm:$0xff]  ;;  %v265_v56 = vld [vmem:[%s4999_s25 + $0x384] sm:$0xff] }
  0x2e   : > { %262 = vst [vmem:[%s5004_s26 + $0x1d4] sm:$0xff] %v261_v54  ;;  %264 = vst [vmem:[%s5004_s26 + $0x1dc] sm:$0xff] %v263_v55  ;;  %v267_v57 = vld [vmem:[%s4999_s25 + $0x38c] sm:$0xff]  ;;  %v269_v58 = vld [vmem:[%s4999_s25 + $0x394] sm:$0xff] }
  0x2f   : > { %266 = vst [vmem:[%s5004_s26 + $0x1e4] sm:$0xff] %v265_v56  ;;  %v271_v59 = vld [vmem:[%s4999_s25 + $0x39c] sm:$0xff]  ;;  %268 = vst [vmem:[%s5004_s26 + $0x1ec] sm:$0xff] %v267_v57  ;;  %v273_v60 = vld [vmem:[%s4999_s25 + $0x3a8] sm:$0xff] }
  0x30   : > { %270 = vst [vmem:[%s5004_s26 + $0x1f4] sm:$0xff] %v269_v58  ;;  %272 = vst [vmem:[%s5004_s26 + $0x1fc] sm:$0xff] %v271_v59  ;;  %v275_v61 = vld [vmem:[%s4999_s25 + $0x3b0] sm:$0xff]  ;;  %v277_v62 = vld [vmem:[%s4999_s25 + $0x3b8] sm:$0xff] }
  0x31   : > { %274 = vst [vmem:[%s5004_s26 + $0x208] sm:$0xff] %v273_v60  ;;  %276 = vst [vmem:[%s5004_s26 + $0x210] sm:$0xff] %v275_v61  ;;  %v279_v63 = vld [vmem:[%s4999_s25 + $0x3c0] sm:$0xff]  ;;  %v281_v0 = vld [vmem:[%s4999_s25 + $0x3c8] sm:$0xff] }
  0x32   : > { %278 = vst [vmem:[%s5004_s26 + $0x218] sm:$0xff] %v277_v62  ;;  %v283_v1 = vld [vmem:[%s4999_s25 + $0x3d0] sm:$0xff]  ;;  %280 = vst [vmem:[%s5004_s26 + $0x220] sm:$0xff] %v279_v63  ;;  %v285_v2 = vld [vmem:[%s4999_s25 + $0x3dc] sm:$0xff] }
  0x33   : > { %282 = vst [vmem:[%s5004_s26 + $0x228] sm:$0xff] %v281_v0  ;;  %284 = vst [vmem:[%s5004_s26 + $0x230] sm:$0xff] %v283_v1  ;;  %v287_v3 = vld [vmem:[%s4999_s25 + $0x3e4] sm:$0xff]  ;;  %v289_v4 = vld [vmem:[%s4999_s25 + $0x3ec] sm:$0xff] }
  0x34   : > { %286 = vst [vmem:[%s5004_s26 + $0x23c] sm:$0xff] %v285_v2  ;;  %288 = vst [vmem:[%s5004_s26 + $0x244] sm:$0xff] %v287_v3  ;;  %v291_v5 = vld [vmem:[%s4999_s25 + $0x3f4] sm:$0xff]  ;;  %v293_v6 = vld [vmem:[%s4999_s25 + $0x3fc] sm:$0xff] }
  0x35   : > { %290 = vst [vmem:[%s5004_s26 + $0x24c] sm:$0xff] %v289_v4  ;;  %v295_v7 = vld [vmem:[%s4999_s25 + $0x404] sm:$0xff]  ;;  %292 = vst [vmem:[%s5004_s26 + $0x254] sm:$0xff] %v291_v5  ;;  %v301_v10 = vld [vmem:[%s4999_s25 + $0x4f0] sm:$0xff] }
  0x36   : > { %294 = vst [vmem:[%s5004_s26 + $0x25c] sm:$0xff] %v293_v6  ;;  %296 = vst [vmem:[%s5004_s26 + $0x264] sm:$0xff] %v295_v7  ;;  %v297_v8 = vld [vmem:[%s4999_s25 + $0x4e0] sm:$0xff]  ;;  %v299_v9 = vld [vmem:[%s4999_s25 + $0x4e8] sm:$0xff] }
  0x37   : > { %298 = vst [vmem:[%s5004_s26 + $0x270] sm:$0xff] %v297_v8  ;;  %300 = vst [vmem:[%s5004_s26 + $0x278] sm:$0xff] %v299_v9  ;;  %v303_v11 = vld [vmem:[%s4999_s25 + $0x4f8] sm:$0xff]  ;;  %v305_v12 = vld [vmem:[%s4999_s25 + $0x500] sm:$0xff] }
  0x38   : > { %302 = vst [vmem:[%s5004_s26 + $0x280] sm:$0xff] %v301_v10  ;;  %v307_v13 = vld [vmem:[%s4999_s25 + $0x508] sm:$0xff]  ;;  %304 = vst [vmem:[%s5004_s26 + $0x288] sm:$0xff] %v303_v11  ;;  %v309_v14 = vld [vmem:[%s4999_s25 + $0x514] sm:$0xff] }
  0x39   : > { %306 = vst [vmem:[%s5004_s26 + $0x290] sm:$0xff] %v305_v12  ;;  %308 = vst [vmem:[%s5004_s26 + $0x298] sm:$0xff] %v307_v13  ;;  %v311_v15 = vld [vmem:[%s4999_s25 + $0x51c] sm:$0xff]  ;;  %v313_v16 = vld [vmem:[%s4999_s25 + $0x524] sm:$0xff] }
  0x3a   : > { %310 = vst [vmem:[%s5004_s26 + $0x2a4] sm:$0xff] %v309_v14  ;;  %312 = vst [vmem:[%s5004_s26 + $0x2ac] sm:$0xff] %v311_v15  ;;  %v315_v17 = vld [vmem:[%s4999_s25 + $0x52c] sm:$0xff]  ;;  %v317_v18 = vld [vmem:[%s4999_s25 + $0x534] sm:$0xff] }
  0x3b   : > { %314 = vst [vmem:[%s5004_s26 + $0x2b4] sm:$0xff] %v313_v16  ;;  %v319_v19 = vld [vmem:[%s4999_s25 + $0x53c] sm:$0xff]  ;;  %316 = vst [vmem:[%s5004_s26 + $0x2bc] sm:$0xff] %v315_v17  ;;  %v321_v20 = vld [vmem:[%s4999_s25 + $0x548] sm:$0xff] }
  0x3c   : > { %318 = vst [vmem:[%s5004_s26 + $0x2c4] sm:$0xff] %v317_v18  ;;  %320 = vst [vmem:[%s5004_s26 + $0x2cc] sm:$0xff] %v319_v19  ;;  %v323_v21 = vld [vmem:[%s4999_s25 + $0x550] sm:$0xff]  ;;  %v325_v22 = vld [vmem:[%s4999_s25 + $0x558] sm:$0xff] }
  0x3d   : > { %322 = vst [vmem:[%s5004_s26 + $0x2d8] sm:$0xff] %v321_v20  ;;  %324 = vst [vmem:[%s5004_s26 + $0x2e0] sm:$0xff] %v323_v21  ;;  %v327_v23 = vld [vmem:[%s4999_s25 + $0x560] sm:$0xff]  ;;  %v329_v24 = vld [vmem:[%s4999_s25 + $0x568] sm:$0xff] }
  0x3e   : > { %326 = vst [vmem:[%s5004_s26 + $0x2e8] sm:$0xff] %v325_v22  ;;  %v331_v25 = vld [vmem:[%s4999_s25 + $0x570] sm:$0xff]  ;;  %328 = vst [vmem:[%s5004_s26 + $0x2f0] sm:$0xff] %v327_v23  ;;  %v333_v26 = vld [vmem:[%s4999_s25 + $0x57c] sm:$0xff] }
  0x3f   : > { %330 = vst [vmem:[%s5004_s26 + $0x2f8] sm:$0xff] %v329_v24  ;;  %332 = vst [vmem:[%s5004_s26 + $0x300] sm:$0xff] %v331_v25  ;;  %v335_v27 = vld [vmem:[%s4999_s25 + $0x584] sm:$0xff]  ;;  %v337_v28 = vld [vmem:[%s4999_s25 + $0x58c] sm:$0xff] }
  0x40   : > { %334 = vst [vmem:[%s5004_s26 + $0x30c] sm:$0xff] %v333_v26  ;;  %336 = vst [vmem:[%s5004_s26 + $0x314] sm:$0xff] %v335_v27  ;;  %v339_v29 = vld [vmem:[%s4999_s25 + $0x594] sm:$0xff]  ;;  %v341_v30 = vld [vmem:[%s4999_s25 + $0x59c] sm:$0xff] }
  0x41   : > { %338 = vst [vmem:[%s5004_s26 + $0x31c] sm:$0xff] %v337_v28  ;;  %v343_v31 = vld [vmem:[%s4999_s25 + $0x5a4] sm:$0xff]  ;;  %340 = vst [vmem:[%s5004_s26 + $0x324] sm:$0xff] %v339_v29  ;;  %v3393_v32 = vld [vmem:[%s4999_s25 + $0x30] sm:$0xf] }
  0x42   : > { %342 = vst [vmem:[%s5004_s26 + $0x32c] sm:$0xff] %v341_v30  ;;  %344 = vst [vmem:[%s5004_s26 + $0x334] sm:$0xff] %v343_v31  ;;  %v3395_v33 = vld [vmem:[%s4999_s25 + $0x64] sm:$0xf]  ;;  %v3397_v34 = vld [vmem:[%s4999_s25 + $0x98] sm:$0xf] }
  0x43   : > { %3394 = vst [vmem:[%s5004_s26 + $0x30] sm:$0xf] %v3393_v32  ;;  %3396 = vst [vmem:[%s5004_s26 + $0x64] sm:$0xf] %v3395_v33  ;;  %v3399_v35 = vld [vmem:[%s4999_s25 + $0xcc] sm:$0xf] }
  0x44   : > { %3398 = vst [vmem:[%s5004_s26 + $0x98] sm:$0xf] %v3397_v34  ;;  %v3401_v36 = vld [vmem:[%s4999_s25 + $0x1d0] sm:$0xf]  ;;  %v3403_v37 = vld [vmem:[%s4999_s25 + $0x204] sm:$0xf] }
  0x45   : > { %3400 = vst [vmem:[%s5004_s26 + $0xcc] sm:$0xf] %v3399_v35  ;;  %3402 = vst [vmem:[%s5004_s26 + $0x100] sm:$0xf] %v3401_v36  ;;  %v3405_v38 = vld [vmem:[%s4999_s25 + $0x238] sm:$0xf] }
  0x46   : > { %3404 = vst [vmem:[%s5004_s26 + $0x134] sm:$0xf] %v3403_v37  ;;  %v3407_v39 = vld [vmem:[%s4999_s25 + $0x26c] sm:$0xf]  ;;  %v3409_v40 = vld [vmem:[%s4999_s25 + $0x370] sm:$0xf] }
  0x47   : > { %3406 = vst [vmem:[%s5004_s26 + $0x168] sm:$0xf] %v3405_v38  ;;  %3408 = vst [vmem:[%s5004_s26 + $0x19c] sm:$0xf] %v3407_v39  ;;  %v3411_v41 = vld [vmem:[%s4999_s25 + $0x3a4] sm:$0xf] }
  0x48   : > { %3410 = vst [vmem:[%s5004_s26 + $0x1d0] sm:$0xf] %v3409_v40  ;;  %v3413_v42 = vld [vmem:[%s4999_s25 + $0x3d8] sm:$0xf]  ;;  %v3415_v43 = vld [vmem:[%s4999_s25 + $0x40c] sm:$0xf] }
  0x49   : > { %3412 = vst [vmem:[%s5004_s26 + $0x204] sm:$0xf] %v3411_v41  ;;  %3414 = vst [vmem:[%s5004_s26 + $0x238] sm:$0xf] %v3413_v42  ;;  %v3417_v44 = vld [vmem:[%s4999_s25 + $0x510] sm:$0xf] }
  0x4a   : > { %3416 = vst [vmem:[%s5004_s26 + $0x26c] sm:$0xf] %v3415_v43  ;;  %v3419_v45 = vld [vmem:[%s4999_s25 + $0x544] sm:$0xf]  ;;  %v3421_v46 = vld [vmem:[%s4999_s25 + $0x578] sm:$0xf] }
  0x4b   : > { %3418 = vst [vmem:[%s5004_s26 + $0x2a0] sm:$0xf] %v3417_v44  ;;  %3420 = vst [vmem:[%s5004_s26 + $0x2d4] sm:$0xf] %v3419_v45  ;;  %v3423_v47 = vld [vmem:[%s4999_s25 + $0x5ac] sm:$0xf] }
  0x4c   : > { %3422 = vst [vmem:[%s5004_s26 + $0x308] sm:$0xf] %v3421_v46  ;;  %3424 = vst [vmem:[%s5004_s26 + $0x33c] sm:$0xf] %v3423_v47 }
  0x4d PF: > { %p3425_p5 = scmp.ge.s32.totalorder %s4943_s14, 1  ;;  %p388_p6 = scmp.lt.s32.totalorder %s4943_s14, 3 }
  0x4f   : > { %p389_p7 = pnand %p3425_p5, %p388_p6 }
  0x51   : > { %392 = sbr.rel (%p389_p7) target bundleno = 781 (0x30d), region = 54 }
  0x58   : > { %v5232_v48 = vld [vmem:[%s6905_s1 + $0x40] sm:$0xff]   ;;  %v5250_v52 = vld [vmem:[%s6905_s1 + $0x48] sm:$0xff]   ;;  %v5268_v56 = vld [vmem:[%s6905_s1 + $0x50] sm:$0xff]   ;;  %s395_s4 = sand.u32 1, %s4935_s12  }
  0x59   : > { %v4562_v49 = vld [vmem:[%s6905_s1 + $0xc0] sm:$0xff]   ;;  %3742 = vmatprep.subr.bf16.mxu0 %v5232_v48  ;;  %v4566_v53 = vld [vmem:[%s6905_s1 + $0xc8] sm:$0xff]   ;;  %v4570_v57 = vld [vmem:[%s6905_s1 + $0xd0] sm:$0xff]   ;;  %s4536_s11 = smul.u32 832, %s395_s4 }
  0x5a   : > { %v5241_v50 = vld [vmem:[%s6905_s1] sm:$0xff]   ;;  %3770 = vmatprep.subr.bf16.mxu1 %v4562_v49  ;;  %v5259_v54 = vld [vmem:[%s6905_s1 + $0x8] sm:$0xff]   ;;  %v5277_v58 = vld [vmem:[%s6905_s1 + $0x10] sm:$0xff]  }
  0x5b   : > { %v4564_v51 = vld [vmem:[%s6905_s1 + $0x80] sm:$0xff]   ;;  %3743 = vmatpush3.bf16.msra.mxu0 %v5241_v50  ;;  %v4568_v55 = vld [vmem:[%s6905_s1 + $0x88] sm:$0xff]   ;;  %v4572_v59 = vld [vmem:[%s6905_s1 + $0x90] sm:$0xff]   ;;  %s5374_s29 = scalar_lea.vmem [#allocation2], %s4536_s11 }
  0x5c   : > { %3771 = vmatpush3.bf16.msra.mxu1 %v4564_v51  ;;  %3744 = vmatprep.subr.bf16.mxu0 %v5250_v52  ;;  %v5286_v60 = vld [vmem:[%s6905_s1 + $0x58] sm:$0xff]   ;;  %v5304_v0 = vld [vmem:[%s6905_s1 + $0x60] sm:$0xff]   ;;  %v5322_v4 = vld [vmem:[%s6905_s1 + $0x68] sm:$0xff]  }
  0x5d   : > { %3772 = vmatprep.subr.bf16.mxu1 %v4566_v53  ;;  %v4574_v61 = vld [vmem:[%s6905_s1 + $0xd8] sm:$0xff]   ;;  %v4578_v1 = vld [vmem:[%s6905_s1 + $0xe0] sm:$0xff]   ;;  %v4582_v5 = vld [vmem:[%s6905_s1 + $0xe8] sm:$0xff]  }
  0x5e   : > { %v5295_v62 = vld [vmem:[%s6905_s1 + $0x18] sm:$0xff]   ;;  %v5313_v2 = vld [vmem:[%s6905_s1 + $0x20] sm:$0xff]   ;;  %v5331_v6 = vld [vmem:[%s6905_s1 + $0x28] sm:$0xff]  }
  0x5f   : > { %3745 = vmatpush3.bf16.msra.mxu0 %v5259_v54  ;;  %v4576_v63 = vld [vmem:[%s6905_s1 + $0x98] sm:$0xff]   ;;  %v4580_v3 = vld [vmem:[%s6905_s1 + $0xa0] sm:$0xff]   ;;  %v4584_v7 = vld [vmem:[%s6905_s1 + $0xa8] sm:$0xff]  }
  0x60   : > { %3773 = vmatpush3.bf16.msra.mxu1 %v4568_v55  ;;  %3746 = vmatprep.subr.bf16.mxu0 %v5268_v56  ;;  %v5341_v8 = vld [vmem:[%s6905_s1 + $0x70] sm:$0xff]   ;;  %v5359_v12 = vld [vmem:[%s6905_s1 + $0x78] sm:$0xff]   ;;  %v4598_v19 = vld [vmem:[%s5374_s29 + $0xc] ss:$52 sps:$4 sm:$0xff]  }
  0x61   : > { %3774 = vmatprep.subr.bf16.mxu1 %v4570_v57  ;;  %v4586_v9 = vld [vmem:[%s6905_s1 + $0xf0] sm:$0xff]   ;;  %v4590_v13 = vld [vmem:[%s6905_s1 + $0xf8] sm:$0xff]   ;;  %v5383_v20 = vld [vmem:[%s6905_s1 + $0x140] sm:$0xff]   ;;  %1499 = vmatprep.mubr.bf16.mxu1 %v4598_v19 }
  0x62   : > { %v5350_v10 = vld [vmem:[%s6905_s1 + $0x30] sm:$0xff]   ;;  %v5368_v14 = vld [vmem:[%s6905_s1 + $0x38] sm:$0xff]   ;;  %v5388_v21 = vld [vmem:[%s6905_s1 + $0x1c0] sm:$0xff]  }
  0x63   : > { %3747 = vmatpush3.bf16.msra.mxu0 %v5277_v58  ;;  %v4588_v11 = vld [vmem:[%s6905_s1 + $0xb0] sm:$0xff]   ;;  %v4592_v15 = vld [vmem:[%s6905_s1 + $0xb8] sm:$0xff]   ;;  %v5394_v22 = vld [vmem:[%s6905_s1 + $0x100] sm:$0xff]  }
  0x64   : > { %3775 = vmatpush3.bf16.msra.mxu1 %v4572_v59  ;;  %3748 = vmatprep.subr.bf16.mxu0 %v5286_v60  ;;  %v4593_v16 = vld [vmem:[%s5374_s29] ss:$52 sps:$4 sm:$0xff]   ;;  %v4595_v17 = vld [vmem:[%s5374_s29 + $0x4] ss:$52 sps:$4 sm:$0xff]   ;;  %v4596_v18 = vld [vmem:[%s5374_s29 + $0x8] ss:$52 sps:$4 sm:$0xff]  }
  0x65   : > { %3776 = vmatprep.subr.bf16.mxu1 %v4574_v61  ;;  %1450 = vmatprep.mubr.bf16.mxu0 %v4595_v17  ;;  %v5400_v23 = vld [vmem:[%s6905_s1 + $0x180] sm:$0xff]   ;;  %v5406_v24 = vld [vmem:[%s6905_s1 + $0x148] sm:$0xff]   ;;  %v5430_v28 = vld [vmem:[%s6905_s1 + $0x150] sm:$0xff]  }
  0x66   : > { %v5412_v25 = vld [vmem:[%s6905_s1 + $0x1c8] sm:$0xff]   ;;  %v5436_v29 = vld [vmem:[%s6905_s1 + $0x1d0] sm:$0xff]   ;;  %v5454_v32 = vld [vmem:[%s6905_s1 + $0x158] sm:$0xff]  }
  0x67   : > { %3749 = vmatpush3.bf16.msra.mxu0 %v5295_v62  ;;  %v5418_v26 = vld [vmem:[%s6905_s1 + $0x108] sm:$0xff]   ;;  %v5442_v30 = vld [vmem:[%s6905_s1 + $0x110] sm:$0xff]   ;;  %v5460_v33 = vld [vmem:[%s6905_s1 + $0x1d8] sm:$0xff]  }
  0x68   : > { %3777 = vmatpush3.bf16.msra.mxu1 %v4576_v63  ;;  %3750 = vmatprep.subr.bf16.mxu0 %v5304_v0  ;;  %v5424_v27 = vld [vmem:[%s6905_s1 + $0x188] sm:$0xff]   ;;  %v5448_v31 = vld [vmem:[%s6905_s1 + $0x190] sm:$0xff]   ;;  %v5466_v34 = vld [vmem:[%s6905_s1 + $0x118] sm:$0xff]  }
  0x69   : > { %3778 = vmatprep.subr.bf16.mxu1 %v4578_v1  ;;  %v5472_v35 = vld [vmem:[%s6905_s1 + $0x198] sm:$0xff]   ;;  %v5478_v36 = vld [vmem:[%s6905_s1 + $0x160] sm:$0xff]   ;;  %v5502_v40 = vld [vmem:[%s6905_s1 + $0x168] sm:$0xff]  }
  0x6a   : > { %v5484_v37 = vld [vmem:[%s6905_s1 + $0x1e0] sm:$0xff]   ;;  %v5508_v41 = vld [vmem:[%s6905_s1 + $0x1e8] sm:$0xff]   ;;  %v5531_v49 = vld [vmem:[%s6905_s1 + $0x170] sm:$0xff]  }
  0x6b   : > { %3751 = vmatpush3.bf16.msra.mxu0 %v5313_v2  ;;  %v5490_v38 = vld [vmem:[%s6905_s1 + $0x120] sm:$0xff]   ;;  %v4623_v43 = vld [vmem:[%s5374_s29 + $0x74] ss:$52 sps:$4 sm:$0xff]   ;;  %v5554_v57 = vld [vmem:[%s6905_s1 + $0x178] sm:$0xff]  }
  0x6c   : > { %3779 = vmatpush3.bf16.msra.mxu1 %v4580_v3  ;;  %3752 = vmatprep.subr.bf16.mxu0 %v5322_v4  ;;  %v5496_v39 = vld [vmem:[%s6905_s1 + $0x1a0] sm:$0xff]   ;;  %v5517_v44 = vld [vmem:[%s6905_s1 + $0x128] sm:$0xff]   ;;  %v5536_v51 = vld [vmem:[%s6905_s1 + $0x1f0] sm:$0xff]  }
  0x6d   : > { %3780 = vmatprep.subr.bf16.mxu1 %v4582_v5  ;;  %v4621_v42 = vld [vmem:[%s5374_s29 + $0x6c] ss:$52 sps:$4 sm:$0xff]   ;;  %v4627_v46 = vld [vmem:[%s5374_s29 + $0x68] ss:$52 sps:$4 sm:$0xff]   ;;  %v4628_v47 = vld [vmem:[%s5374_s29 + $0x70] ss:$52 sps:$4 sm:$0xff]  }
  0x6e   : > { %v5522_v45 = vld [vmem:[%s6905_s1 + $0x1a8] sm:$0xff]   ;;  %v5542_v53 = vld [vmem:[%s6905_s1 + $0x130] sm:$0xff]   ;;  %v5560_v59 = vld [vmem:[%s6905_s1 + $0x1f8] sm:$0xff]  }
  0x6f   : > { %3753 = vmatpush3.bf16.msra.mxu0 %v5331_v6  ;;  %v5548_v55 = vld [vmem:[%s6905_s1 + $0x1b0] sm:$0xff]   ;;  %6983 = vst [vmem:[#allocation4_spill] sm:$0xff] %v5560_v59  ;;  %v5566_v61 = vld [vmem:[%s6905_s1 + $0x138] sm:$0xff]   ;;  %v5612_v17 = vld [vmem:[%s6905_s1 + $0x2c8] sm:$0xff]  }
  0x70   : > { %3781 = vmatpush3.bf16.msra.mxu1 %v4584_v7  ;;  %3754 = vmatprep.subr.bf16.mxu0 %v5341_v8  ;;  %6982 = vst [vmem:[#allocation3_spill] sm:$0xff] %v5548_v55  ;;  %v5572_v63 = vld [vmem:[%s6905_s1 + $0x1b8] sm:$0xff]   ;;  %v4637_v1 = vld [vmem:[%s5374_s29 + $0x10] ss:$52 sps:$4 sm:$0xff]   ;;  %v4639_v3 = vld [vmem:[%s5374_s29 + $0x14] ss:$52 sps:$4 sm:$0xff]  }
  0x71   : > { %3782 = vmatprep.subr.bf16.mxu1 %v4586_v9  ;;  %6984 = vst [vmem:[#allocation5_spill] sm:$0xff] %v5572_v63  ;;  %v4640_v5 = vld [vmem:[%s5374_s29 + $0x18] ss:$52 sps:$4 sm:$0xff]   ;;  %v4642_v7 = vld [vmem:[%s5374_s29 + $0x1c] ss:$52 sps:$4 sm:$0xff]   ;;  %v5583_v9 = vld [vmem:[%s6905_s1 + $0x240] sm:$0xff]  }
  0x72   : > { %6987 = vst [vmem:[#allocation8_spill] sm:$0xff] %v5612_v17  ;;  %v5624_v19 = vld [vmem:[%s6905_s1 + $0x288] sm:$0xff]  }
  0x73   : > { %3755 = vmatpush3.bf16.msra.mxu0 %v5350_v10  ;;  %6988 = vst [vmem:[#allocation9_spill] sm:$0xff] %v5624_v19 }
  0x74   : > { %3783 = vmatpush3.bf16.msra.mxu1 %v4588_v11  ;;  %3756 = vmatprep.subr.bf16.mxu0 %v5359_v12  ;;  %v5588_v11 = vld [vmem:[%s6905_s1 + $0x2c0] sm:$0xff]  }
  0x75   : > { %3784 = vmatprep.subr.bf16.mxu1 %v4590_v13  ;;  %6985 = vst [vmem:[#allocation6_spill] sm:$0xff] %v5588_v11  ;;  %v5594_v13 = vld [vmem:[%s6905_s1 + $0x200] sm:$0xff]  }
  0x77   : > { %3757 = vmatpush3.bf16.msra.mxu0 %v5368_v14 }
  0x78   : > { %3785 = vmatpush3.bf16.msra.mxu1 %v4592_v15  ;;  %3798 = vmatprep.subr.bf16.mxu0 %v5383_v20  ;;  %v5600_v15 = vld [vmem:[%s6905_s1 + $0x280] sm:$0xff]  }
  0x79   : > { %3826 = vmatprep.subr.bf16.mxu1 %v5388_v21  ;;  %6986 = vst [vmem:[#allocation7_spill] sm:$0xff] %v5600_v15 }
  0x7a   : > { %1451 = vmatmul.mubr.bf16.vlgmr.msra.gmra.mrb[0].mxu0 %v4593_v16  ;;  %v5606_v16 = vld [vmem:[%s6905_s1 + $0x248] sm:$0xff]  }
  0x7b   : > { %1500 = vmatmul.mubr.bf16.vlgmr.msra.gmra.mrb[0].mxu1 %v4596_v18  ;;  %3799 = vmatpush3.bf16.msra.mxu0 %v5394_v22  ;;  %v5618_v18 = vld [vmem:[%s6905_s1 + $0x208] sm:$0xff]  }
  0x7c   : > { %3827 = vmatpush3.bf16.msra.mxu1 %v5400_v23  ;;  %3800 = vmatprep.subr.bf16.mxu0 %v5406_v24 }
  0x7d   : > { %3828 = vmatprep.subr.bf16.mxu1 %v5412_v25  ;;  %1458 = vmatprep.mubr.bf16.mxu0 %v4621_v42  ;;  %v4651_v42 = vld [vmem:[%s5374_s29 + $0x7c] ss:$52 sps:$4 sm:$0xff]  }
  0x7e   : > { %1507 = vmatprep.mubr.bf16.mxu1 %v4623_v43  ;;  %v4653_v43 = vld [vmem:[%s5374_s29 + $0x78] ss:$52 sps:$4 sm:$0xff]  }
  0x7f   : > { %3801 = vmatpush3.bf16.msra.mxu0 %v5418_v26 }
  0x80   : > { %3829 = vmatpush3.bf16.msra.mxu1 %v5424_v27  ;;  %3802 = vmatprep.subr.bf16.mxu0 %v5430_v28 }
  0x81   : > { %3830 = vmatprep.subr.bf16.mxu1 %v5436_v29 }
  0x82   : > { %1459 = vmatmul.mubr.bf16.gmra.mrb[4].mxu0 %v4627_v46  ;;  %v5633_v46 = vld [vmem:[%s6905_s1 + $0x250] sm:$0xff]  }
  0x83   : > { %3803 = vmatpush3.bf16.msra.mxu0 %v5442_v30  ;;  %1508 = vmatmul.mubr.bf16.gmra.mrb[4].mxu1 %v4628_v47  ;;  %v5638_v47 = vld [vmem:[%s6905_s1 + $0x2d0] sm:$0xff]  }
  0x84   : > { %3831 = vmatpush3.bf16.msra.mxu1 %v5448_v31  ;;  %3804 = vmatprep.subr.bf16.mxu0 %v5454_v32  ;;  %6989 = vst [vmem:[#allocation10_spill] sm:$0xff] %v5638_v47 }
  0x85   : > { %3832 = vmatprep.subr.bf16.mxu1 %v5460_v33  ;;  %1548 = vmatprep.mubr.bf16.mxu0 %v4639_v3  ;;  %v5646_v3 = vld [vmem:[%s6905_s1 + $0x210] sm:$0xff]  }
  0x86   : > { %1597 = vmatprep.mubr.bf16.mxu1 %v4642_v7  ;;  %v4660_v7 = vld [vmem:[%s5374_s29 + $0x80] ss:$52 sps:$4 sm:$0xff]  }
  0x87   : > { %3805 = vmatpush3.bf16.msra.mxu0 %v5466_v34 }
  0x88   : > { %3833 = vmatpush3.bf16.msra.mxu1 %v5472_v35  ;;  %3806 = vmatprep.subr.bf16.mxu0 %v5478_v36 }
  0x89   : > { %3834 = vmatprep.subr.bf16.mxu1 %v5484_v37 }
  0x8b   : > { %3807 = vmatpush3.bf16.msra.mxu0 %v5490_v38 }
  0x8c   : > { %3835 = vmatpush3.bf16.msra.mxu1 %v5496_v39  ;;  %3808 = vmatprep.subr.bf16.mxu0 %v5502_v40 }
  0x8d   : > { %3836 = vmatprep.subr.bf16.mxu1 %v5508_v41 }
  0x8f   : > { %3809 = vmatpush3.bf16.msra.mxu0 %v5517_v44 }
  0x90   : > { %3837 = vmatpush3.bf16.msra.mxu1 %v5522_v45  ;;  %3810 = vmatprep.subr.bf16.mxu0 %v5531_v49 }
  0x91   : > { %3838 = vmatprep.subr.bf16.mxu1 %v5536_v51 }
  0x93   : > { %3811 = vmatpush3.bf16.msra.mxu0 %v5542_v53 }
  0x94   : > { %3839 = vmatpush3.bf16.msra.mxu1 %v5548_v55  ;;  %3812 = vmatprep.subr.bf16.mxu0 %v5554_v57  ;;  %v4683_v55 = vld [vmem:[%s5374_s29 + $0x24] ss:$52 sps:$4 sm:$0xff]  }
  0x95   : > { %3840 = vmatprep.subr.bf16.mxu1 %v5560_v59  ;;  %v5760_v59 = vld [vmem:[%s6905_s1 + $0x2f8] sm:$0xff]  }
  0x96   : > { %7002 = vst [vmem:[#allocation23_spill] sm:$0xff] %v5760_v59 }
  0x97   : > { %3813 = vmatpush3.bf16.msra.mxu0 %v5566_v61 }
  0x98   : > { %3841 = vmatpush3.bf16.msra.mxu1 %v5572_v63  ;;  %3854 = vmatprep.subr.bf16.mxu0 %v5583_v9  ;;  %v5754_v63 = vld [vmem:[%s6905_s1 + $0x278] sm:$0xff]  }
  0x99   : > { %3882 = vmatprep.subr.bf16.mxu1 %v5588_v11  ;;  %v5742_v11 = vld [vmem:[%s6905_s1 + $0x230] sm:$0xff]   ;;  %7001 = vst [vmem:[#allocation22_spill] sm:$0xff] %v5754_v63 }
  0x9a   : > { %1549 = vmatmul.mubr.bf16.vlgmr.msra.gmra.mrb[8].mxu0 %v4637_v1  ;;  %v4656_v1 = vld [vmem:[%s5374_s29 + $0x84] ss:$52 sps:$4 sm:$0xff]   ;;  %6999 = vst [vmem:[#allocation20_spill] sm:$0xff] %v5742_v11 }
  0x9b   : > { %1598 = vmatmul.mubr.bf16.vlgmr.msra.gmra.mrb[8].mxu1 %v4640_v5  ;;  %3855 = vmatpush3.bf16.msra.mxu0 %v5594_v13  ;;  %v5651_v5 = vld [vmem:[%s6905_s1 + $0x290] sm:$0xff]  }
  0x9c   : > { %3883 = vmatpush3.bf16.msra.mxu1 %v5600_v15  ;;  %3856 = vmatprep.subr.bf16.mxu0 %v5606_v16  ;;  %6990 = vst [vmem:[#allocation11_spill] sm:$0xff] %v5651_v5  ;;  %v5724_v15 = vld [vmem:[%s6905_s1 + $0x2a8] sm:$0xff]  }
  0x9d   : > { %3884 = vmatprep.subr.bf16.mxu1 %v5612_v17  ;;  %1556 = vmatprep.mubr.bf16.mxu0 %v4651_v42  ;;  %v5658_v42 = vld [vmem:[%s6905_s1 + $0x258] sm:$0xff]   ;;  %v5712_v17 = vld [vmem:[%s6905_s1 + $0x2e8] sm:$0xff]   ;;  %6996 = vst [vmem:[#allocation17_spill] sm:$0xff] %v5724_v15 }
  0x9e   : > { %1605 = vmatprep.mubr.bf16.mxu1 %v4656_v1  ;;  %v5670_v1 = vld [vmem:[%s6905_s1 + $0x218] sm:$0xff]   ;;  %6995 = vst [vmem:[#allocation16_spill] sm:$0xff] %v5712_v17 }
  0x9f   : > { %3857 = vmatpush3.bf16.msra.mxu0 %v5618_v18 }
  0xa0   : > { %3885 = vmatpush3.bf16.msra.mxu1 %v5624_v19  ;;  %3858 = vmatprep.subr.bf16.mxu0 %v5633_v46  ;;  %v5700_v19 = vld [vmem:[%s6905_s1 + $0x2a0] sm:$0xff]  }
  0xa1   : > { %3886 = vmatprep.subr.bf16.mxu1 %v5638_v47  ;;  %v5676_v47 = vld [vmem:[%s6905_s1 + $0x298] sm:$0xff]   ;;  %6994 = vst [vmem:[#allocation15_spill] sm:$0xff] %v5700_v19 }
  0xa2   : > { %1557 = vmatmul.mubr.bf16.gmra.mrb[12].mxu0 %v4653_v43  ;;  %v5664_v43 = vld [vmem:[%s6905_s1 + $0x2d8] sm:$0xff]   ;;  %6992 = vst [vmem:[#allocation13_spill] sm:$0xff] %v5676_v47 }
  0xa3   : > { %3859 = vmatpush3.bf16.msra.mxu0 %v5646_v3  ;;  %6991 = vst [vmem:[#allocation12_spill] sm:$0xff] %v5664_v43  ;;  %1606 = vmatmul.mubr.bf16.gmra.mrb[12].mxu1 %v4660_v7  ;;  %v5682_v7 = vld [vmem:[%s6905_s1 + $0x260] sm:$0xff]  }
  0xa4   : > { %3887 = vmatpush3.bf16.msra.mxu1 %v5651_v5  ;;  %3860 = vmatprep.subr.bf16.mxu0 %v5658_v42  ;;  %v5688_v5 = vld [vmem:[%s6905_s1 + $0x2e0] sm:$0xff]  }
  0xa5   : > { %3888 = vmatprep.subr.bf16.mxu1 %v5664_v43  ;;  %6993 = vst [vmem:[#allocation14_spill] sm:$0xff] %v5688_v5  ;;  %v5694_v43 = vld [vmem:[%s6905_s1 + $0x220] sm:$0xff]   ;;  %1646 = vmatprep.mubr.bf16.mxu0 %v4683_v55 }
  0xa6   : > { %v4689_v55 = vld [vmem:[%s5374_s29 + $0x8c] ss:$52 sps:$4 sm:$0xff]  }
  0xa7   : > { %3861 = vmatpush3.bf16.msra.mxu0 %v5670_v1 }
  0xa8   : > { %3889 = vmatpush3.bf16.msra.mxu1 %v5676_v47  ;;  %3862 = vmatprep.subr.bf16.mxu0 %v5682_v7  ;;  %v5706_v47 = vld [vmem:[%s6905_s1 + $0x268] sm:$0xff]  }
  0xa9   : > { %3890 = vmatprep.subr.bf16.mxu1 %v5688_v5  ;;  %v5718_v5 = vld [vmem:[%s6905_s1 + $0x228] sm:$0xff]  }
  0xab   : > { %3863 = vmatpush3.bf16.msra.mxu0 %v5694_v43 }
  0xac   : > { %3891 = vmatpush3.bf16.msra.mxu1 %v5700_v19  ;;  %3864 = vmatprep.subr.bf16.mxu0 %v5706_v47  ;;  %v5730_v19 = vld [vmem:[%s6905_s1 + $0x270] sm:$0xff]  }
  0xad   : > { %3892 = vmatprep.subr.bf16.mxu1 %v5712_v17  ;;  %6997 = vst [vmem:[#allocation18_spill] sm:$0xff] %v5730_v19  ;;  %v5736_v17 = vld [vmem:[%s6905_s1 + $0x2f0] sm:$0xff]  }
  0xae   : > { %6998 = vst [vmem:[#allocation19_spill] sm:$0xff] %v5736_v17 }
  0xaf   : > { %3865 = vmatpush3.bf16.msra.mxu0 %v5718_v5 }
  0xb0   : > { %3893 = vmatpush3.bf16.msra.mxu1 %v5724_v15  ;;  %3866 = vmatprep.subr.bf16.mxu0 %v5730_v19  ;;  %v5748_v15 = vld [vmem:[%s6905_s1 + $0x2b0] sm:$0xff]   ;;  %v4686_v19 = vld [vmem:[%s5374_s29 + $0x2c] ss:$52 sps:$4 sm:$0xff]  }
  0xb1   : > { %3894 = vmatprep.subr.bf16.mxu1 %v5736_v17  ;;  %7000 = vst [vmem:[#allocation21_spill] sm:$0xff] %v5748_v15  ;;  %v5766_v17 = vld [vmem:[%s6905_s1 + $0x238] sm:$0xff]   ;;  %1695 = vmatprep.mubr.bf16.mxu1 %v4686_v19  ;;  %v4693_v19 = vld [vmem:[%s5374_s29 + $0x94] ss:$52 sps:$4 sm:$0xff]  }
  0xb2   : > { %7003 = vst [vmem:[#allocation24_spill] sm:$0xff] %v5766_v17 }
  0xb3   : > { %3867 = vmatpush3.bf16.msra.mxu0 %v5742_v11  ;;  %v5772_v11 = vld [vmem:[%s6905_s1 + $0x2b8] sm:$0xff]  }
  0xb4   : > { %3895 = vmatpush3.bf16.msra.mxu1 %v5748_v15  ;;  %3868 = vmatprep.subr.bf16.mxu0 %v5754_v63  ;;  %v4681_v15 = vld [vmem:[%s5374_s29 + $0x20] ss:$52 sps:$4 sm:$0xff]   ;;  %v4684_v63 = vld [vmem:[%s5374_s29 + $0x28] ss:$52 sps:$4 sm:$0xff]  }
  0xb5   : > { %3896 = vmatprep.subr.bf16.mxu1 %v5760_v59  ;;  %v5784_v59 = vld [vmem:[%s6905_s1 + $0x300] sm:$0xff]  }
  0xb7   : > { %3869 = vmatpush3.bf16.msra.mxu0 %v5766_v17  ;;  %v5789_v17 = vld [vmem:[%s6905_s1 + $0x308] sm:$0xff]  }
  0xb8   : > { %3897 = vmatpush3.bf16.msra.mxu1 %v5772_v11  ;;  %4454 = vmatprep.subr.bf16.mxu0 %v5784_v59 }
  0xb9   : > { %3920 = vmatprep.subr.bf16.mxu1 %v5232_v48  ;;  %v4691_v48 = vld [vmem:[%s5374_s29 + $0x88] ss:$52 sps:$4 sm:$0xff]  }
  0xba   : > { %1647 = vmatmul.mubr.bf16.vlgmr.msra.gmra.mrb[16].mxu0 %v4681_v15  ;;  %v5801_v15 = vld [vmem:[%s6905_s1 + $0x310] sm:$0xff]  }
  0xbb   : > { %1696 = vmatmul.mubr.bf16.vlgmr.msra.gmra.mrb[16].mxu1 %v4684_v63  ;;  %4455 = vmatpush3.bf16.msra.mxu0 %v5784_v59  ;;  %v4695_v63 = vld [vmem:[%s5374_s29 + $0x90] ss:$52 sps:$4 sm:$0xff]  }
  0xbc   : > { %3921 = vmatpush3.bf16.msra.mxu1 %v5241_v50  ;;  %4456 = vmatprep.subr.bf16.mxu0 %v5789_v17  ;;  %v5811_v50 = vld [vmem:[%s6905_s1 + $0x318] sm:$0xff]  }
  0xbd   : > { %3922 = vmatprep.subr.bf16.mxu1 %v5250_v52  ;;  %1654 = vmatprep.mubr.bf16.mxu0 %v4689_v55  ;;  %v4701_v52 = vld [vmem:[%s5374_s29 + $0x30] ss:$52 sps:$4 sm:$0xff]   ;;  %v4705_v55 = vld [vmem:[%s5374_s29 + $0xd4] ss:$52 sps:$4 sm:$0xff]  }
  0xbe   : > { %1703 = vmatprep.mubr.bf16.mxu1 %v4693_v19  ;;  %v5974_v19 = vld [vmem:[%s6905_s1 + $0xb8] sm:$0xff]  }
  0xbf   : > { %4457 = vmatpush3.bf16.msra.mxu0 %v5789_v17  ;;  %7005 = vst [vmem:[#allocation26_spill] sm:$0xff] %v5974_v19 }
  0xc0   : > { %3923 = vmatpush3.bf16.msra.mxu1 %v5259_v54  ;;  %4458 = vmatprep.subr.bf16.mxu0 %v5801_v15  ;;  %v5822_v54 = vld [vmem:[%s6905_s1 + $0x320] sm:$0xff]  }
  0xc1   : > { %3924 = vmatprep.subr.bf16.mxu1 %v5268_v56  ;;  %v5832_v56 = vld [vmem:[%s6905_s1 + $0x328] sm:$0xff]  }
  0xc2   : > { %1655 = vmatmul.mubr.bf16.gmra.mrb[20].mxu0 %v4691_v48  ;;  %v4709_v48 = vld [vmem:[%s5374_s29 + $0xd8] ss:$52 sps:$4 sm:$0xff]  }
  0xc3   : > { %1704 = vmatmul.mubr.bf16.gmra.mrb[20].mxu1 %v4695_v63  ;;  %4459 = vmatpush3.bf16.msra.mxu0 %v5801_v15  ;;  %v7022_v63 = vld [vmem:[#allocation15_spill] sm:$0xff] }
  0xc4   : > { %3925 = vmatpush3.bf16.msra.mxu1 %v5277_v58  ;;  %4460 = vmatprep.subr.bf16.mxu0 %v5811_v50  ;;  %v5841_v58 = vld [vmem:[%s6905_s1 + $0x330] sm:$0xff]  }
  0xc5   : > { %3926 = vmatprep.subr.bf16.mxu1 %v5286_v60  ;;  %4470 = vmatprep.mubr.bf16.mxu0 %v4701_v52  ;;  %v5850_v60 = vld [vmem:[%s6905_s1 + $0x338] sm:$0xff]   ;;  %v7024_v52 = vld [vmem:[#allocation17_spill] sm:$0xff] }
  0xc6   : > { %1954 = vmatprep.mubr.bf16.mxu1 %v4705_v55  ;;  %v7026_v55 = vld [vmem:[#allocation21_spill] sm:$0xff] }
  0xc7   : > { %4461 = vmatpush3.bf16.msra.mxu0 %v5811_v50 }
  0xc8   : > { %3927 = vmatpush3.bf16.msra.mxu1 %v5295_v62  ;;  %4462 = vmatprep.subr.bf16.mxu0 %v5822_v54  ;;  %v4702_v62 = vld [vmem:[%s5374_s29 + $0x98] ss:$52 sps:$4 sm:$0xff]  }
  0xc9   : > { %3928 = vmatprep.subr.bf16.mxu1 %v5304_v0  ;;  %v4703_v0 = vld [vmem:[%s5374_s29 + $0xd0] ss:$52 sps:$4 sm:$0xff]  }
  0xcb   : > { %4463 = vmatpush3.bf16.msra.mxu0 %v5822_v54 }
  0xcc   : > { %3929 = vmatpush3.bf16.msra.mxu1 %v5313_v2  ;;  %4464 = vmatprep.subr.bf16.mxu0 %v5832_v56  ;;  %v5863_v2 = vld [vmem:[%s6905_s1 + $0xc0] sm:$0xff]  }
  0xcd   : > { %3930 = vmatprep.subr.bf16.mxu1 %v5322_v4  ;;  %v4706_v4 = vld [vmem:[%s5374_s29 + $0x13c] ss:$52 sps:$4 sm:$0xff]  }
  0xcf   : > { %4465 = vmatpush3.bf16.msra.mxu0 %v5832_v56 }
  0xd0   : > { %3931 = vmatpush3.bf16.msra.mxu1 %v5331_v6  ;;  %4466 = vmatprep.subr.bf16.mxu0 %v5841_v58  ;;  %v4711_v6 = vld [vmem:[%s5374_s29 + $0xdc] ss:$52 sps:$4 sm:$0xff]  }
  0xd1   : > { %3932 = vmatprep.subr.bf16.mxu1 %v5341_v8  ;;  %v5872_v8 = vld [vmem:[%s6905_s1 + $0x80] sm:$0xff]  }
  0xd3   : > { %4467 = vmatpush3.bf16.msra.mxu0 %v5841_v58 }
  0xd4   : > { %3933 = vmatpush3.bf16.msra.mxu1 %v5350_v10  ;;  %4468 = vmatprep.subr.bf16.mxu0 %v5850_v60  ;;  %v5879_v10 = vld [vmem:[%s6905_s1 + $0xc8] sm:$0xff]  }
  0xd5   : > { %3934 = vmatprep.subr.bf16.mxu1 %v5359_v12  ;;  %v4708_v12 = vld [vmem:[%s5374_s29 + $0x138] ss:$52 sps:$4 sm:$0xff]  }
  0xd7   : > { %4469 = vmatpush3.bf16.msra.mxu0 %v5850_v60 }
  0xd8   : > { %3935 = vmatpush3.bf16.msra.mxu1 %v5368_v14  ;;  %3948 = vmatprep.subr.bf16.mxu0 %v5863_v2  ;;  %v5887_v14 = vld [vmem:[%s6905_s1 + $0x88] sm:$0xff]  }
  0xd9   : > { %3976 = vmatprep.subr.bf16.mxu1 %v5383_v20  ;;  %v4714_v20 = vld [vmem:[%s5374_s29 + $0xe4] ss:$52 sps:$4 sm:$0xff]  }
  0xda   : > { %4471 = vmatmul.mubr.bf16.vlgmr.msra.gmra.mrb[24].mxu0 %v4702_v62  ;;  %v7027_v62 = vld [vmem:[#allocation23_spill] sm:$0xff] }
  0xdb   : > { %1955 = vmatmul.mubr.bf16.vlgmr.msra.gmra.mrb[24].mxu1 %v4703_v0  ;;  %3949 = vmatpush3.bf16.msra.mxu0 %v5872_v8  ;;  %v4737_v0 = vld [vmem:[%s5374_s29 + $0x168] ss:$52 sps:$4 sm:$0xff]  }
  0xdc   : > { %3977 = vmatpush3.bf16.msra.mxu1 %v5394_v22  ;;  %3950 = vmatprep.subr.bf16.mxu0 %v5879_v10  ;;  %v5895_v22 = vld [vmem:[%s6905_s1 + $0xd0] sm:$0xff]  }
  0xdd   : > { %3978 = vmatprep.subr.bf16.mxu1 %v5406_v24  ;;  %1962 = vmatprep.mubr.bf16.mxu1 %v4706_v4  ;;  %v5902_v24 = vld [vmem:[%s6905_s1 + $0x90] sm:$0xff]   ;;  %v6061_v4 = vld [vmem:[%s6905_s1 + $0x40] sm:$0xff]  }
  0xde   : > { %2003 = vmatprep.mubr.bf16.mxu0 %v4711_v6  ;;  %v4738_v6 = vld [vmem:[%s5374_s29 + $0x164] ss:$52 sps:$4 sm:$0xff]  }
  0xdf   : > { %3951 = vmatpush3.bf16.msra.mxu0 %v5887_v14 }
  0xe0   : > { %3979 = vmatpush3.bf16.msra.mxu1 %v5418_v26  ;;  %3952 = vmatprep.subr.bf16.mxu0 %v5895_v22  ;;  %v5909_v26 = vld [vmem:[%s6905_s1 + $0xd8] sm:$0xff]  }
  0xe1   : > { %3980 = vmatprep.subr.bf16.mxu1 %v5430_v28  ;;  %v5916_v28 = vld [vmem:[%s6905_s1 + $0x98] sm:$0xff]  }
  0xe3   : > { %1963 = vmatmul.mubr.bf16.gmra.mrb[28].mxu1 %v4708_v12  ;;  %3953 = vmatpush3.bf16.msra.mxu0 %v5902_v24  ;;  %v4746_v12 = vld [vmem:[%s5374_s29 + $0x1ac] ss:$52 sps:$4 sm:$0xff]  }
  0xe4   : > { %3981 = vmatpush3.bf16.msra.mxu1 %v5442_v30  ;;  %3954 = vmatprep.subr.bf16.mxu0 %v5909_v26  ;;  %v5923_v30 = vld [vmem:[%s6905_s1 + $0xe0] sm:$0xff]  }
  0xe5   : > { %3982 = vmatprep.subr.bf16.mxu1 %v5454_v32  ;;  %2052 = vmatprep.mubr.bf16.mxu1 %v4714_v20  ;;  %v5930_v32 = vld [vmem:[%s6905_s1 + $0xa0] sm:$0xff]   ;;  %v6077_v20 = vld [vmem:[%s6905_s1 + $0x48] sm:$0xff]  }
  0xe7   : > { %3955 = vmatpush3.bf16.msra.mxu0 %v5916_v28 }
  0xe8   : > { %3983 = vmatpush3.bf16.msra.mxu1 %v5466_v34  ;;  %3956 = vmatprep.subr.bf16.mxu0 %v5923_v30  ;;  %v5937_v34 = vld [vmem:[%s6905_s1 + $0xe8] sm:$0xff]  }
  0xe9   : > { %3984 = vmatprep.subr.bf16.mxu1 %v5478_v36  ;;  %v5944_v36 = vld [vmem:[%s6905_s1 + $0xa8] sm:$0xff]  }
  0xeb   : > { %3957 = vmatpush3.bf16.msra.mxu0 %v5930_v32 }
  0xec   : > { %3985 = vmatpush3.bf16.msra.mxu1 %v5490_v38  ;;  %3958 = vmatprep.subr.bf16.mxu0 %v5937_v34  ;;  %v5951_v38 = vld [vmem:[%s6905_s1 + $0xf0] sm:$0xff]  }
  0xed   : > { %3986 = vmatprep.subr.bf16.mxu1 %v5502_v40  ;;  %v5958_v40 = vld [vmem:[%s6905_s1 + $0xb0] sm:$0xff]  }
  0xef   : > { %3959 = vmatpush3.bf16.msra.mxu0 %v5944_v36 }
  0xf0   : > { %3987 = vmatpush3.bf16.msra.mxu1 %v5517_v44  ;;  %3960 = vmatprep.subr.bf16.mxu0 %v5951_v38  ;;  %v5965_v44 = vld [vmem:[%s6905_s1 + $0xf8] sm:$0xff]  }
  0xf1   : > { %3988 = vmatprep.subr.bf16.mxu1 %v5531_v49  ;;  %7004 = vst [vmem:[#allocation25_spill] sm:$0xff] %v5965_v44  ;;  %v4712_v49 = vld [vmem:[%s5374_s29 + $0xe0] ss:$52 sps:$4 sm:$0xff]  }
  0xf3   : > { %3961 = vmatpush3.bf16.msra.mxu0 %v5958_v40 }
  0xf4   : > { %3989 = vmatpush3.bf16.msra.mxu1 %v5542_v53  ;;  %3962 = vmatprep.subr.bf16.mxu0 %v5965_v44  ;;  %v4715_v53 = vld [vmem:[%s5374_s29 + $0x144] ss:$52 sps:$4 sm:$0xff]  }
  0xf5   : > { %3990 = vmatprep.subr.bf16.mxu1 %v5554_v57  ;;  %v4718_v57 = vld [vmem:[%s5374_s29 + $0x14c] ss:$52 sps:$4 sm:$0xff]  }
  0xf7   : > { %3963 = vmatpush3.bf16.msra.mxu0 %v5974_v19 }
  0xf8   : > { %3991 = vmatpush3.bf16.msra.mxu1 %v5566_v61  ;;  %4004 = vmatprep.subr.bf16.mxu0 %v5388_v21  ;;  %v4717_v61 = vld [vmem:[%s5374_s29 + $0x140] ss:$52 sps:$4 sm:$0xff]   ;;  %v4720_v21 = vld [vmem:[%s5374_s29 + $0x148] ss:$52 sps:$4 sm:$0xff]  }
  0xf9   : > { %4032 = vmatprep.subr.bf16.mxu1 %v5583_v9  ;;  %v4723_v9 = vld [vmem:[%s5374_s29 + $0xec] ss:$52 sps:$4 sm:$0xff]  }
  0xfa   : > { %2004 = vmatmul.mubr.bf16.vlgmr.msra.gmra.mrb[28].mxu0 %v4709_v48  ;;  %v4740_v48 = vld [vmem:[%s5374_s29 + $0x160] ss:$52 sps:$4 sm:$0xff]  }
  0xfb   : > { %2053 = vmatmul.mubr.bf16.vlgmr.msra.gmra.mrb[32].mxu1 %v4712_v49  ;;  %4005 = vmatpush3.bf16.msra.mxu0 %v5400_v23  ;;  %v4726_v23 = vld [vmem:[%s5374_s29 + $0xf4] ss:$52 sps:$4 sm:$0xff]  }
  0xfc   : > { %4033 = vmatpush3.bf16.msra.mxu1 %v5594_v13  ;;  %4006 = vmatprep.subr.bf16.mxu0 %v5412_v25  ;;  %v7006_v25 = vld [vmem:[#allocation18_spill] sm:$0xff]  ;;  %v6085_v49 = vld [vmem:[%s6905_s1 + $0x8] sm:$0xff]  }
  0xfd   : > { %4034 = vmatprep.subr.bf16.mxu1 %v5606_v16  ;;  %2011 = vmatprep.mubr.bf16.mxu0 %v4715_v53  ;;  %v4730_v13 = vld [vmem:[%s5374_s29 + $0x15c] ss:$52 sps:$4 sm:$0xff]   ;;  %v7014_v16 = vld [vmem:[#allocation7_spill] sm:$0xff] }
  0xfe   : > { %2060 = vmatprep.mubr.bf16.mxu1 %v4718_v57  ;;  %v6092_v53 = vld [vmem:[%s6905_s1 + $0x50] sm:$0xff]  }
  0xff   : > { %4007 = vmatpush3.bf16.msra.mxu0 %v5424_v27  ;;  %v7007_v27 = vld [vmem:[#allocation3_spill] sm:$0xff] }
 0x100   : > { %4035 = vmatpush3.bf16.msra.mxu1 %v5618_v18  ;;  %4008 = vmatprep.subr.bf16.mxu0 %v5436_v29  ;;  %v7008_v29 = vld [vmem:[#allocation20_spill] sm:$0xff] }
 0x101   : > { %4036 = vmatprep.subr.bf16.mxu1 %v5633_v46  ;;  %v7015_v18 = vld [vmem:[#allocation8_spill] sm:$0xff]  ;;  %v4729_v46 = vld [vmem:[%s5374_s29 + $0x150] ss:$52 sps:$4 sm:$0xff]  }
 0x102   : > { %2012 = vmatmul.mubr.bf16.gmra.mrb[32].mxu0 %v4717_v61  ;;  %v4743_v61 = vld [vmem:[%s5374_s29 + $0x1a4] ss:$52 sps:$4 sm:$0xff]  }
 0x103   : > { %2061 = vmatmul.mubr.bf16.gmra.mrb[36].mxu1 %v4720_v21  ;;  %4009 = vmatpush3.bf16.msra.mxu0 %v5448_v31  ;;  %v7009_v31 = vld [vmem:[#allocation4_spill] sm:$0xff] }
 0x104   : > { %4037 = vmatpush3.bf16.msra.mxu1 %v5646_v3  ;;  %4010 = vmatprep.subr.bf16.mxu0 %v5460_v33  ;;  %v7010_v33 = vld [vmem:[#allocation22_spill] sm:$0xff]  ;;  %v7016_v3 = vld [vmem:[#allocation9_spill] sm:$0xff] }
 0x105   : > { %4038 = vmatprep.subr.bf16.mxu1 %v5658_v42  ;;  %2101 = vmatprep.mubr.bf16.mxu0 %v4723_v9  ;;  %v4735_v42 = vld [vmem:[%s5374_s29 + $0xfc] ss:$52 sps:$4 sm:$0xff]  }
 0x106   : > { %2150 = vmatprep.mubr.bf16.mxu1 %v4726_v23  ;;  %v6100_v23 = vld [vmem:[%s6905_s1 + $0x10] sm:$0xff]  }
 0x107   : > { %4011 = vmatpush3.bf16.msra.mxu0 %v5472_v35  ;;  %v4721_v35 = vld [vmem:[%s5374_s29 + $0xe8] ss:$52 sps:$4 sm:$0xff]  }
 0x108   : > { %4039 = vmatpush3.bf16.msra.mxu1 %v5670_v1  ;;  %4012 = vmatprep.subr.bf16.mxu0 %v5484_v37  ;;  %v4724_v37 = vld [vmem:[%s5374_s29 + $0xf0] ss:$52 sps:$4 sm:$0xff]   ;;  %v7019_v1 = vld [vmem:[#allocation12_spill] sm:$0xff] }
 0x109   : > { %4040 = vmatprep.subr.bf16.mxu1 %v5682_v7  ;;  %v7020_v7 = vld [vmem:[#allocation13_spill] sm:$0xff] }
 0x10b   : > { %4013 = vmatpush3.bf16.msra.mxu0 %v5496_v39  ;;  %v7011_v39 = vld [vmem:[#allocation5_spill] sm:$0xff] }
 0x10c   : > { %4041 = vmatpush3.bf16.msra.mxu1 %v5694_v43  ;;  %4014 = vmatprep.subr.bf16.mxu0 %v5508_v41  ;;  %v7012_v41 = vld [vmem:[#allocation24_spill] sm:$0xff]  ;;  %v4736_v43 = vld [vmem:[%s5374_s29 + $0x100] ss:$52 sps:$4 sm:$0xff]  }
 0x10d   : > { %4042 = vmatprep.subr.bf16.mxu1 %v5706_v47  ;;  %v4732_v47 = vld [vmem:[%s5374_s29 + $0x158] ss:$52 sps:$4 sm:$0xff]  }
 0x10f   : > { %4015 = vmatpush3.bf16.msra.mxu0 %v5522_v45  ;;  %v7013_v45 = vld [vmem:[#allocation6_spill] sm:$0xff] }
 0x110   : > { %4043 = vmatpush3.bf16.msra.mxu1 %v5718_v5  ;;  %4016 = vmatprep.subr.bf16.mxu0 %v5536_v51  ;;  %v4727_v51 = vld [vmem:[%s5374_s29 + $0x154] ss:$52 sps:$4 sm:$0xff]   ;;  %v7017_v5 = vld [vmem:[#allocation10_spill] sm:$0xff] }
 0x111   : > { %4044 = vmatprep.subr.bf16.mxu1 %v7006_v25 }
 0x113   : > { %4017 = vmatpush3.bf16.msra.mxu0 %v7007_v27 }
 0x114   : > { %4045 = vmatpush3.bf16.msra.mxu1 %v7008_v29  ;;  %4018 = vmatprep.subr.bf16.mxu0 %v7009_v31  ;;  %v6107_v31 = vld [vmem:[%s6905_s1 + $0x58] sm:$0xff]  }
 0x115   : > { %4046 = vmatprep.subr.bf16.mxu1 %v7010_v33 }
 0x117   : > { %4019 = vmatpush3.bf16.msra.mxu0 %v7011_v39 }
 0x118   : > { %4047 = vmatpush3.bf16.msra.mxu1 %v7012_v41  ;;  %4060 = vmatprep.subr.bf16.mxu0 %v7013_v45 }
 0x119   : > { %4474 = vmatprep.subr.bf16.mxu1 %v5784_v59 }
 0x11a   : > { %2102 = vmatmul.mubr.bf16.vlgmr.msra.gmra.mrb[36].mxu0 %v4721_v35 }
 0x11b   : > { %2151 = vmatmul.mubr.bf16.vlgmr.msra.gmra.mrb[40].mxu1 %v4724_v37  ;;  %4061 = vmatpush3.bf16.msra.mxu0 %v7014_v16  ;;  %v6123_v16 = vld [vmem:[%s6905_s1 + $0x60] sm:$0xff]  }
 0x11c   : > { %4475 = vmatpush3.bf16.msra.mxu1 %v5784_v59  ;;  %4062 = vmatprep.subr.bf16.mxu0 %v7015_v18  ;;  %v7018_v59 = vld [vmem:[#allocation11_spill] sm:$0xff] }
 0x11d   : > { %4476 = vmatprep.subr.bf16.mxu1 %v5789_v17  ;;  %2109 = vmatprep.mubr.bf16.mxu0 %v4727_v51 }
 0x11e   : > { %2158 = vmatprep.mubr.bf16.mxu1 %v4730_v13  ;;  %v6116_v13 = vld [vmem:[%s6905_s1 + $0x18] sm:$0xff]  }
 0x11f   : > { %4063 = vmatpush3.bf16.msra.mxu0 %v7016_v3  ;;  %v6146_v3 = vld [vmem:[%s6905_s1 + $0x28] sm:$0xff]  }
 0x120   : > { %4477 = vmatpush3.bf16.msra.mxu1 %v5789_v17  ;;  %4064 = vmatprep.subr.bf16.mxu0 %v7017_v5  ;;  %v7021_v17 = vld [vmem:[#allocation14_spill] sm:$0xff]  ;;  %v6153_v5 = vld [vmem:[%s6905_s1 + $0x70] sm:$0xff]  }
 0x121   : > { %4478 = vmatprep.subr.bf16.mxu1 %v5801_v15 }
 0x122   : > { %2110 = vmatmul.mubr.bf16.gmra.mrb[40].mxu0 %v4729_v46  ;;  %v6132_v46 = vld [vmem:[%s6905_s1 + $0x20] sm:$0xff]  }
 0x123   : > { %2159 = vmatmul.mubr.bf16.gmra.mrb[44].mxu1 %v4732_v47  ;;  %4065 = vmatpush3.bf16.msra.mxu0 %v7018_v59  ;;  %v6139_v47 = vld [vmem:[%s6905_s1 + $0x68] sm:$0xff]   ;;  %v4741_v59 = vld [vmem:[%s5374_s29 + $0x1a0] ss:$52 sps:$4 sm:$0xff]  }
 0x124   : > { %4479 = vmatpush3.bf16.msra.mxu1 %v5801_v15  ;;  %4066 = vmatprep.subr.bf16.mxu0 %v7019_v1  ;;  %v7023_v15 = vld [vmem:[#allocation16_spill] sm:$0xff] }
 0x125   : > { %4480 = vmatprep.subr.bf16.mxu1 %v5811_v50  ;;  %2199 = vmatprep.mubr.bf16.mxu0 %v4735_v42  ;;  %v6160_v42 = vld [vmem:[%s6905_s1 + $0x30] sm:$0xff]   ;;  %v4744_v1 = vld [vmem:[%s5374_s29 + $0x1a8] ss:$52 sps:$4 sm:$0xff]  }
 0x126   : > { %4490 = vmatprep.mubr.bf16.mxu1 %v4736_v43  ;;  %v6167_v43 = vld [vmem:[%s6905_s1 + $0x78] sm:$0xff]  }
 0x127   : > { %4067 = vmatpush3.bf16.msra.mxu0 %v7020_v7  ;;  %v6176_v7 = vld [vmem:[%s6905_s1 + $0x38] sm:$0xff]  }
 0x128   : > { %4481 = vmatpush3.bf16.msra.mxu1 %v5811_v50  ;;  %4068 = vmatprep.subr.bf16.mxu0 %v7021_v17  ;;  %v7025_v50 = vld [vmem:[#allocation19_spill] sm:$0xff] }
 0x129   : > { %4482 = vmatprep.subr.bf16.mxu1 %v5822_v54  ;;  %v6183_v17 = vld [vmem:[%s6905_s1 + $0x140] sm:$0xff]  }
 0x12b   : > { %4069 = vmatpush3.bf16.msra.mxu0 %v7022_v63  ;;  %v6189_v63 = vld [vmem:[%s6905_s1 + $0x1c0] sm:$0xff]  }
 0x12c   : > { %4483 = vmatpush3.bf16.msra.mxu1 %v5822_v54  ;;  %4070 = vmatprep.subr.bf16.mxu0 %v7023_v15  ;;  %v4733_v54 = vld [vmem:[%s5374_s29 + $0xf8] ss:$52 sps:$4 sm:$0xff]   ;;  %7028 = vst [vmem:[#allocation18_spill] sm:$0xff] %v6189_v63 }
 0x12d   : > { %4484 = vmatprep.subr.bf16.mxu1 %v5832_v56  ;;  %v4747_v15 = vld [vmem:[%s5374_s29 + $0x20c] ss:$52 sps:$4 sm:$0xff]  }
 0x12f   : > { %4071 = vmatpush3.bf16.msra.mxu0 %v7024_v52  ;;  %v4749_v52 = vld [vmem:[%s5374_s29 + $0x214] ss:$52 sps:$4 sm:$0xff]  }
 0x130   : > { %4485 = vmatpush3.bf16.msra.mxu1 %v5832_v56  ;;  %4072 = vmatprep.subr.bf16.mxu0 %v7025_v50  ;;  %v6197_v50 = vld [vmem:[%s6905_s1 + $0x100] sm:$0xff]  }
 0x131   : > { %4486 = vmatprep.subr.bf16.mxu1 %v5841_v58 }
 0x133   : > { %4073 = vmatpush3.bf16.msra.mxu0 %v7026_v55  ;;  %v6203_v55 = vld [vmem:[%s6905_s1 + $0x180] sm:$0xff]  }
 0x134   : > { %4487 = vmatpush3.bf16.msra.mxu1 %v5841_v58  ;;  %4074 = vmatprep.subr.bf16.mxu0 %v7027_v62  ;;  %7029 = vst [vmem:[#allocation3_spill] sm:$0xff] %v6203_v55 }
 0x135   : > { %4488 = vmatprep.subr.bf16.mxu1 %v5850_v60 }
 0x137   : > { %4075 = vmatpush3.bf16.msra.mxu0 %v5772_v11  ;;  %v6070_v11 = vld [vmem:[%s6905_s1] sm:$0xff]  }
 0x138   : > { %4489 = vmatpush3.bf16.msra.mxu1 %v5850_v60  ;;  %4098 = vmatprep.subr.bf16.mxu0 %v6061_v4 }
 0x139   : > { %4126 = vmatprep.subr.bf16.mxu1 %v5863_v2 }
 0x13a   : > { %2200 = vmatmul.mubr.bf16.vlgmr.msra.gmra.mrb[44].mxu0 %v4733_v54  ;;  %v6209_v54 = vld [vmem:[%s6905_s1 + $0x148] sm:$0xff]  }
 0x13b   : > { %4491 = vmatmul.mubr.bf16.vlgmr.msra.gmra.mrb[48].mxu1 %v4737_v0  ;;  %4099 = vmatpush3.bf16.msra.mxu0 %v6070_v11  ;;  %v6215_v0 = vld [vmem:[%s6905_s1 + $0x1c8] sm:$0xff]  }
 0x13c   : > { %4127 = vmatpush3.bf16.msra.mxu1 %v5872_v8  ;;  %4100 = vmatprep.subr.bf16.mxu0 %v6077_v20  ;;  %7030 = vst [vmem:[#allocation20_spill] sm:$0xff] %v6215_v0 }
 0x13d   : > { %4128 = vmatprep.subr.bf16.mxu1 %v5879_v10  ;;  %2207 = vmatprep.mubr.bf16.mxu0 %v4738_v6 }
 0x13e   : > { %2511 = vmatprep.mubr.bf16.mxu1 %v4746_v12 }
 0x13f   : > { %4101 = vmatpush3.bf16.msra.mxu0 %v6085_v49 }
 0x140   : > { %4129 = vmatpush3.bf16.msra.mxu1 %v5887_v14  ;;  %4102 = vmatprep.subr.bf16.mxu0 %v6092_v53 }
 0x141   : > { %4130 = vmatprep.subr.bf16.mxu1 %v5895_v22 }
 0x142   : > { %2208 = vmatmul.mubr.bf16.gmra.mrb[48].mxu0 %v4740_v48 }
 0x143   : > { %4103 = vmatpush3.bf16.msra.mxu0 %v6100_v23  ;;  %2462 = vmatprep.mubr.bf16.mxu0 %v4743_v61 }
 0x144   : > { %4131 = vmatpush3.bf16.msra.mxu1 %v5902_v24  ;;  %4104 = vmatprep.subr.bf16.mxu0 %v6107_v31 }
 0x145   : > { %4132 = vmatprep.subr.bf16.mxu1 %v5909_v26 }
 0x147   : > { %4105 = vmatpush3.bf16.msra.mxu0 %v6116_v13 }
 0x148   : > { %4133 = vmatpush3.bf16.msra.mxu1 %v5916_v28  ;;  %4106 = vmatprep.subr.bf16.mxu0 %v6123_v16 }
 0x149   : > { %4134 = vmatprep.subr.bf16.mxu1 %v5923_v30 }
 0x14b   : > { %4107 = vmatpush3.bf16.msra.mxu0 %v6132_v46 }
 0x14c   : > { %4135 = vmatpush3.bf16.msra.mxu1 %v5930_v32  ;;  %4108 = vmatprep.subr.bf16.mxu0 %v6139_v47 }
 0x14d   : > { %v3758_v57 = vpop.f32.mrb[0].mxu0  ;;  %4136 = vmatprep.subr.bf16.mxu1 %v5937_v34 }
 0x14e   : > { %v3786_v21 = vpop.f32.mrb[0].mxu1  ;;  %v3759_v9 = vpop.f32.mrb[1].mxu0 }
 0x14f   : > { %v3760_v25 = vadd.f32 %v3759_v9, %v3758_v57  ;;  %v3787_v27 = vpop.f32.mrb[1].mxu1  ;;  %v3761_v29 = vpop.f32.mrb[2].mxu0  ;;  %4109 = vmatpush3.bf16.msra.mxu0 %v6146_v3 }
 0x150   : > { %v3788_v33 = vadd.f32 %v3787_v27, %v3786_v21  ;;  %v3789_v35 = vpop.f32.mrb[2].mxu1  ;;  %v3762_v37 = vpop.f32.mrb[3].mxu0  ;;  %4137 = vmatpush3.bf16.msra.mxu1 %v5944_v36  ;;  %4110 = vmatprep.subr.bf16.mxu0 %v6153_v5  ;;  %v4751_v27 = vld [vmem:[%s5374_s29 + $0x208] ss:$52 sps:$4 sm:$0xff]  }
 0x151   : > { %v3763_v39 = vadd.f32 %v3762_v37, %v3761_v29  ;;  %v3790_v41 = vpop.f32.mrb[3].mxu1  ;;  %4138 = vmatprep.subr.bf16.mxu1 %v5951_v38  ;;  %v4752_v29 = vld [vmem:[%s5374_s29 + $0x210] ss:$52 sps:$4 sm:$0xff]  }
 0x152   : > { %v6111_v45 = vadd.f32 %v3788_v33, %v3760_v25  ;;  %v3791_v51 = vadd.f32 %v3790_v41, %v3789_v35  ;;  %v6223_v33 = vld [vmem:[%s6905_s1 + $0x108] sm:$0xff]   ;;  %v6235_v41 = vld [vmem:[%s6905_s1 + $0x150] sm:$0xff]  }
 0x153   : > { %4111 = vmatpush3.bf16.msra.mxu0 %v6160_v42  ;;  %v6229_v35 = vld [vmem:[%s6905_s1 + $0x188] sm:$0xff]  }
 0x154   : > { %v6127_v18 = vadd.f32 %v3791_v51, %v3763_v39  ;;  %4139 = vmatpush3.bf16.msra.mxu1 %v5958_v40  ;;  %4112 = vmatprep.subr.bf16.mxu0 %v6167_v43  ;;  %7031 = vst [vmem:[#allocation4_spill] sm:$0xff] %v6229_v35 }
 0x155   : > { %4140 = vmatprep.subr.bf16.mxu1 %v5965_v44  ;;  %v3764_v62 = vpop.f32.mrb[4].mxu0 }
 0x156   : > { %v3792_v6 = vpop.f32.mrb[4].mxu1  ;;  %v3765_v12 = vpop.f32.mrb[5].mxu0 }
 0x157   : > { %4113 = vmatpush3.bf16.msra.mxu0 %v6176_v7  ;;  %v3766_v48 = vadd.f32 %v3765_v12, %v3764_v62  ;;  %v3793_v57 = vpop.f32.mrb[5].mxu1  ;;  %v3767_v61 = vpop.f32.mrb[6].mxu0  ;;  %v6259_v12 = vld [vmem:[%s6905_s1 + $0x190] sm:$0xff]  }
 0x158   : > { %4141 = vmatpush3.bf16.msra.mxu1 %v5974_v19  ;;  %4154 = vmatprep.subr.bf16.mxu0 %v6183_v17  ;;  %v3794_v21 = vadd.f32 %v3793_v57, %v3792_v6  ;;  %v3795_v9 = vpop.f32.mrb[6].mxu1  ;;  %v3768_v25 = vpop.f32.mrb[7].mxu0  ;;  %v6253_v6 = vld [vmem:[%s6905_s1 + $0x110] sm:$0xff]   ;;  %7033 = vst [vmem:[#allocation5_spill] sm:$0xff] %v6259_v12  ;;  %v6271_v57 = vld [vmem:[%s6905_s1 + $0x1d8] sm:$0xff]  }
 0x159   : > { %4182 = vmatprep.subr.bf16.mxu1 %v6189_v63  ;;  %v3769_v37 = vadd.f32 %v3768_v25, %v3767_v61  ;;  %v3796_v39 = vpop.f32.mrb[7].mxu1  ;;  %7034 = vst [vmem:[#allocation24_spill] sm:$0xff] %v6271_v57  ;;  %v6401_v63 = vld [vmem:[%s6905_s1 + $0x2c0] sm:$0xff]   ;;  %v4759_v19 = vld [vmem:[%s5374_s29 + $0x21c] ss:$52 sps:$4 sm:$0xff]  }
 0x15a   : > { %2463 = vmatmul.mubr.bf16.vlgmr.msra.gmra.mrb[52].mxu0 %v4741_v59  ;;  %v6238_v51 = vadd.f32 %v3794_v21, %v3766_v48  ;;  %v6243_v59 = vld [vmem:[%s6905_s1 + $0x1d0] sm:$0xff]   ;;  %v6265_v48 = vld [vmem:[%s6905_s1 + $0x158] sm:$0xff]   ;;  %7048 = vst [vmem:[#allocation21_spill] sm:$0xff] %v6401_v63 }
 0x15b   : > { %2512 = vmatmul.mubr.bf16.vlgmr.msra.gmra.mrb[52].mxu1 %v4744_v1  ;;  %4155 = vmatpush3.bf16.msra.mxu0 %v6197_v50  ;;  %7032 = vst [vmem:[#allocation22_spill] sm:$0xff] %v6243_v59  ;;  %v3797_v1 = vadd.f32 %v3796_v39, %v3795_v9  ;;  %v6277_v21 = vld [vmem:[%s6905_s1 + $0x118] sm:$0xff]  }
 0x15c   : > { %4183 = vmatpush3.bf16.msra.mxu1 %v6203_v55  ;;  %4156 = vmatprep.subr.bf16.mxu0 %v6209_v54  ;;  %v6283_v9 = vld [vmem:[%s6905_s1 + $0x198] sm:$0xff]  }
 0x15d   : > { %4184 = vmatprep.subr.bf16.mxu1 %v6215_v0  ;;  %2470 = vmatprep.mubr.bf16.mxu0 %v4747_v15  ;;  %v4755_v15 = vld [vmem:[%s5374_s29 + $0x1b4] ss:$52 sps:$4 sm:$0xff]   ;;  %v6248_v62 = vadd.f32 %v3797_v1, %v3769_v37  ;;  %7035 = vst [vmem:[#allocation6_spill] sm:$0xff] %v6283_v9  ;;  %v6295_v37 = vld [vmem:[%s6905_s1 + $0x1e0] sm:$0xff]   ;;  %v6383_v55 = vld [vmem:[%s6905_s1 + $0x138] sm:$0xff]  }
 0x15e   : > { %2519 = vmatprep.mubr.bf16.mxu1 %v4749_v52  ;;  %v4758_v52 = vld [vmem:[%s5374_s29 + $0x1bc] ss:$52 sps:$4 sm:$0xff]   ;;  %7036 = vst [vmem:[#allocation7_spill] sm:$0xff] %v6295_v37  ;;  %v6302_v0 = vld [vmem:[%s6905_s1 + $0x120] sm:$0xff]   ;;  %7045 = vst [vmem:[#allocation16_spill] sm:$0xff] %v6383_v55 }
 0x15f   : > { %4157 = vmatpush3.bf16.msra.mxu0 %v6223_v33 }
 0x160   : > { %4185 = vmatpush3.bf16.msra.mxu1 %v6229_v35  ;;  %4158 = vmatprep.subr.bf16.mxu0 %v6235_v41 }
 0x161   : > { %4186 = vmatprep.subr.bf16.mxu1 %v6243_v59 }
 0x162   : > { %2471 = vmatmul.mubr.bf16.gmra.mrb[56].mxu0 %v4751_v27 }
 0x163   : > { %2520 = vmatmul.mubr.bf16.gmra.mrb[56].mxu1 %v4752_v29  ;;  %4159 = vmatpush3.bf16.msra.mxu0 %v6253_v6  ;;  %v6289_v29 = vld [vmem:[%s6905_s1 + $0x160] sm:$0xff]  }
 0x164   : > { %4187 = vmatpush3.bf16.msra.mxu1 %v6259_v12  ;;  %4160 = vmatprep.subr.bf16.mxu0 %v6265_v48 }
 0x165   : > { %4188 = vmatprep.subr.bf16.mxu1 %v6271_v57  ;;  %2560 = vmatprep.mubr.bf16.mxu0 %v4755_v15 }
 0x166   : > { %2609 = vmatprep.mubr.bf16.mxu1 %v4758_v52 }
 0x167   : > { %4161 = vmatpush3.bf16.msra.mxu0 %v6277_v21 }
 0x168   : > { %4189 = vmatpush3.bf16.msra.mxu1 %v6283_v9  ;;  %4162 = vmatprep.subr.bf16.mxu0 %v6289_v29 }
 0x169   : > { %4190 = vmatprep.subr.bf16.mxu1 %v6295_v37 }
 0x16b   : > { %4163 = vmatpush3.bf16.msra.mxu0 %v6302_v0 }
 0x16d   : > { %v3814_v61 = vpop.f32.mrb[8].mxu0 }
 0x16e   : > { %v3815_v25 = vpop.f32.mrb[9].mxu0  ;;  %v3842_v27 = vpop.f32.mrb[8].mxu1 }
 0x16f   : > { %v3816_v39 = vadd.f32 %v3815_v25, %v3814_v61  ;;  %v3817_v1 = vpop.f32.mrb[10].mxu0  ;;  %v3843_v15 = vpop.f32.mrb[9].mxu1  ;;  %v6308_v61 = vld [vmem:[%s6905_s1 + $0x1a0] sm:$0xff]  }
 0x170   : > { %v3818_v52 = vpop.f32.mrb[11].mxu0  ;;  %v3844_v9 = vadd.f32 %v3843_v15, %v3842_v27  ;;  %v3845_v57 = vpop.f32.mrb[10].mxu1  ;;  %7037 = vst [vmem:[#allocation8_spill] sm:$0xff] %v6308_v61  ;;  %4191 = vmatpush3.bf16.msra.mxu1 %v6308_v61  ;;  %v6374_v61 = vld [vmem:[%s6905_s1 + $0x1f8] sm:$0xff]  }
 0x171   : > { %v1551_v12 = vadd.f32 %v3816_v39, %v6111_v45  ;;  %v3819_v59 = vadd.f32 %v3818_v52, %v3817_v1  ;;  %v3846_v35 = vpop.f32.mrb[11].mxu1  ;;  %v6314_v45 = vld [vmem:[%s6905_s1 + $0x168] sm:$0xff]   ;;  %7044 = vst [vmem:[#allocation15_spill] sm:$0xff] %v6374_v61 }
 0x172   : > { %v3847_v25 = vadd.f32 %v3846_v35, %v3845_v57  ;;  %4164 = vmatprep.subr.bf16.mxu0 %v6314_v45  ;;  %v6323_v1 = vld [vmem:[%s6905_s1 + $0x1e8] sm:$0xff]  }
 0x173   : > { %v1554_v27 = vadd.f32 %v3819_v59, %v6127_v18  ;;  %v6318_v39 = vadd.f32 %v3844_v9, %v1551_v12  ;;  %7038 = vst [vmem:[#allocation9_spill] sm:$0xff] %v6323_v1  ;;  %4192 = vmatprep.subr.bf16.mxu1 %v6323_v1  ;;  %v6331_v35 = vld [vmem:[%s6905_s1 + $0x128] sm:$0xff]   ;;  %v6343_v59 = vld [vmem:[%s6905_s1 + $0x170] sm:$0xff]  }
 0x174   : > { %4165 = vmatpush3.bf16.msra.mxu0 %v6331_v35  ;;  %v6337_v18 = vld [vmem:[%s6905_s1 + $0x1a8] sm:$0xff]   ;;  %v6349_v12 = vld [vmem:[%s6905_s1 + $0x1f0] sm:$0xff]  }
 0x175   : > { %v6326_v15 = vadd.f32 %v3847_v25, %v1554_v27  ;;  %7039 = vst [vmem:[#allocation10_spill] sm:$0xff] %v6337_v18  ;;  %4193 = vmatpush3.bf16.msra.mxu1 %v6337_v18  ;;  %4166 = vmatprep.subr.bf16.mxu0 %v6343_v59  ;;  %7040 = vst [vmem:[#allocation11_spill] sm:$0xff] %v6349_v12  ;;  %v3820_v57 = vpop.f32.mrb[12].mxu0  ;;  %v6355_v27 = vld [vmem:[%s6905_s1 + $0x130] sm:$0xff]  }
 0x176   : > { %4194 = vmatprep.subr.bf16.mxu1 %v6349_v12  ;;  %v3821_v9 = vpop.f32.mrb[13].mxu0  ;;  %7041 = vst [vmem:[#allocation12_spill] sm:$0xff] %v6355_v27  ;;  %v6361_v18 = vld [vmem:[%s6905_s1 + $0x1b0] sm:$0xff]   ;;  %v3848_v37 = vpop.f32.mrb[12].mxu1 }
 0x177   : > { %v3822_v52 = vadd.f32 %v3821_v9, %v3820_v57  ;;  %v3823_v25 = vpop.f32.mrb[14].mxu0  ;;  %7042 = vst [vmem:[#allocation13_spill] sm:$0xff] %v6361_v18  ;;  %v6368_v57 = vld [vmem:[%s6905_s1 + $0x178] sm:$0xff]  }
 0x178   : > { %4167 = vmatpush3.bf16.msra.mxu0 %v6355_v27  ;;  %v3824_v12 = vpop.f32.mrb[15].mxu0  ;;  %7043 = vst [vmem:[#allocation14_spill] sm:$0xff] %v6368_v57 }
 0x179   : > { %4195 = vmatpush3.bf16.msra.mxu1 %v6361_v18  ;;  %v1559_v1 = vadd.f32 %v3822_v52, %v6238_v51  ;;  %4168 = vmatprep.subr.bf16.mxu0 %v6368_v57  ;;  %v3825_v9 = vadd.f32 %v3824_v12, %v3823_v25  ;;  %v4753_v51 = vld [vmem:[%s5374_s29 + $0x1b0] ss:$52 sps:$4 sm:$0xff]   ;;  %v4756_v52 = vld [vmem:[%s5374_s29 + $0x1b8] ss:$52 sps:$4 sm:$0xff]   ;;  %v3849_v12 = vpop.f32.mrb[13].mxu1 }
 0x17a   : > { %4196 = vmatprep.subr.bf16.mxu1 %v6374_v61  ;;  %v6389_v25 = vld [vmem:[%s6905_s1 + $0x1b8] sm:$0xff]   ;;  %v3850_v61 = vadd.f32 %v3849_v12, %v3848_v37 }
 0x17b   : > { %v1562_v18 = vadd.f32 %v3825_v9, %v6248_v62  ;;  %7046 = vst [vmem:[#allocation17_spill] sm:$0xff] %v6389_v25  ;;  %v3851_v62 = vpop.f32.mrb[14].mxu1  ;;  %v6395_v9 = vld [vmem:[%s6905_s1 + $0x240] sm:$0xff]  }
 0x17c   : > { %4169 = vmatpush3.bf16.msra.mxu0 %v6383_v55  ;;  %7047 = vst [vmem:[#allocation19_spill] sm:$0xff] %v6395_v9  ;;  %v3852_v55 = vpop.f32.mrb[15].mxu1  ;;  %v4762_v57 = vld [vmem:[%s5374_s29 + $0x224] ss:$52 sps:$4 sm:$0xff]   ;;  %v6406_v37 = vadd.f32 %v3850_v61, %v1559_v1  ;;  %v6431_v1 = vld [vmem:[%s6905_s1 + $0x2c8] sm:$0xff]  }
 0x17d   : > { %4197 = vmatpush3.bf16.msra.mxu1 %v6389_v25  ;;  %4210 = vmatprep.subr.bf16.mxu0 %v6395_v9  ;;  %v3853_v12 = vadd.f32 %v3852_v55, %v3851_v62  ;;  %v6411_v25 = vld [vmem:[%s6905_s1 + $0x200] sm:$0xff]   ;;  %v6425_v55 = vld [vmem:[%s6905_s1 + $0x248] sm:$0xff]   ;;  %7052 = vst [vmem:[#allocation29_spill] sm:$0xff] %v6431_v1 }
 0x17e   : > { %4238 = vmatprep.subr.bf16.mxu1 %v6401_v63  ;;  %7049 = vst [vmem:[#allocation23_spill] sm:$0xff] %v6411_v25  ;;  %v6417_v63 = vld [vmem:[%s6905_s1 + $0x280] sm:$0xff]   ;;  %7051 = vst [vmem:[#allocation28_spill] sm:$0xff] %v6425_v55  ;;  %v6445_v62 = vld [vmem:[%s6905_s1 + $0x288] sm:$0xff]  }
 0x17f   : > { %2561 = vmatmul.mubr.bf16.vlgmr.msra.gmra.mrb[60].mxu0 %v4753_v51  ;;  %7050 = vst [vmem:[#allocation27_spill] sm:$0xff] %v6417_v63  ;;  %v6420_v61 = vadd.f32 %v3853_v12, %v1562_v18  ;;  %v4761_v18 = vld [vmem:[%s5374_s29 + $0x218] ss:$52 sps:$4 sm:$0xff]   ;;  %v4764_v51 = vld [vmem:[%s5374_s29 + $0x220] ss:$52 sps:$4 sm:$0xff]   ;;  %7054 = vst [vmem:[#allocation31_spill] sm:$0xff] %v6445_v62 }
 0x180   : > { %2610 = vmatmul.mubr.bf16.vlgmr.msra.gmra.mrb[60].mxu1 %v4756_v52  ;;  %4211 = vmatpush3.bf16.msra.mxu0 %v6411_v25  ;;  %v6439_v52 = vld [vmem:[%s6905_s1 + $0x208] sm:$0xff]   ;;  %v4767_v12 = vld [vmem:[%s5374_s29 + $0x1c4] ss:$52 sps:$4 sm:$0xff]  }
 0x181   : > { %4239 = vmatpush3.bf16.msra.mxu1 %v6417_v63  ;;  %4212 = vmatprep.subr.bf16.mxu0 %v6425_v55  ;;  %7053 = vst [vmem:[#allocation30_spill] sm:$0xff] %v6439_v52  ;;  %v6471_v63 = vld [vmem:[%s6905_s1 + $0x290] sm:$0xff]   ;;  %v6538_v25 = vld [vmem:[%s6905_s1 + $0x228] sm:$0xff]  }
 0x182   : > { %4240 = vmatprep.subr.bf16.mxu1 %v6431_v1  ;;  %2568 = vmatprep.mubr.bf16.mxu0 %v4759_v19  ;;  %v6451_v19 = vld [vmem:[%s6905_s1 + $0x250] sm:$0xff]   ;;  %v4770_v1 = vld [vmem:[%s5374_s29 + $0x1cc] ss:$52 sps:$4 sm:$0xff]   ;;  %7058 = vst [vmem:[#allocation35_spill] sm:$0xff] %v6471_v63  ;;  %7069 = vst [vmem:[#allocation46_spill] sm:$0xff] %v6538_v25 }
 0x183   : > { %2617 = vmatprep.mubr.bf16.mxu1 %v4762_v57  ;;  %7055 = vst [vmem:[#allocation32_spill] sm:$0xff] %v6451_v19  ;;  %v6457_v57 = vld [vmem:[%s6905_s1 + $0x2d0] sm:$0xff]  }
 0x184   : > { %4213 = vmatpush3.bf16.msra.mxu0 %v6439_v52  ;;  %7056 = vst [vmem:[#allocation33_spill] sm:$0xff] %v6457_v57 }
 0x185   : > { %4241 = vmatpush3.bf16.msra.mxu1 %v6445_v62  ;;  %4214 = vmatprep.subr.bf16.mxu0 %v6451_v19  ;;  %v6465_v62 = vld [vmem:[%s6905_s1 + $0x210] sm:$0xff]  }
 0x186   : > { %4242 = vmatprep.subr.bf16.mxu1 %v6457_v57  ;;  %7057 = vst [vmem:[#allocation34_spill] sm:$0xff] %v6465_v62  ;;  %v6477_v57 = vld [vmem:[%s6905_s1 + $0x258] sm:$0xff]  }
 0x187   : > { %2569 = vmatmul.mubr.bf16.gmra.mrb[64].mxu0 %v4761_v18  ;;  %7059 = vst [vmem:[#allocation36_spill] sm:$0xff] %v6477_v57  ;;  %v6483_v18 = vld [vmem:[%s6905_s1 + $0x2d8] sm:$0xff]  }
 0x188   : > { %2618 = vmatmul.mubr.bf16.gmra.mrb[64].mxu1 %v4764_v51  ;;  %4215 = vmatpush3.bf16.msra.mxu0 %v6465_v62  ;;  %7060 = vst [vmem:[#allocation37_spill] sm:$0xff] %v6483_v18  ;;  %v6489_v51 = vld [vmem:[%s6905_s1 + $0x218] sm:$0xff]  }
 0x189   : > { %4243 = vmatpush3.bf16.msra.mxu1 %v6471_v63  ;;  %4216 = vmatprep.subr.bf16.mxu0 %v6477_v57  ;;  %7061 = vst [vmem:[#allocation38_spill] sm:$0xff] %v6489_v51  ;;  %v6495_v63 = vld [vmem:[%s6905_s1 + $0x298] sm:$0xff]  }
 0x18a   : > { %4244 = vmatprep.subr.bf16.mxu1 %v6483_v18  ;;  %2658 = vmatprep.mubr.bf16.mxu0 %v4767_v12  ;;  %7062 = vst [vmem:[#allocation39_spill] sm:$0xff] %v6495_v63  ;;  %v6501_v18 = vld [vmem:[%s6905_s1 + $0x260] sm:$0xff]  }
 0x18b   : > { %2707 = vmatprep.mubr.bf16.mxu1 %v4770_v1  ;;  %7063 = vst [vmem:[#allocation40_spill] sm:$0xff] %v6501_v18  ;;  %v6507_v1 = vld [vmem:[%s6905_s1 + $0x2e0] sm:$0xff]  }
 0x18c   : > { %4217 = vmatpush3.bf16.msra.mxu0 %v6489_v51  ;;  %7064 = vst [vmem:[#allocation41_spill] sm:$0xff] %v6507_v1  ;;  %v6513_v12 = vld [vmem:[%s6905_s1 + $0x220] sm:$0xff]  }
 0x18d   : > { %4245 = vmatpush3.bf16.msra.mxu1 %v6495_v63  ;;  %4218 = vmatprep.subr.bf16.mxu0 %v6501_v18  ;;  %7065 = vst [vmem:[#allocation42_spill] sm:$0xff] %v6513_v12  ;;  %v3870_v63 = vpop.f32.mrb[16].mxu0  ;;  %v6519_v51 = vld [vmem:[%s6905_s1 + $0x2a0] sm:$0xff]  }
 0x18e   : > { %4246 = vmatprep.subr.bf16.mxu1 %v6507_v1  ;;  %7066 = vst [vmem:[#allocation43_spill] sm:$0xff] %v6519_v51  ;;  %v3871_v18 = vpop.f32.mrb[17].mxu0  ;;  %v6525_v1 = vld [vmem:[%s6905_s1 + $0x268] sm:$0xff]   ;;  %v3898_v19 = vpop.f32.mrb[16].mxu1 }
 0x18f   : > { %7067 = vst [vmem:[#allocation44_spill] sm:$0xff] %v6525_v1  ;;  %v3872_v57 = vadd.f32 %v3871_v18, %v3870_v63  ;;  %v3873_v62 = vpop.f32.mrb[18].mxu0  ;;  %v6544_v63 = vld [vmem:[%s6905_s1 + $0x2a8] sm:$0xff]  }
 0x190   : > { %4219 = vmatpush3.bf16.msra.mxu0 %v6513_v12  ;;  %v6531_v12 = vld [vmem:[%s6905_s1 + $0x2e8] sm:$0xff]   ;;  %v3874_v52 = vpop.f32.mrb[19].mxu0  ;;  %7070 = vst [vmem:[#allocation47_spill] sm:$0xff] %v6544_v63 }
 0x191   : > { %4247 = vmatpush3.bf16.msra.mxu1 %v6519_v51  ;;  %4220 = vmatprep.subr.bf16.mxu0 %v6525_v1  ;;  %7068 = vst [vmem:[#allocation45_spill] sm:$0xff] %v6531_v12  ;;  %v3899_v51 = vpop.f32.mrb[17].mxu1  ;;  %v1649_v55 = vadd.f32 %v3872_v57, %v6318_v39  ;;  %v3875_v1 = vadd.f32 %v3874_v52, %v3873_v62  ;;  %v6550_v39 = vld [vmem:[%s6905_s1 + $0x270] sm:$0xff]  }
 0x192   : > { %4248 = vmatprep.subr.bf16.mxu1 %v6531_v12  ;;  %v3900_v9 = vadd.f32 %v3899_v51, %v3898_v19  ;;  %v3901_v44 = vpop.f32.mrb[18].mxu1  ;;  %7071 = vst [vmem:[#allocation48_spill] sm:$0xff] %v6550_v39  ;;  %v6556_v52 = vld [vmem:[%s6905_s1 + $0x2f0] sm:$0xff]  }
 0x193   : > { %v3902_v18 = vpop.f32.mrb[19].mxu1  ;;  %7072 = vst [vmem:[#allocation49_spill] sm:$0xff] %v6556_v52  ;;  %v1652_v62 = vadd.f32 %v3875_v1, %v6326_v15  ;;  %v6565_v51 = vld [vmem:[%s6905_s1 + $0x230] sm:$0xff]  }
 0x194   : > { %4221 = vmatpush3.bf16.msra.mxu0 %v6538_v25  ;;  %v3903_v19 = vadd.f32 %v3902_v18, %v3901_v44  ;;  %v6560_v57 = vadd.f32 %v3900_v9, %v1649_v55  ;;  %7073 = vst [vmem:[#allocation50_spill] sm:$0xff] %v6565_v51  ;;  %v6571_v12 = vld [vmem:[%s6905_s1 + $0x2b0] sm:$0xff]   ;;  %v6579_v9 = vld [vmem:[%s6905_s1 + $0x278] sm:$0xff]  }
 0x195   : > { %4249 = vmatpush3.bf16.msra.mxu1 %v6544_v63  ;;  %4222 = vmatprep.subr.bf16.mxu0 %v6550_v39  ;;  %v3876_v63 = vpop.f32.mrb[20].mxu0  ;;  %7074 = vst [vmem:[#allocation51_spill] sm:$0xff] %v6571_v12  ;;  %7075 = vst [vmem:[#allocation52_spill] sm:$0xff] %v6579_v9  ;;  %v6585_v55 = vld [vmem:[%s6905_s1 + $0x2f8] sm:$0xff]  }
 0x196   : > { %4250 = vmatprep.subr.bf16.mxu1 %v6556_v52  ;;  %v6574_v44 = vadd.f32 %v3903_v19, %v1652_v62  ;;  %v3877_v15 = vpop.f32.mrb[21].mxu0  ;;  %7076 = vst [vmem:[#allocation53_spill] sm:$0xff] %v6585_v55  ;;  %v4765_v52 = vld [vmem:[%s5374_s29 + $0x1c0] ss:$52 sps:$4 sm:$0xff]  }
 0x197   : > { %v3878_v1 = vadd.f32 %v3877_v15, %v3876_v63  ;;  %v3879_v18 = vpop.f32.mrb[22].mxu0  ;;  %v6600_v15 = vld [vmem:[%s6905_s1 + $0x2b8] sm:$0xff]  }
 0x198   : > { %4223 = vmatpush3.bf16.msra.mxu0 %v6565_v51  ;;  %v3880_v62 = vpop.f32.mrb[23].mxu0  ;;  %v4768_v51 = vld [vmem:[%s5374_s29 + $0x1c8] ss:$52 sps:$4 sm:$0xff]   ;;  %7077 = vst [vmem:[#allocation54_spill] sm:$0xff] %v6600_v15 }
 0x199   : > { %4251 = vmatpush3.bf16.msra.mxu1 %v6571_v12  ;;  %4224 = vmatprep.subr.bf16.mxu0 %v6579_v9  ;;  %v3904_v12 = vpop.f32.mrb[20].mxu1  ;;  %v1657_v39 = vadd.f32 %v3878_v1, %v6406_v37  ;;  %v6594_v9 = vld [vmem:[%s6905_s1 + $0x238] sm:$0xff]   ;;  %v3881_v25 = vadd.f32 %v3880_v62, %v3879_v18  ;;  %v6606_v37 = vld [vmem:[%s6905_s1 + $0x300] sm:$0xff]   ;;  %v4774_v62 = vld [vmem:[%s5374_s29 + $0x234] ss:$52 sps:$4 sm:$0xff]  }
 0x19a   : > { %4252 = vmatprep.subr.bf16.mxu1 %v6585_v55  ;;  %v3905_v19 = vpop.f32.mrb[21].mxu1  ;;  %v4771_v18 = vld [vmem:[%s5374_s29 + $0x22c] ss:$52 sps:$4 sm:$0xff]  }
 0x19b   : > { %v3906_v55 = vadd.f32 %v3905_v19, %v3904_v12  ;;  %v3907_v63 = vpop.f32.mrb[22].mxu1  ;;  %v1660_v12 = vadd.f32 %v3881_v25, %v6420_v61  ;;  %v4776_v25 = vld [vmem:[%s5374_s29 + $0x230] ss:$52 sps:$4 sm:$0xff]  }
 0x19c   : > { %4225 = vmatpush3.bf16.msra.mxu0 %v6594_v9  ;;  %v3908_v27 = vpop.f32.mrb[23].mxu1  ;;  %v4777_v61 = vld [vmem:[%s5374_s29 + $0x1d0] ss:$52 sps:$4 sm:$0xff]  }
 0x19d   : > { %4253 = vmatpush3.bf16.msra.mxu1 %v6600_v15  ;;  %4494 = vmatprep.subr.bf16.mxu0 %v6606_v37  ;;  %v3909_v1 = vadd.f32 %v3908_v27, %v3907_v63  ;;  %v1706_v19 = vadd.f32 %v3906_v55, %v1657_v39  ;;  %v4773_v27 = vld [vmem:[%s5374_s29 + $0x228] ss:$52 sps:$4 sm:$0xff]  }
 0x19e   : > { %4276 = vmatprep.subr.bf16.mxu1 %v6061_v4  ;;  %v6618_v4 = vld [vmem:[%s6905_s1 + $0x308] sm:$0xff]  }
 0x19f   : > { %2659 = vmatmul.mubr.bf16.vlgmr.msra.gmra.mrb[68].mxu0 %v4765_v52  ;;  %v1709_v15 = vadd.f32 %v3909_v1, %v1660_v12  ;;  %v4781_v39 = vld [vmem:[%s5374_s29 + $0x274] ss:$52 sps:$4 sm:$0xff]  }
 0x1a0   : > { %2708 = vmatmul.mubr.bf16.vlgmr.msra.gmra.mrb[68].mxu1 %v4768_v51  ;;  %4495 = vmatpush3.bf16.msra.mxu0 %v6606_v37 }
 0x1a1   : > { %4277 = vmatpush3.bf16.msra.mxu1 %v6070_v11  ;;  %4496 = vmatprep.subr.bf16.mxu0 %v6618_v4  ;;  %v6629_v11 = vld [vmem:[%s6905_s1 + $0x310] sm:$0xff]  }
 0x1a2   : > { %4278 = vmatprep.subr.bf16.mxu1 %v6077_v20  ;;  %2666 = vmatprep.mubr.bf16.mxu0 %v4771_v18  ;;  %v6640_v20 = vld [vmem:[%s6905_s1 + $0x318] sm:$0xff]  }
 0x1a3   : > { %2715 = vmatprep.mubr.bf16.mxu1 %v4774_v62 }
 0x1a4   : > { %4497 = vmatpush3.bf16.msra.mxu0 %v6618_v4 }
 0x1a5   : > { %4279 = vmatpush3.bf16.msra.mxu1 %v6085_v49  ;;  %4498 = vmatprep.subr.bf16.mxu0 %v6629_v11  ;;  %v6649_v49 = vld [vmem:[%s6905_s1 + $0x320] sm:$0xff]  }
 0x1a6   : > { %4280 = vmatprep.subr.bf16.mxu1 %v6092_v53 }
 0x1a7   : > { %2667 = vmatmul.mubr.bf16.gmra.mrb[72].mxu0 %v4773_v27  ;;  %v4787_v27 = vld [vmem:[%s5374_s29 + $0x27c] ss:$52 sps:$4 sm:$0xff]  }
 0x1a8   : > { %2716 = vmatmul.mubr.bf16.gmra.mrb[72].mxu1 %v4776_v25  ;;  %4499 = vmatpush3.bf16.msra.mxu0 %v6629_v11 }
 0x1a9   : > { %4281 = vmatpush3.bf16.msra.mxu1 %v6100_v23  ;;  %4500 = vmatprep.subr.bf16.mxu0 %v6640_v20 }
 0x1aa   : > { %4282 = vmatprep.subr.bf16.mxu1 %v6107_v31  ;;  %4510 = vmatprep.mubr.bf16.mxu0 %v4777_v61  ;;  %v7081_v61 = vld [vmem:[#allocation26_spill] sm:$0xff] }
 0x1ab   : > { %2970 = vmatprep.mubr.bf16.mxu1 %v4781_v39 }
 0x1ac   : > { %4501 = vmatpush3.bf16.msra.mxu0 %v6640_v20 }
 0x1ad   : > { %4283 = vmatpush3.bf16.msra.mxu1 %v6116_v13  ;;  %4502 = vmatprep.subr.bf16.mxu0 %v6649_v49  ;;  %v4472_v53 = vpop.f32.mrb[24].mxu0 }
 0x1ae   : > { %4284 = vmatprep.subr.bf16.mxu1 %v6123_v16  ;;  %v3936_v23 = vpop.f32.mrb[24].mxu1  ;;  %v6657_v31 = vadd.f32 %v4472_v53, %v1706_v19  ;;  %v1746_v13 = vpop.f32.mrb[25].mxu0  ;;  %v6665_v16 = vld [vmem:[%s6905_s1 + $0x328] sm:$0xff]  }
 0x1af   : > { %v3937_v52 = vpop.f32.mrb[25].mxu1  ;;  %v6660_v51 = vadd.f32 %v1746_v13, %v6560_v57  ;;  %v4473_v55 = vpop.f32.mrb[26].mxu0  ;;  %v7082_v53 = vld [vmem:[#allocation16_spill] sm:$0xff] }
 0x1b0   : > { %4503 = vmatpush3.bf16.msra.mxu0 %v6649_v49  ;;  %v1749_v63 = vpop.f32.mrb[27].mxu0 }
 0x1b1   : > { %4285 = vmatpush3.bf16.msra.mxu1 %v6132_v46  ;;  %4504 = vmatprep.subr.bf16.mxu0 %v5832_v56  ;;  %v6669_v56 = vadd.f32 %v3937_v52, %v3936_v23  ;;  %v3939_v46 = vpop.f32.mrb[26].mxu1  ;;  %v6676_v12 = vadd.f32 %v1749_v63, %v6574_v44  ;;  %v4779_v44 = vld [vmem:[%s5374_s29 + $0x270] ss:$52 sps:$4 sm:$0xff]   ;;  %v7083_v52 = vld [vmem:[#allocation18_spill] sm:$0xff] }
 0x1b2   : > { %4286 = vmatprep.subr.bf16.mxu1 %v6139_v47  ;;  %v6671_v47 = vadd.f32 %v4473_v55, %v1709_v15  ;;  %v3940_v57 = vpop.f32.mrb[27].mxu1  ;;  %v7084_v55 = vld [vmem:[#allocation19_spill] sm:$0xff] }
 0x1b3   : > { %v6678_v1 = vadd.f32 %v3940_v57, %v3939_v46  ;;  %v4791_v57 = vld [vmem:[%s5374_s29 + $0x2e4] ss:$52 sps:$4 sm:$0xff]  }
 0x1b4   : > { %4505 = vmatpush3.bf16.msra.mxu0 %v6665_v16 }
 0x1b5   : > { %4287 = vmatpush3.bf16.msra.mxu1 %v6146_v3  ;;  %4506 = vmatprep.subr.bf16.mxu0 %v5841_v58  ;;  %v6683_v3 = vld [vmem:[%s6905_s1 + $0x330] sm:$0xff]  }
 0x1b6   : > { %4288 = vmatprep.subr.bf16.mxu1 %v6153_v5  ;;  %v3942_v58 = vpop.f32.mrb[28].mxu1  ;;  %v4778_v5 = vld [vmem:[%s5374_s29 + $0x238] ss:$52 sps:$4 sm:$0xff]  }
 0x1b7   : > { %v3943_v15 = vpop.f32.mrb[29].mxu1 }
 0x1b8   : > { %4507 = vmatpush3.bf16.msra.mxu0 %v6683_v3  ;;  %v6693_v18 = vadd.f32 %v3943_v15, %v3942_v58  ;;  %v3945_v62 = vpop.f32.mrb[30].mxu1  ;;  %v7086_v15 = vld [vmem:[#allocation23_spill] sm:$0xff] }
 0x1b9   : > { %4289 = vmatpush3.bf16.msra.mxu1 %v6160_v42  ;;  %4508 = vmatprep.subr.bf16.mxu0 %v5850_v60  ;;  %v3946_v42 = vpop.f32.mrb[31].mxu1 }
 0x1ba   : > { %4290 = vmatprep.subr.bf16.mxu1 %v6167_v43  ;;  %v6697_v19 = vadd.f32 %v3946_v42, %v3945_v62  ;;  %v4782_v43 = vld [vmem:[%s5374_s29 + $0x2dc] ss:$52 sps:$4 sm:$0xff]   ;;  %v7087_v62 = vld [vmem:[#allocation20_spill] sm:$0xff] }
 0x1bc   : > { %4509 = vmatpush3.bf16.msra.mxu0 %v5850_v60  ;;  %v4784_v60 = vld [vmem:[%s5374_s29 + $0x2d8] ss:$52 sps:$4 sm:$0xff]  }
 0x1bd   : > { %4291 = vmatpush3.bf16.msra.mxu1 %v6176_v7  ;;  %4304 = vmatprep.subr.bf16.mxu0 %v5863_v2  ;;  %v4790_v2 = vld [vmem:[%s5374_s29 + $0x284] ss:$52 sps:$4 sm:$0xff]  }
 0x1be   : > { %4332 = vmatprep.subr.bf16.mxu1 %v6183_v17 }
 0x1bf   : > { %4511 = vmatmul.mubr.bf16.vlgmr.msra.gmra.mrb[76].mxu0 %v4778_v5 }
 0x1c0   : > { %2971 = vmatmul.mubr.bf16.vlgmr.msra.gmra.mrb[76].mxu1 %v4779_v44  ;;  %4305 = vmatpush3.bf16.msra.mxu0 %v5872_v8  ;;  %v7085_v44 = vld [vmem:[#allocation3_spill] sm:$0xff] }
 0x1c1   : > { %4333 = vmatpush3.bf16.msra.mxu1 %v6197_v50  ;;  %4306 = vmatprep.subr.bf16.mxu0 %v5879_v10 }
 0x1c2   : > { %4334 = vmatprep.subr.bf16.mxu1 %v6209_v54  ;;  %2978 = vmatprep.mubr.bf16.mxu1 %v4782_v43  ;;  %v4793_v43 = vld [vmem:[%s5374_s29 + $0x2e0] ss:$52 sps:$4 sm:$0xff]  }
 0x1c3   : > { %3019 = vmatprep.mubr.bf16.mxu0 %v4787_v27  ;;  %v4796_v27 = vld [vmem:[%s5374_s29 + $0x2e8] ss:$52 sps:$4 sm:$0xff]  }
 0x1c4   : > { %4307 = vmatpush3.bf16.msra.mxu0 %v5887_v14 }
 0x1c5   : > { %4335 = vmatpush3.bf16.msra.mxu1 %v6223_v33  ;;  %4308 = vmatprep.subr.bf16.mxu0 %v5895_v22  ;;  %v7079_v33 = vld [vmem:[#allocation25_spill] sm:$0xff] }
 0x1c6   : > { %4336 = vmatprep.subr.bf16.mxu1 %v6235_v41  ;;  %v7080_v41 = vld [vmem:[#allocation14_spill] sm:$0xff] }
 0x1c8   : > { %2979 = vmatmul.mubr.bf16.gmra.mrb[80].mxu1 %v4784_v60  ;;  %4309 = vmatpush3.bf16.msra.mxu0 %v5902_v24  ;;  %v7089_v60 = vld [vmem:[#allocation4_spill] sm:$0xff] }
 0x1c9   : > { %4337 = vmatpush3.bf16.msra.mxu1 %v6253_v6  ;;  %4310 = vmatprep.subr.bf16.mxu0 %v5909_v26 }
 0x1ca   : > { %4338 = vmatprep.subr.bf16.mxu1 %v6265_v48  ;;  %3068 = vmatprep.mubr.bf16.mxu1 %v4790_v2  ;;  %v7091_v2 = vld [vmem:[#allocation22_spill] sm:$0xff] }
 0x1cc   : > { %4311 = vmatpush3.bf16.msra.mxu0 %v5916_v28 }
 0x1cd   : > { %4339 = vmatpush3.bf16.msra.mxu1 %v6277_v21  ;;  %4312 = vmatprep.subr.bf16.mxu0 %v5923_v30  ;;  %v3964_v8 = vpop.f32.mrb[28].mxu0 }
 0x1ce   : > { %4340 = vmatprep.subr.bf16.mxu1 %v6289_v29  ;;  %v3992_v10 = vpop.f32.mrb[32].mxu1  ;;  %v3965_v14 = vpop.f32.mrb[29].mxu0 }
 0x1cf   : > { %v3993_v22 = vpop.f32.mrb[33].mxu1  ;;  %v3966_v24 = vadd.f32 %v3965_v14, %v3964_v8  ;;  %v3967_v26 = vpop.f32.mrb[30].mxu0  ;;  %v7092_v8 = vld [vmem:[#allocation32_spill] sm:$0xff] }
 0x1d0   : > { %4313 = vmatpush3.bf16.msra.mxu0 %v5930_v32  ;;  %v3994_v28 = vadd.f32 %v3993_v22, %v3992_v10  ;;  %v3995_v30 = vpop.f32.mrb[34].mxu1  ;;  %v3968_v7 = vpop.f32.mrb[31].mxu0  ;;  %v4799_v10 = vld [vmem:[%s5374_s29 + $0x28c] ss:$52 sps:$4 sm:$0xff]   ;;  %v4802_v14 = vld [vmem:[%s5374_s29 + $0x294] ss:$52 sps:$4 sm:$0xff]  }
 0x1d1   : > { %4341 = vmatpush3.bf16.msra.mxu1 %v6302_v0  ;;  %4314 = vmatprep.subr.bf16.mxu0 %v5937_v34  ;;  %v3996_v32 = vpop.f32.mrb[35].mxu1  ;;  %v2006_v34 = vadd.f32 %v3966_v24, %v6669_v56  ;;  %v3969_v17 = vadd.f32 %v3968_v7, %v3967_v26  ;;  %v7093_v22 = vld [vmem:[#allocation5_spill] sm:$0xff]  ;;  %v7094_v24 = vld [vmem:[#allocation34_spill] sm:$0xff]  ;;  %v7095_v26 = vld [vmem:[#allocation24_spill] sm:$0xff] }
 0x1d2   : > { %4342 = vmatprep.subr.bf16.mxu1 %v6314_v45  ;;  %v3997_v50 = vadd.f32 %v3996_v32, %v3995_v30  ;;  %v4785_v45 = vld [vmem:[%s5374_s29 + $0x278] ss:$52 sps:$4 sm:$0xff]   ;;  %v7099_v32 = vld [vmem:[#allocation7_spill] sm:$0xff] }
 0x1d3   : > { %v2009_v54 = vadd.f32 %v3969_v17, %v6678_v1  ;;  %v6729_v0 = vadd.f32 %v3994_v28, %v2006_v34  ;;  %v4794_v1 = vld [vmem:[%s5374_s29 + $0x2ec] ss:$52 sps:$4 sm:$0xff]   ;;  %v7097_v30 = vld [vmem:[#allocation6_spill] sm:$0xff] }
 0x1d4   : > { %4315 = vmatpush3.bf16.msra.mxu0 %v5944_v36  ;;  %v7078_v36 = vld [vmem:[#allocation12_spill] sm:$0xff]  ;;  %v7098_v7 = vld [vmem:[#allocation38_spill] sm:$0xff] }
 0x1d5   : > { %4343 = vmatpush3.bf16.msra.mxu1 %v6331_v35  ;;  %4316 = vmatprep.subr.bf16.mxu0 %v5951_v38  ;;  %v6735_v38 = vadd.f32 %v3997_v50, %v2009_v54  ;;  %v3970_v6 = vpop.f32.mrb[32].mxu0  ;;  %v4788_v35 = vld [vmem:[%s5374_s29 + $0x280] ss:$52 sps:$4 sm:$0xff]   ;;  %v7096_v28 = vld [vmem:[#allocation36_spill] sm:$0xff]  ;;  %v7102_v50 = vld [vmem:[#allocation42_spill] sm:$0xff] }
 0x1d6   : > { %4344 = vmatprep.subr.bf16.mxu1 %v6343_v59  ;;  %v3998_v48 = vpop.f32.mrb[36].mxu1  ;;  %v3971_v21 = vpop.f32.mrb[33].mxu0  ;;  %v7100_v34 = vld [vmem:[#allocation40_spill] sm:$0xff]  ;;  %v7103_v54 = vld [vmem:[#allocation9_spill] sm:$0xff] }
 0x1d7   : > { %v3999_v29 = vpop.f32.mrb[37].mxu1  ;;  %v3972_v59 = vadd.f32 %v3971_v21, %v3970_v6  ;;  %v3973_v25 = vpop.f32.mrb[34].mxu0  ;;  %v7101_v17 = vld [vmem:[#allocation8_spill] sm:$0xff] }
 0x1d8   : > { %4317 = vmatpush3.bf16.msra.mxu0 %v5958_v40  ;;  %v4000_v40 = vadd.f32 %v3999_v29, %v3998_v48  ;;  %v4001_v39 = vpop.f32.mrb[38].mxu1  ;;  %v3974_v23 = vpop.f32.mrb[35].mxu0 }
 0x1d9   : > { %4345 = vmatpush3.bf16.msra.mxu1 %v7078_v36  ;;  %4318 = vmatprep.subr.bf16.mxu0 %v7079_v33  ;;  %v4002_v13 = vpop.f32.mrb[39].mxu1  ;;  %v2014_v56 = vadd.f32 %v3972_v59, %v6693_v18  ;;  %v3975_v46 = vadd.f32 %v3974_v23, %v3973_v25  ;;  %v7088_v18 = vld [vmem:[#allocation28_spill] sm:$0xff]  ;;  %v7106_v25 = vld [vmem:[#allocation46_spill] sm:$0xff] }
 0x1da   : > { %4346 = vmatprep.subr.bf16.mxu1 %v7080_v41  ;;  %v4003_v63 = vadd.f32 %v4002_v13, %v4001_v39  ;;  %v7104_v36 = vld [vmem:[#allocation44_spill] sm:$0xff]  ;;  %v7107_v39 = vld [vmem:[#allocation11_spill] sm:$0xff] }
 0x1db   : > { %v2017_v58 = vadd.f32 %v3975_v46, %v6697_v19  ;;  %v6747_v5 = vadd.f32 %v4000_v40, %v2014_v56  ;;  %v7090_v19 = vld [vmem:[#allocation30_spill] sm:$0xff]  ;;  %v7109_v46 = vld [vmem:[#allocation13_spill] sm:$0xff] }
 0x1dc   : > { %4319 = vmatpush3.bf16.msra.mxu0 %v7081_v61 }
 0x1dd   : > { %4347 = vmatpush3.bf16.msra.mxu1 %v7082_v53  ;;  %4360 = vmatprep.subr.bf16.mxu0 %v7083_v52  ;;  %v6753_v42 = vadd.f32 %v4003_v63, %v2017_v58  ;;  %v7108_v53 = vld [vmem:[#allocation48_spill] sm:$0xff]  ;;  %v7110_v63 = vld [vmem:[#allocation50_spill] sm:$0xff] }
 0x1de   : > { %4388 = vmatprep.subr.bf16.mxu1 %v7084_v55 }
 0x1df   : > { %3020 = vmatmul.mubr.bf16.vlgmr.msra.gmra.mrb[80].mxu0 %v4785_v45  ;;  %v7105_v45 = vld [vmem:[#allocation10_spill] sm:$0xff] }
 0x1e0   : > { %3069 = vmatmul.mubr.bf16.vlgmr.msra.gmra.mrb[84].mxu1 %v4788_v35  ;;  %4361 = vmatpush3.bf16.msra.mxu0 %v7085_v44 }
 0x1e1   : > { %4389 = vmatpush3.bf16.msra.mxu1 %v7086_v15  ;;  %4362 = vmatprep.subr.bf16.mxu0 %v7087_v62 }
 0x1e2   : > { %4390 = vmatprep.subr.bf16.mxu1 %v7088_v18  ;;  %3027 = vmatprep.mubr.bf16.mxu0 %v4791_v57  ;;  %v7111_v57 = vld [vmem:[#allocation15_spill] sm:$0xff]  ;;  %v4797_v18 = vld [vmem:[%s5374_s29 + $0x288] ss:$52 sps:$4 sm:$0xff]  }
 0x1e3   : > { %3076 = vmatprep.mubr.bf16.mxu1 %v4794_v1  ;;  %v7112_v1 = vld [vmem:[#allocation52_spill] sm:$0xff] }
 0x1e4   : > { %4363 = vmatpush3.bf16.msra.mxu0 %v7089_v60  ;;  %v7113_v60 = vld [vmem:[#allocation17_spill] sm:$0xff] }
 0x1e5   : > { %4391 = vmatpush3.bf16.msra.mxu1 %v7090_v19  ;;  %4364 = vmatprep.subr.bf16.mxu0 %v7091_v2 }
 0x1e6   : > { %4392 = vmatprep.subr.bf16.mxu1 %v7092_v8 }
 0x1e7   : > { %3028 = vmatmul.mubr.bf16.gmra.mrb[84].mxu0 %v4793_v43 }
 0x1e8   : > { %3077 = vmatmul.mubr.bf16.gmra.mrb[88].mxu1 %v4796_v27  ;;  %4365 = vmatpush3.bf16.msra.mxu0 %v7093_v22  ;;  %v4803_v22 = vld [vmem:[%s5374_s29 + $0x2f4] ss:$52 sps:$4 sm:$0xff]  }
 0x1e9   : > { %4393 = vmatpush3.bf16.msra.mxu1 %v7094_v24  ;;  %4366 = vmatprep.subr.bf16.mxu0 %v7095_v26 }
 0x1ea   : > { %4394 = vmatprep.subr.bf16.mxu1 %v7096_v28  ;;  %3117 = vmatprep.mubr.bf16.mxu0 %v4799_v10 }
 0x1eb   : > { %3166 = vmatprep.mubr.bf16.mxu1 %v4802_v14  ;;  %v7114_v14 = vld [vmem:[#allocation21_spill] sm:$0xff] }
 0x1ec   : > { %4367 = vmatpush3.bf16.msra.mxu0 %v7097_v30  ;;  %v4806_v30 = vld [vmem:[%s5374_s29 + $0x2fc] ss:$52 sps:$4 sm:$0xff]  }
 0x1ed   : > { %4395 = vmatpush3.bf16.msra.mxu1 %v7098_v7  ;;  %4368 = vmatprep.subr.bf16.mxu0 %v7099_v32  ;;  %v4020_v33 = vpop.f32.mrb[36].mxu0  ;;  %v7115_v32 = vld [vmem:[#allocation27_spill] sm:$0xff] }
 0x1ee   : > { %4396 = vmatprep.subr.bf16.mxu1 %v7100_v34  ;;  %v4048_v41 = vpop.f32.mrb[40].mxu1  ;;  %v4021_v6 = vpop.f32.mrb[37].mxu0  ;;  %v7116_v34 = vld [vmem:[#allocation29_spill] sm:$0xff] }
 0x1ef   : > { %v4049_v48 = vpop.f32.mrb[41].mxu1  ;;  %v4022_v21 = vadd.f32 %v4021_v6, %v4020_v33  ;;  %v4023_v29 = vpop.f32.mrb[38].mxu0  ;;  %v7119_v33 = vld [vmem:[#allocation35_spill] sm:$0xff] }
 0x1f0   : > { %4369 = vmatpush3.bf16.msra.mxu0 %v7101_v17  ;;  %v4050_v35 = vadd.f32 %v4049_v48, %v4048_v41  ;;  %v4051_v59 = vpop.f32.mrb[42].mxu1  ;;  %v4024_v61 = vpop.f32.mrb[39].mxu0  ;;  %v4805_v17 = vld [vmem:[%s5374_s29 + $0x2f0] ss:$52 sps:$4 sm:$0xff]  }
 0x1f1   : > { %4397 = vmatpush3.bf16.msra.mxu1 %v7102_v50  ;;  %4370 = vmatprep.subr.bf16.mxu0 %v7103_v54  ;;  %v4052_v40 = vpop.f32.mrb[43].mxu1  ;;  %v2104_v23 = vadd.f32 %v4022_v21, %v6729_v0  ;;  %v4025_v13 = vadd.f32 %v4024_v61, %v4023_v29  ;;  %v4808_v50 = vld [vmem:[%s5374_s29 + $0x2f8] ss:$52 sps:$4 sm:$0xff]   ;;  %v7117_v54 = vld [vmem:[#allocation31_spill] sm:$0xff]  ;;  %v7120_v41 = vld [vmem:[#allocation37_spill] sm:$0xff] }
 0x1f2   : > { %4398 = vmatprep.subr.bf16.mxu1 %v7104_v36  ;;  %v4053_v52 = vadd.f32 %v4052_v40, %v4051_v59  ;;  %v4811_v36 = vld [vmem:[%s5374_s29 + $0x29c] ss:$52 sps:$4 sm:$0xff]   ;;  %v7121_v6 = vld [vmem:[#allocation39_spill] sm:$0xff] }
 0x1f3   : > { %v2107_v55 = vadd.f32 %v4025_v13, %v6735_v38  ;;  %v6781_v56 = vadd.f32 %v4050_v35, %v2104_v23  ;;  %v4800_v38 = vld [vmem:[%s5374_s29 + $0x290] ss:$52 sps:$4 sm:$0xff]  }
 0x1f4   : > { %4371 = vmatpush3.bf16.msra.mxu0 %v7105_v45  ;;  %v7123_v48 = vld [vmem:[#allocation43_spill] sm:$0xff]  ;;  %v7124_v21 = vld [vmem:[#allocation45_spill] sm:$0xff] }
 0x1f5   : > { %4399 = vmatpush3.bf16.msra.mxu1 %v7106_v25  ;;  %4372 = vmatprep.subr.bf16.mxu0 %v7107_v39  ;;  %v6787_v58 = vadd.f32 %v4053_v52, %v2107_v55  ;;  %v4026_v44 = vpop.f32.mrb[40].mxu0  ;;  %v7125_v61 = vld [vmem:[#allocation47_spill] sm:$0xff]  ;;  %v7126_v39 = vld [vmem:[#allocation49_spill] sm:$0xff] }
 0x1f6   : > { %4400 = vmatprep.subr.bf16.mxu1 %v7108_v53  ;;  %v4054_v15 = vpop.f32.mrb[44].mxu1  ;;  %v4027_v0 = vpop.f32.mrb[41].mxu0  ;;  %v7127_v52 = vld [vmem:[#allocation51_spill] sm:$0xff] }
 0x1f7   : > { %v4055_v62 = vpop.f32.mrb[45].mxu1  ;;  %v4028_v43 = vadd.f32 %v4027_v0, %v4026_v44  ;;  %v4029_v27 = vpop.f32.mrb[42].mxu0  ;;  %v4809_v44 = vld [vmem:[%s5374_s29 + $0x298] ss:$52 sps:$4 sm:$0xff]  }
 0x1f8   : > { %4373 = vmatpush3.bf16.msra.mxu0 %v7109_v46  ;;  %v4056_v19 = vadd.f32 %v4055_v62, %v4054_v15  ;;  %v4057_v2 = vpop.f32.mrb[46].mxu1  ;;  %v4030_v8 = vpop.f32.mrb[43].mxu0  ;;  %v4920_v46 = vld [vmem:[%s6905_s1 + $0x338] sm:$0xff]  }
 0x1f9   : > { %4401 = vmatpush3.bf16.msra.mxu1 %v7110_v63  ;;  %4374 = vmatprep.subr.bf16.mxu0 %v7111_v57  ;;  %v4058_v10 = vpop.f32.mrb[47].mxu1  ;;  %v2112_v24 = vadd.f32 %v4028_v43, %v6747_v5  ;;  %v4031_v26 = vadd.f32 %v4030_v8, %v4029_v27  ;;  %v4813_v15 = vld [vmem:[%s5374_s29 + $0x308] ss:$52 sps:$4 sm:$0xff]  }
 0x1fa   : > { %4402 = vmatprep.subr.bf16.mxu1 %v7112_v1  ;;  %v4059_v28 = vadd.f32 %v4058_v10, %v4057_v2  ;;  %v7129_v62 = vld [vmem:[#allocation54_spill] sm:$0xff]  ;;  %v4816_v10 = vld [vmem:[%s5374_s29 + $0x300] ss:$52 sps:$4 sm:$0xff]  }
 0x1fb   : > { %v2115_v7 = vadd.f32 %v4031_v26, %v6753_v42  ;;  %v7118_v42 = vld [vmem:[#allocation33_spill] sm:$0xff] }
 0x1fc   : > { %4375 = vmatpush3.bf16.msra.mxu0 %v7113_v60 }
 0x1fd   : > { %4403 = vmatpush3.bf16.msra.mxu1 %v6594_v9  ;;  %4416 = vmatprep.subr.bf16.mxu0 %v7114_v14  ;;  %v6799_v9 = vadd.f32 %v4056_v19, %v2112_v24  ;;  %v6804_v5 = vadd.f32 %v4059_v28, %v2115_v7 }
 0x1fe   : > { %4514 = vmatprep.subr.bf16.mxu1 %v6606_v37 }
 0x1ff   : > { %3118 = vmatmul.mubr.bf16.vlgmr.msra.gmra.mrb[88].mxu0 %v4797_v18  ;;  %v4814_v18 = vld [vmem:[%s5374_s29 + $0x304] ss:$52 sps:$4 sm:$0xff]  }
 0x200   : > { %3167 = vmatmul.mubr.bf16.vlgmr.msra.gmra.mrb[92].mxu1 %v4800_v38  ;;  %4417 = vmatpush3.bf16.msra.mxu0 %v7115_v32 }
 0x201   : > { %4515 = vmatpush3.bf16.msra.mxu1 %v6606_v37  ;;  %4418 = vmatprep.subr.bf16.mxu0 %v7116_v34  ;;  %v4812_v37 = vld [vmem:[%s5374_s29 + $0x2a0] ss:$52 sps:$4 sm:$0xff]   ;;  %s3426_s29 = sshll.u32 %s3386_s15, 2 }
 0x202   : > { %3125 = vmatprep.mubr.bf16.mxu0 %v4803_v22  ;;  %4516 = vmatprep.subr.bf16.mxu1 %v6618_v4  ;;  %p420_p8 = scmp.lt.s32.totalorder %s3426_s29, 7 }
 0x203   : > { %3174 = vmatprep.mubr.bf16.mxu1 %v4806_v30 }
 0x204   : > { %4419 = vmatpush3.bf16.msra.mxu0 %v7117_v54  ;;  %s7134_s29 = smov (!%p420_p8, %s3426_s29), 7 }
 0x205   : > { %4517 = vmatpush3.bf16.msra.mxu1 %v6618_v4  ;;  %4420 = vmatprep.subr.bf16.mxu0 %v7118_v42  ;;  %v7122_v4 = vld [vmem:[#allocation41_spill] sm:$0xff]  ;;  %s3427_s14 = sshll.u32 %s7134_s29, 2 }
 0x206   : > { %4518 = vmatprep.subr.bf16.mxu1 %v6629_v11  ;;  %s423_s27 = scalar_lea.vmem %s6907_s3, %s3427_s14 }
 0x207   : > { %3126 = vmatmul.mubr.bf16.gmra.mrb[92].mxu0 %v4805_v17 }
 0x208   : > { %3175 = vmatmul.mubr.bf16.gmra.mrb[96].mxu1 %v4808_v50  ;;  %4421 = vmatpush3.bf16.msra.mxu0 %v7119_v33 }
 0x209   : > { %4519 = vmatpush3.bf16.msra.mxu1 %v6629_v11  ;;  %4422 = vmatprep.subr.bf16.mxu0 %v7120_v41 }
 0x20a   : > { %4520 = vmatprep.subr.bf16.mxu1 %v6640_v20  ;;  %3215 = vmatprep.mubr.bf16.mxu0 %v4811_v36 }
 0x20b   : > { %4530 = vmatprep.mubr.bf16.mxu1 %v4812_v37 }
 0x20c   : > { %4423 = vmatpush3.bf16.msra.mxu0 %v7121_v6 }
 0x20d   : > { %4521 = vmatpush3.bf16.msra.mxu1 %v6640_v20  ;;  %4424 = vmatprep.subr.bf16.mxu0 %v7122_v4  ;;  %v4076_v11 = vpop.f32.mrb[44].mxu0 }
 0x20e   : > { %4522 = vmatprep.subr.bf16.mxu1 %v6649_v49  ;;  %v4492_v29 = vpop.f32.mrb[48].mxu1  ;;  %v4077_v45 = vpop.f32.mrb[45].mxu0 }
 0x20f   : > { %v2250_v35 = vpop.f32.mrb[49].mxu1  ;;  %v4078_v59 = vadd.f32 %v4077_v45, %v4076_v11  ;;  %v4079_v25 = vpop.f32.mrb[46].mxu0 }
 0x210   : > { %4425 = vmatpush3.bf16.msra.mxu0 %v7123_v48  ;;  %v4493_v20 = vpop.f32.mrb[50].mxu1  ;;  %v4080_v40 = vpop.f32.mrb[47].mxu0 }
 0x211   : > { %4523 = vmatpush3.bf16.msra.mxu1 %v6649_v49  ;;  %4426 = vmatprep.subr.bf16.mxu0 %v7124_v21  ;;  %v2253_v49 = vpop.f32.mrb[51].mxu1  ;;  %v4081_v53 = vadd.f32 %v4080_v40, %v4079_v25  ;;  %v2202_v23 = vadd.f32 %v4078_v59, %v6781_v56 }
 0x212   : > { %4524 = vmatprep.subr.bf16.mxu1 %v6665_v16 }
 0x213   : > { %v6832_v13 = vadd.f32 %v2250_v35, %v2202_v23  ;;  %v2205_v55 = vadd.f32 %v4081_v53, %v6787_v58 }
 0x214   : > { %4427 = vmatpush3.bf16.msra.mxu0 %v7125_v61 }
 0x215   : > { %4525 = vmatpush3.bf16.msra.mxu1 %v6665_v16  ;;  %4428 = vmatprep.subr.bf16.mxu0 %v7126_v39  ;;  %v7128_v16 = vld [vmem:[#allocation53_spill] sm:$0xff]  ;;  %v2265_v63 = vmax.f32 %v6660_v51, %v6832_v13  ;;  %v6843_v56 = vadd.f32 %v2253_v49, %v2205_v55  ;;  %v4082_v57 = vpop.f32.mrb[48].mxu0 }
 0x216   : > { %4526 = vmatprep.subr.bf16.mxu1 %v6683_v3  ;;  %v4083_v1 = vpop.f32.mrb[49].mxu0 }
 0x217   : > { %v2266_v58 = vmax.f32 %v6676_v12, %v6843_v56  ;;  %v4085_v0 = vpop.f32.mrb[50].mxu0 }
 0x218   : > { %4429 = vmatpush3.bf16.msra.mxu0 %v7127_v52  ;;  %v4086_v38 = vpop.f32.mrb[51].mxu0 }
 0x219   : > { %4527 = vmatpush3.bf16.msra.mxu1 %v6683_v3  ;;  %4430 = vmatprep.subr.bf16.mxu0 %v7128_v16  ;;  %v4084_v3 = vadd.f32 %v4083_v1, %v4082_v57  ;;  %v4087_v27 = vadd.f32 %v4086_v38, %v4085_v0 }
 0x21a   : > { %4528 = vmatprep.subr.bf16.mxu1 %v4920_v46 }
 0x21b   : > { %v2210_v43 = vadd.f32 %v4084_v3, %v6799_v9  ;;  %v2213_v19 = vadd.f32 %v4087_v27, %v6804_v5 }
 0x21c   : > { %4431 = vmatpush3.bf16.msra.mxu0 %v7129_v62 }
 0x21d   : > { %4529 = vmatpush3.bf16.msra.mxu1 %v4920_v46  ;;  %v6852_v60 = vadd.f32 %v4492_v29, %v2210_v43  ;;  %v6855_v2 = vadd.f32 %v4493_v20, %v2213_v19 }
 0x21f   : > { %3216 = vmatmul.mubr.bf16.vlgmr.msra.gmra.mrb[96].mxu0 %v4809_v44  ;;  %v2267_v8 = vmax.f32 %v6657_v31, %v6852_v60  ;;  %v2268_v14 = vmax.f32 %v6671_v47, %v6855_v2 }
 0x220   : > { %4531 = vmatmul.mubr.bf16.vlgmr.msra.gmra.mrb[100].mxu1 %v4813_v15  ;;  %3223 = vmatprep.mubr.bf16.mxu0 %v4814_v18 }
 0x227   : > { %3224 = vmatmul.mubr.bf16.gmra.mrb[100].mxu0 %v4816_v10 }
 0x22d   : > { %v4114_v22 = vpop.f32.mrb[52].mxu0 }
 0x22e   : > { %v4142_v24 = vpop.f32.mrb[52].mxu1  ;;  %v4115_v26 = vpop.f32.mrb[53].mxu0 }
 0x22f   : > { %v4143_v28 = vpop.f32.mrb[53].mxu1  ;;  %v4116_v30 = vadd.f32 %v4115_v26, %v4114_v22  ;;  %v4117_v9 = vpop.f32.mrb[54].mxu0 }
 0x230   : > { %v4144_v7 = vadd.f32 %v4143_v28, %v4142_v24  ;;  %v4145_v32 = vpop.f32.mrb[54].mxu1  ;;  %v4118_v34 = vpop.f32.mrb[55].mxu0 }
 0x231   : > { %v4146_v5 = vpop.f32.mrb[55].mxu1  ;;  %v4119_v50 = vadd.f32 %v4118_v34, %v4117_v9 }
 0x232   : > { %v2514_v17 = vadd.f32 %v4144_v7, %v4116_v30  ;;  %v4147_v54 = vadd.f32 %v4146_v5, %v4145_v32 }
 0x234   : > { %v2517_v42 = vadd.f32 %v4147_v54, %v4119_v50 }
 0x235   : > { %v4120_v36 = vpop.f32.mrb[56].mxu0 }
 0x236   : > { %v4148_v37 = vpop.f32.mrb[56].mxu1  ;;  %v4121_v33 = vpop.f32.mrb[57].mxu0 }
 0x237   : > { %v4149_v41 = vpop.f32.mrb[57].mxu1  ;;  %v4122_v6 = vadd.f32 %v4121_v33, %v4120_v36  ;;  %v4123_v48 = vpop.f32.mrb[58].mxu0 }
 0x238   : > { %v4150_v4 = vadd.f32 %v4149_v41, %v4148_v37  ;;  %v4151_v21 = vpop.f32.mrb[58].mxu1  ;;  %v4124_v11 = vpop.f32.mrb[59].mxu0 }
 0x239   : > { %v4152_v29 = vpop.f32.mrb[59].mxu1  ;;  %v4125_v35 = vadd.f32 %v4124_v11, %v4123_v48 }
 0x23a   : > { %v2522_v45 = vadd.f32 %v4150_v4, %v4122_v6  ;;  %v4153_v59 = vadd.f32 %v4152_v29, %v4151_v21 }
 0x23c   : > { %v2525_v25 = vadd.f32 %v4153_v59, %v4125_v35 }
 0x252   : > { %v4170_v61 = vpop.f32.mrb[60].mxu0 }
 0x253   : > { %v4198_v20 = vpop.f32.mrb[60].mxu1  ;;  %v4171_v40 = vpop.f32.mrb[61].mxu0 }
 0x254   : > { %v4199_v39 = vpop.f32.mrb[61].mxu1  ;;  %v4172_v49 = vadd.f32 %v4171_v40, %v4170_v61  ;;  %v4173_v53 = vpop.f32.mrb[62].mxu0 }
 0x255   : > { %v4200_v23 = vadd.f32 %v4199_v39, %v4198_v20  ;;  %v4201_v52 = vpop.f32.mrb[62].mxu1  ;;  %v4174_v55 = vpop.f32.mrb[63].mxu0 }
 0x256   : > { %v4202_v16 = vpop.f32.mrb[63].mxu1  ;;  %v2563_v46 = vadd.f32 %v4172_v49, %v2514_v17  ;;  %v4175_v57 = vadd.f32 %v4174_v55, %v4173_v53 }
 0x257   : > { %v4203_v1 = vadd.f32 %v4202_v16, %v4201_v52 }
 0x258   : > { %v2566_v44 = vadd.f32 %v4175_v57, %v2517_v42  ;;  %v2612_v15 = vadd.f32 %v4200_v23, %v2563_v46 }
 0x25a   : > { %v2615_v3 = vadd.f32 %v4203_v1, %v2566_v44  ;;  %v4176_v0 = vpop.f32.mrb[64].mxu0 }
 0x25b   : > { %v4204_v62 = vpop.f32.mrb[64].mxu1  ;;  %v4177_v18 = vpop.f32.mrb[65].mxu0 }
 0x25c   : > { %v4205_v38 = vpop.f32.mrb[65].mxu1  ;;  %v4178_v43 = vadd.f32 %v4177_v18, %v4176_v0  ;;  %v4179_v27 = vpop.f32.mrb[66].mxu0 }
 0x25d   : > { %v4206_v19 = vadd.f32 %v4205_v38, %v4204_v62  ;;  %v4207_v10 = vpop.f32.mrb[66].mxu1  ;;  %v4180_v22 = vpop.f32.mrb[67].mxu0 }
 0x25e   : > { %v4208_v24 = vpop.f32.mrb[67].mxu1  ;;  %v2571_v26 = vadd.f32 %v4178_v43, %v2522_v45  ;;  %v4181_v28 = vadd.f32 %v4180_v22, %v4179_v27 }
 0x25f   : > { %v4209_v30 = vadd.f32 %v4208_v24, %v4207_v10 }
 0x260   : > { %v2574_v7 = vadd.f32 %v4181_v28, %v2525_v25  ;;  %v2620_v9 = vadd.f32 %v4206_v19, %v2571_v26 }
 0x262   : > { %v2623_v32 = vadd.f32 %v4209_v30, %v2574_v7 }
 0x272   : > { %v4226_v34 = vpop.f32.mrb[68].mxu0 }
 0x273   : > { %v4254_v5 = vpop.f32.mrb[68].mxu1  ;;  %v4227_v17 = vpop.f32.mrb[69].mxu0 }
 0x274   : > { %v4255_v50 = vpop.f32.mrb[69].mxu1  ;;  %v4228_v54 = vadd.f32 %v4227_v17, %v4226_v34  ;;  %v4229_v42 = vpop.f32.mrb[70].mxu0 }
 0x275   : > { %v4256_v36 = vadd.f32 %v4255_v50, %v4254_v5  ;;  %v4257_v37 = vpop.f32.mrb[70].mxu1  ;;  %v4230_v33 = vpop.f32.mrb[71].mxu0 }
 0x276   : > { %v4258_v41 = vpop.f32.mrb[71].mxu1  ;;  %v2661_v6 = vadd.f32 %v4228_v54, %v2612_v15  ;;  %v4231_v4 = vadd.f32 %v4230_v33, %v4229_v42 }
 0x277   : > { %v4259_v48 = vadd.f32 %v4258_v41, %v4257_v37 }
 0x278   : > { %v2664_v21 = vadd.f32 %v4231_v4, %v2615_v3  ;;  %v2710_v11 = vadd.f32 %v4256_v36, %v2661_v6 }
 0x27a   : > { %v4232_v29 = vpop.f32.mrb[72].mxu0  ;;  %v2713_v35 = vadd.f32 %v4259_v48, %v2664_v21 }
 0x27b   : > { %v4260_v45 = vpop.f32.mrb[72].mxu1  ;;  %v4233_v59 = vpop.f32.mrb[73].mxu0 }
 0x27c   : > { %v4261_v25 = vpop.f32.mrb[73].mxu1  ;;  %v4234_v61 = vadd.f32 %v4233_v59, %v4232_v29  ;;  %v4235_v20 = vpop.f32.mrb[74].mxu0 }
 0x27d   : > { %v4262_v40 = vadd.f32 %v4261_v25, %v4260_v45  ;;  %v4263_v39 = vpop.f32.mrb[74].mxu1  ;;  %v4236_v49 = vpop.f32.mrb[75].mxu0 }
 0x27e   : > { %v4264_v53 = vpop.f32.mrb[75].mxu1  ;;  %v2669_v23 = vadd.f32 %v4234_v61, %v2620_v9  ;;  %v4237_v52 = vadd.f32 %v4236_v49, %v4235_v20 }
 0x27f   : > { %v4265_v55 = vadd.f32 %v4264_v53, %v4263_v39 }
 0x280   : > { %v2672_v16 = vadd.f32 %v4237_v52, %v2623_v32  ;;  %v2718_v46 = vadd.f32 %v4262_v40, %v2669_v23 }
 0x282   : > { %v2721_v57 = vadd.f32 %v4265_v55, %v2672_v16 }
 0x292   : > { %v4512_v1 = vpop.f32.mrb[76].mxu0 }
 0x293   : > { %v4292_v44 = vpop.f32.mrb[76].mxu1  ;;  %v2767_v15 = vadd.f32 %v4512_v1, %v2718_v46  ;;  %v2758_v3 = vpop.f32.mrb[77].mxu0 }
 0x294   : > { %v4293_v0 = vpop.f32.mrb[77].mxu1  ;;  %v2759_v62 = vadd.f32 %v2758_v3, %v2710_v11  ;;  %v4513_v18 = vpop.f32.mrb[78].mxu0 }
 0x295   : > { %v4294_v38 = vadd.f32 %v4293_v0, %v4292_v44  ;;  %v4295_v43 = vpop.f32.mrb[78].mxu1  ;;  %v6865_v27 = vmax.f32 %v2267_v8, %v2767_v15  ;;  %v2770_v19 = vadd.f32 %v4513_v18, %v2721_v57  ;;  %v2761_v10 = vpop.f32.mrb[79].mxu0 }
 0x296   : > { %v4296_v22 = vpop.f32.mrb[79].mxu1  ;;  %v6870_v24 = vmax.f32 %v2265_v63, %v2759_v62  ;;  %v2762_v26 = vadd.f32 %v2761_v10, %v2713_v35 }
 0x297   : > { %v4297_v28 = vadd.f32 %v4296_v22, %v4295_v43  ;;  %v6875_v30 = vmax.f32 %v2268_v14, %v2770_v19 }
 0x298   : > { %v6880_v31 = vmax.f32 %v2266_v58, %v2762_v26 }
 0x29b   : > { %v4298_v60 = vpop.f32.mrb[80].mxu1 }
 0x29c   : > { %v4299_v8 = vpop.f32.mrb[81].mxu1 }
 0x29d   : > { %v4300_v7 = vadd.f32 %v4299_v8, %v4298_v60  ;;  %v4301_v9 = vpop.f32.mrb[82].mxu1 }
 0x29e   : > { %v4302_v32 = vpop.f32.mrb[83].mxu1 }
 0x29f   : > { %v4303_v51 = vadd.f32 %v4302_v32, %v4301_v9 }
 0x2b2   : > { %v4320_v13 = vpop.f32.mrb[80].mxu0 }
 0x2b3   : > { %v4348_v63 = vpop.f32.mrb[84].mxu1  ;;  %v4321_v34 = vpop.f32.mrb[81].mxu0 }
 0x2b4   : > { %v4349_v5 = vpop.f32.mrb[85].mxu1  ;;  %v4322_v17 = vadd.f32 %v4321_v34, %v4320_v13  ;;  %v4323_v50 = vpop.f32.mrb[82].mxu0 }
 0x2b5   : > { %v4350_v47 = vadd.f32 %v4349_v5, %v4348_v63  ;;  %v4351_v2 = vpop.f32.mrb[86].mxu1  ;;  %v4324_v14 = vpop.f32.mrb[83].mxu0 }
 0x2b6   : > { %v4352_v54 = vpop.f32.mrb[87].mxu1  ;;  %v3022_v42 = vadd.f32 %v4322_v17, %v4294_v38  ;;  %v4325_v12 = vadd.f32 %v4324_v14, %v4323_v50 }
 0x2b7   : > { %v4353_v56 = vadd.f32 %v4352_v54, %v4351_v2 }
 0x2b8   : > { %v3025_v58 = vadd.f32 %v4325_v12, %v4297_v28  ;;  %v3071_v36 = vadd.f32 %v4350_v47, %v3022_v42 }
 0x2ba   : > { %v3074_v37 = vadd.f32 %v4353_v56, %v3025_v58  ;;  %v4326_v33 = vpop.f32.mrb[84].mxu0 }
 0x2bb   : > { %v4354_v41 = vpop.f32.mrb[88].mxu1  ;;  %v4327_v6 = vpop.f32.mrb[85].mxu0 }
 0x2bc   : > { %v4355_v4 = vpop.f32.mrb[89].mxu1  ;;  %v4328_v48 = vadd.f32 %v4327_v6, %v4326_v33  ;;  %v4329_v21 = vpop.f32.mrb[86].mxu0 }
 0x2bd   : > { %v4356_v11 = vadd.f32 %v4355_v4, %v4354_v41  ;;  %v4357_v29 = vpop.f32.mrb[90].mxu1  ;;  %v4330_v45 = vpop.f32.mrb[87].mxu0  ;;  %v3720_v41 = vld [vmem:[%s6906_s2] ss:$0 sm:$0xff] }
 0x2be   : > { %v4358_v35 = vpop.f32.mrb[91].mxu1  ;;  %v3030_v59 = vadd.f32 %v4328_v48, %v4300_v7  ;;  %v4331_v25 = vadd.f32 %v4330_v45, %v4329_v21 }
 0x2bf   : > { %v4359_v61 = vadd.f32 %v4358_v35, %v4357_v29 }
 0x2c0   : > { %v3033_v20 = vadd.f32 %v4331_v25, %v4303_v51  ;;  %v3079_v40 = vadd.f32 %v4356_v11, %v3030_v59 }
 0x2c2   : > { %v3082_v39 = vadd.f32 %v4359_v61, %v3033_v20 }
 0x2d2   : > { %v4376_v49 = vpop.f32.mrb[88].mxu0 }
 0x2d3   : > { %v4404_v53 = vpop.f32.mrb[92].mxu1  ;;  %v4377_v23 = vpop.f32.mrb[89].mxu0 }
 0x2d4   : > { %v4405_v52 = vpop.f32.mrb[93].mxu1  ;;  %v4378_v55 = vadd.f32 %v4377_v23, %v4376_v49  ;;  %v4379_v16 = vpop.f32.mrb[90].mxu0 }
 0x2d5   : > { %v4406_v46 = vadd.f32 %v4405_v52, %v4404_v53  ;;  %v4407_v57 = vpop.f32.mrb[94].mxu1  ;;  %v4380_v1 = vpop.f32.mrb[91].mxu0 }
 0x2d6   : > { %v4408_v44 = vpop.f32.mrb[95].mxu1  ;;  %v3120_v15 = vadd.f32 %v4378_v55, %v3071_v36  ;;  %v4381_v3 = vadd.f32 %v4380_v1, %v4379_v16 }
 0x2d7   : > { %v4409_v0 = vadd.f32 %v4408_v44, %v4407_v57 }
 0x2d8   : > { %v3123_v62 = vadd.f32 %v4381_v3, %v3074_v37  ;;  %v3169_v18 = vadd.f32 %v4406_v46, %v3120_v15 }
 0x2da   : > { %v3172_v38 = vadd.f32 %v4409_v0, %v3123_v62  ;;  %v4382_v43 = vpop.f32.mrb[92].mxu0 }
 0x2db   : > { %v4410_v19 = vpop.f32.mrb[96].mxu1  ;;  %v4383_v10 = vpop.f32.mrb[93].mxu0 }
 0x2dc   : > { %v4411_v22 = vpop.f32.mrb[97].mxu1  ;;  %v4384_v26 = vadd.f32 %v4383_v10, %v4382_v43  ;;  %v4385_v28 = vpop.f32.mrb[94].mxu0 }
 0x2dd   : > { %v4412_v60 = vadd.f32 %v4411_v22, %v4410_v19  ;;  %v4413_v8 = vpop.f32.mrb[98].mxu1  ;;  %v4386_v7 = vpop.f32.mrb[95].mxu0 }
 0x2de   : > { %v4414_v9 = vpop.f32.mrb[99].mxu1  ;;  %v3128_v32 = vadd.f32 %v4384_v26, %v3079_v40  ;;  %v4387_v51 = vadd.f32 %v4386_v7, %v4385_v28 }
 0x2df   : > { %v4415_v13 = vadd.f32 %v4414_v9, %v4413_v8 }
 0x2e0   : > { %v3131_v63 = vadd.f32 %v4387_v51, %v3082_v39  ;;  %v3177_v34 = vadd.f32 %v4412_v60, %v3128_v32 }
 0x2e2   : > { %v3180_v5 = vadd.f32 %v4415_v13, %v3131_v63 }
 0x2f2   : > { %v4432_v17 = vpop.f32.mrb[96].mxu0 }
 0x2f3   : > { %v4532_v50 = vpop.f32.mrb[100].mxu1  ;;  %v4433_v47 = vpop.f32.mrb[97].mxu0 }
 0x2f4   : > { %v3266_v2 = vpop.f32.mrb[101].mxu1  ;;  %v4434_v14 = vadd.f32 %v4433_v47, %v4432_v17  ;;  %v4435_v54 = vpop.f32.mrb[98].mxu0 }
 0x2f5   : > { %v4533_v42 = vpop.f32.mrb[102].mxu1  ;;  %v4436_v12 = vpop.f32.mrb[99].mxu0 }
 0x2f6   : > { %v3269_v56 = vpop.f32.mrb[103].mxu1  ;;  %v4437_v58 = vadd.f32 %v4436_v12, %v4435_v54  ;;  %v3218_v36 = vadd.f32 %v4434_v14, %v3169_v18 }
 0x2f8   : > { %v3267_v37 = vadd.f32 %v3266_v2, %v3218_v36  ;;  %v3221_v33 = vadd.f32 %v4437_v58, %v3172_v38 }
 0x2fa   : > { %v3281_v6 = vmax.f32 %v6870_v24, %v3267_v37  ;;  %v3270_v4 = vadd.f32 %v3269_v56, %v3221_v33  ;;  %v4438_v48 = vpop.f32.mrb[100].mxu0 }
 0x2fb   : > { %v4439_v21 = vpop.f32.mrb[101].mxu0 }
 0x2fc   : > { %v3292_v11 = vadd.f32 %v3720_v41, %v3281_v6  ;;  %v3282_v29 = vmax.f32 %v6880_v31, %v3270_v4  ;;  %v4440_v45 = vadd.f32 %v4439_v21, %v4438_v48  ;;  %v4441_v35 = vpop.f32.mrb[102].mxu0 }
 0x2fd   : > { %v4442_v59 = vpop.f32.mrb[103].mxu0 }
 0x2fe   : > { %v3293_v25 = vadd.f32 %v3720_v41, %v3282_v29  ;;  %v3226_v61 = vadd.f32 %v4440_v45, %v3177_v34  ;;  %v4443_v20 = vadd.f32 %v4442_v59, %v4441_v35  ;;  %v3296_v40 = vmax.f32 %v3292_v11, 0.0 }
 0x300   : > { %v3297_v39 = vmax.f32 %v3293_v25, 0.0  ;;  %v3275_v49 = vadd.f32 %v4532_v50, %v3226_v61  ;;  %v3229_v53 = vadd.f32 %v4443_v20, %v3180_v5 }
 0x302   : > { %v3734_v24 = vpack.c.bf16 %v3297_v39, %v3296_v40  ;;  %v3283_v23 = vmax.f32 %v6865_v27, %v3275_v49  ;;  %v3278_v52 = vadd.f32 %v4533_v42, %v3229_v53 }
 0x304   : > { %3735 = vst [vmem:[%s423_s27] sm:$0xff] %v3734_v24   ;;  %v3294_v31 = vadd.f32 %v3720_v41, %v3283_v23  ;;  %v3284_v55 = vmax.f32 %v6875_v30, %v3278_v52 }
 0x306   : > { %v3295_v16 = vadd.f32 %v3720_v41, %v3284_v55  ;;  %v3298_v46 = vmax.f32 %v3294_v31, 0.0 }
 0x308   : > { %v3299_v57 = vmax.f32 %v3295_v16, 0.0 }
 0x30a   : > { %v3739_v1 = vpack.c.bf16 %v3299_v57, %v3298_v46 }
 0x30c   : > { %3741 = vst [vmem:[%s423_s27 + $0x8] sm:$0xff] %v3739_v1  }
 0x30d PF: > { %p10_p9 = scmp.ge.s32.totalorder %s4982_s16, 4   ;;  %s7130_s12 = smov %s4939_s13 }
 0x30e   : > { %s7131_s13 = smov %s4991_s19  ;;  %s7132_s14 = smov %s4982_s16 }
 0x30f   :  { %12 = sbr.rel (!%p10_p9) target bundleno = 2 (0x2), region = 102 }

</bundles_post_ra>
